<compile_context>
chip_gen: v6e
topology: v6e:2x2x1
jax: 0.10.0
libtpu: 0.0.40
codegen_flags: <defaults>
</compile_context>

<pallas_src>
import functools
import math

import jax
import jax.numpy as jnp
from jax import lax
from jax.experimental import pallas as pl
from jax.experimental.pallas import tpu as pltpu

_VMEM_LIMIT = 32 * 1024 * 1024   # safe on v5e/v6e (128 MiB phys) and v7x (64 MiB phys)


def _pick_tile(dim, target, unit):
    """Largest tile <= target that divides `dim` and is a multiple of `unit`
    (TPU sublane/lane granularity).  Falls back to the full dim, which always
    satisfies the (8, 128) BlockSpec rule."""
    if dim <= target:
        return dim
    t = (target // unit) * unit
    while t >= unit:
        if dim % t == 0:
            return t
        t -= unit
    return dim


# ----------------------------------------------------------------------------
# Tiled linear:  y = x @ w + b   (w stored pre-transposed as (K, N), b as (1, N))
# Used for the fused Q/K/V projection.
# ----------------------------------------------------------------------------
def _linear_kernel(x_ref, w_ref, b_ref, o_ref, acc_ref, *, relu):
    @pl.when(pl.program_id(2) == 0)
    def _():
        acc_ref[...] = jnp.zeros_like(acc_ref)

    acc_ref[...] += jnp.dot(x_ref[...], w_ref[...],
                            preferred_element_type=jnp.float32)

    @pl.when(pl.program_id(2) == pl.num_programs(2) - 1)
    def _():
        out = acc_ref[...] + b_ref[...]
        if relu:
            out = jnp.maximum(out, 0.0)
        o_ref[...] = out.astype(o_ref.dtype)


def pallas_linear(x2d, w, b, *, relu=False):
    M, K = x2d.shape
    K2, N = w.shape
    assert K == K2 and b.shape == (1, N)
    tm = _pick_tile(M, 256, 8)
    tn = _pick_tile(N, 256, 128)
    tk = _pick_tile(K, 512, 128)
    grid = (M // tm, N // tn, K // tk)
    kernel = functools.partial(_linear_kernel, relu=relu)
    return pl.pallas_call(
        kernel,
        out_shape=jax.ShapeDtypeStruct((M, N), x2d.dtype),
        grid_spec=pltpu.PrefetchScalarGridSpec(
            num_scalar_prefetch=0,
            grid=grid,
            in_specs=[
                pl.BlockSpec((tm, tk), lambda i, j, k: (i, k)),
                pl.BlockSpec((tk, tn), lambda i, j, k: (k, j)),
                pl.BlockSpec((1, tn), lambda i, j, k: (0, j)),
            ],
            out_specs=pl.BlockSpec((tm, tn), lambda i, j, k: (i, j)),
            scratch_shapes=[pltpu.VMEM((tm, tn), jnp.float32)],
        ),
        compiler_params=pltpu.CompilerParams(
            dimension_semantics=("parallel", "parallel", "arbitrary"),
            vmem_limit_bytes=_VMEM_LIMIT),
        cost_estimate=pl.CostEstimate(
            flops=2 * M * N * K, transcendentals=0,
            bytes_accessed=4 * (M * K + K * N + M * N)),
    )(x2d, w, b)


# ----------------------------------------------------------------------------
# Fused feed-forward:  y = relu(x @ w1 + b1) @ w2 + b2
# (d_ff is tiled as the accumulated contraction axis; h never touches HBM)
# ----------------------------------------------------------------------------
def _ffn_kernel(x_ref, w1_ref, b1_ref, w2_ref, b2_ref, o_ref, acc_ref):
    j = pl.program_id(1)

    @pl.when(j == 0)
    def _():
        acc_ref[...] = jnp.zeros_like(acc_ref)

    h = jnp.dot(x_ref[...], w1_ref[...],
                preferred_element_type=jnp.float32) + b1_ref[...]
    h = jnp.maximum(h, 0.0)
    acc_ref[...] += jnp.dot(h, w2_ref[...], preferred_element_type=jnp.float32)

    @pl.when(j == pl.num_programs(1) - 1)
    def _():
        o_ref[...] = (acc_ref[...] + b2_ref[...]).astype(o_ref.dtype)


def pallas_ffn(x2d, w1, b1, w2, b2):
    M, Dm = x2d.shape
    Dff = w1.shape[1]
    tm = _pick_tile(M, 256, 8)
    tf = _pick_tile(Dff, 512, 128)
    grid = (M // tm, Dff // tf)
    return pl.pallas_call(
        _ffn_kernel,
        out_shape=jax.ShapeDtypeStruct((M, Dm), x2d.dtype),
        grid_spec=pltpu.PrefetchScalarGridSpec(
            num_scalar_prefetch=0,
            grid=grid,
            in_specs=[
                pl.BlockSpec((tm, Dm), lambda i, j: (i, 0)),
                pl.BlockSpec((Dm, tf), lambda i, j: (0, j)),
                pl.BlockSpec((1, tf), lambda i, j: (0, j)),
                pl.BlockSpec((tf, Dm), lambda i, j: (j, 0)),
                pl.BlockSpec((1, Dm), lambda i, j: (0, 0)),
            ],
            out_specs=pl.BlockSpec((tm, Dm), lambda i, j: (i, 0)),
            scratch_shapes=[pltpu.VMEM((tm, Dm), jnp.float32)],
        ),
        compiler_params=pltpu.CompilerParams(
            dimension_semantics=("parallel", "arbitrary"),
            vmem_limit_bytes=_VMEM_LIMIT),
        cost_estimate=pl.CostEstimate(
            flops=4 * M * Dff * Dm, transcendentals=0,
            bytes_accessed=4 * (2 * M * Dm + 2 * Dm * Dff)),
    )(x2d, w1, b1, w2, b2)


# ----------------------------------------------------------------------------
# Attention + Wo fused: one grid step per batch element on lane-dense slabs.
# Head split, scaling, softmax, head concat and the output projection Wo all
# happen in-kernel -> the (S, d_model) attention intermediate never hits HBM.
# ----------------------------------------------------------------------------
def _attention_wo_kernel(qkv_ref, wo_ref, bo_ref, o_ref, *, num_heads, scale):
    qkv = qkv_ref[0]                      # (S, 3*Dm), lane-dense
    _, three_dm = qkv.shape
    d_model = three_dm // 3
    depth = d_model // num_heads

    q = qkv[:, :d_model] * scale          # scale folded into q (S*Dm muls, not H*S*S)
    k = qkv[:, d_model:2 * d_model]
    v = qkv[:, 2 * d_model:]

    contract_last = (((1,), (1,)), ((), ()))   # q k^T without materializing k.T
    outs = []
    for h in range(num_heads):
        lo, hi = h * depth, (h + 1) * depth
        qh, kh, vh = q[:, lo:hi], k[:, lo:hi], v[:, lo:hi]
        s = lax.dot_general(qh, kh, contract_last,
                            preferred_element_type=jnp.float32)     # (S, S)
        s = s - jnp.max(s, axis=-1, keepdims=True)
        p = jnp.exp(s)
        # EUP approx reciprocal: normalization off the VALU critical path.
        p = p * pl.reciprocal(jnp.sum(p, axis=-1, keepdims=True), approx=True)
        outs.append(jnp.dot(p, vh, preferred_element_type=jnp.float32))
    attn = jnp.concatenate(outs, axis=-1)                            # (S, Dm)
    out = jnp.dot(attn, wo_ref[...],
                  preferred_element_type=jnp.float32) + bo_ref[...]  # Wo fused
    o_ref[0] = out.astype(o_ref.dtype)    # single unmasked lane-dense store


def pallas_attention_wo(qkv, wo, bo, num_heads):
    """qkv: (B, S, 3*d_model) fused projections -> (B, S, d_model) = Wo(attention)."""
    # TODO(synk): the optional additive `mask` of the PyTorch forward is not
    # plumbed through (module is exercised with mask=None); for long S switch
    # to an online-softmax (flash) form with a KV-tile grid axis.
    B, S, three_dm = qkv.shape
    d_model = three_dm // 3
    depth = d_model // num_heads
    scale = 1.0 / math.sqrt(float(depth))
    kernel = functools.partial(_attention_wo_kernel, num_heads=num_heads, scale=scale)
    return pl.pallas_call(
        kernel,
        out_shape=jax.ShapeDtypeStruct((B, S, d_model), qkv.dtype),
        grid=(B,),
        in_specs=[
            pl.BlockSpec((1, S, three_dm), lambda b: (b, 0, 0)),
            pl.BlockSpec((d_model, d_model), lambda b: (0, 0)),  # resident weight
            pl.BlockSpec((1, d_model), lambda b: (0, 0)),
        ],
        out_specs=pl.BlockSpec((1, S, d_model), lambda b: (b, 0, 0)),
        compiler_params=pltpu.CompilerParams(
            dimension_semantics=("parallel",),
            vmem_limit_bytes=_VMEM_LIMIT),
        cost_estimate=pl.CostEstimate(
            flops=4 * B * num_heads * S * S * depth + 2 * B * S * d_model * d_model,
            transcendentals=B * num_heads * S * S,
            bytes_accessed=4 * (B * S * three_dm + d_model * d_model
                                + B * S * d_model)),
    )(qkv, wo, bo)


# ----------------------------------------------------------------------------
# Parameter init (PyTorch nn.Linear semantics; weights stored pre-transposed)
# ----------------------------------------------------------------------------
def init_linear(key, in_f, out_f):
    kw, kb = jax.random.split(key)
    bound = 1.0 / math.sqrt(in_f)
    w = jax.random.uniform(kw, (out_f, in_f), jnp.float32, -bound, bound)
    b = jax.random.uniform(kb, (out_f,), jnp.float32, -bound, bound)
    return {"w": w.T, "b": b.reshape(1, out_f)}      # (K, N), (1, N)


def init_layer(key, d_model, d_ff):
    keys = jax.random.split(key, 6)
    wq = init_linear(keys[0], d_model, d_model)
    wk = init_linear(keys[1], d_model, d_model)
    wv = init_linear(keys[2], d_model, d_model)
    return {
        # Q/K/V fused once at init: one (Dm, 3*Dm) matmul per layer instead of three.
        "Wqkv": {"w": jnp.concatenate([wq["w"], wk["w"], wv["w"]], axis=1),
                 "b": jnp.concatenate([wq["b"], wk["b"], wv["b"]], axis=1)},
        "Wo": init_linear(keys[3], d_model, d_model),
        "lin1": init_linear(keys[4], d_model, d_ff),
        "lin2": init_linear(keys[5], d_ff, d_model),
    }


def init_encoder(key, num_layers, d_model, d_ff):
    return [init_layer(k, d_model, d_ff) for k in jax.random.split(key, num_layers)]


# ----------------------------------------------------------------------------
# Forward pass (3 pallas_calls per layer: QKV, attention+Wo, FFN)
# ----------------------------------------------------------------------------
def encoder_layer_forward(params, x, num_heads):
    B, S, Dm = x.shape
    x2d = x.reshape(B * S, Dm)
    qkv = pallas_linear(x2d, params["Wqkv"]["w"], params["Wqkv"]["b"])   # (B*S, 3*Dm)
    attn_out = pallas_attention_wo(qkv.reshape(B, S, 3 * Dm),
                                   params["Wo"]["w"], params["Wo"]["b"],
                                   num_heads)                            # (B, S, Dm)
    out = pallas_ffn(attn_out.reshape(B * S, Dm),
                     params["lin1"]["w"], params["lin1"]["b"],
                     params["lin2"]["w"], params["lin2"]["b"])
    return out.reshape(B, S, Dm)


def transformer_encoder_forward(all_params, x, num_heads):
    for layer_params in all_params:
        x = encoder_layer_forward(layer_params, x, num_heads)
    return x


# ----------------------------------------------------------------------------
# Pure-JAX reference (correctness check)
# ----------------------------------------------------------------------------
def ref_forward(all_params, x, num_heads):
    B, S, Dm = x.shape
    depth = Dm // num_heads

    def lin(t, pp):
        return t @ pp["w"] + pp["b"]

    for p in all_params:
        qkv = lin(x, p["Wqkv"])
        q, k, v = jnp.split(qkv, 3, axis=-1)

        def heads(t):
            return t.reshape(B, S, num_heads, depth).transpose(0, 2, 1, 3)

        scores = jnp.einsum("bhqd,bhkd->bhqk", heads(q), heads(k)) / math.sqrt(depth)
        w = jax.nn.softmax(scores, axis=-1)
        a = jnp.einsum("bhqk,bhkd->bhqd", w, heads(v))
        a = a.transpose(0, 2, 1, 3).reshape(B, S, Dm)
        a = lin(a, p["Wo"])
        h = jax.nn.relu(lin(a, p["lin1"]))
        x = lin(h, p["lin2"])
    return x


# ----------------------------------------------------------------------------
if __name__ == "__main__":
    # Small, lane-friendly shapes consistent with the module structure
    # (spec uses d_model=512, d_ff=2048, num_heads=8 — scaled down here).
    batch, seq, d_model, num_heads, d_ff, num_layers = 2, 16, 128, 8, 512, 2

    key = jax.random.PRNGKey(0)
    k_params, k_x = jax.random.split(key)
    params = init_encoder(k_params, num_layers, d_model, d_ff)
    x = jax.random.normal(k_x, (batch, seq, d_model), jnp.float32)

    fwd = jax.jit(lambda p, xx: transformer_encoder_forward(p, xx, num_heads))
    out = jax.block_until_ready(fwd(params, x))

    ref = ref_forward(params, x, num_heads)
    assert out.shape == (batch, seq, d_model)
    # Tolerance accounts for the approx-reciprocal softmax normalization
    # (pl.reciprocal(approx=True)); set approx=False for ~1e-4 parity.
    max_err = float(jnp.max(jnp.abs(out - ref)))
    assert max_err < 5e-3, f"mismatch vs reference: max abs err {max_err}"

    print("KERNEL_OK")
</pallas_src>

<mosaic_0001>
module attributes {stable_mosaic.version = 11 : i64} {
  func.func @_linear_kernel(%arg0: i32, %arg1: i32, %arg2: i32, %arg3: memref<32x128xf32, #tpu.memory_space<vmem>>, %arg4: memref<128x128xf32, #tpu.memory_space<vmem>>, %arg5: memref<1x128xf32, #tpu.memory_space<vmem>>, %arg6: memref<32x128xf32, #tpu.memory_space<vmem>>, %arg7: memref<32x128xf32, #tpu.memory_space<vmem>>) attributes {dimension_semantics = [#tpu.dimension_semantics<parallel>, #tpu.dimension_semantics<parallel>, #tpu.dimension_semantics<arbitrary>], iteration_bounds = array<i64: 1, 3, 1>, scalar_prefetch = 0 : i64, scratch_operands = 1 : i64, tpu.core_type = #tpu.core_type<tc>, window_params = [{transform_indices = @transform_0, window_bounds = array<i64: 32, 128>}, {transform_indices = @transform_1, window_bounds = array<i64: 128, 128>}, {transform_indices = @transform_2, window_bounds = array<i64: 1, 128>}, {transform_indices = @transform_3, window_bounds = array<i64: 32, 128>}]} {
    %c0_i32 = arith.constant 0 : i32
    %0 = arith.cmpi eq, %arg2, %c0_i32 : i32
    %1 = arith.extui %0 : i1 to i32
    %c0_i32_0 = arith.constant 0 : i32
    %2 = arith.cmpi ne, %1, %c0_i32_0 : i32
    scf.if %2 {
      %cst_10 = arith.constant 0.000000e+00 : f32
      %12 = vector.broadcast %cst_10 : f32 to vector<32x128xf32>
      %c0_11 = arith.constant 0 : index
      %c0_12 = arith.constant 0 : index
      %13 = vector.load %arg7[%c0_11, %c0_12] : memref<32x128xf32, #tpu.memory_space<vmem>>, vector<32x128xf32>
      tpu.vector_store %arg7[%c0_11, %c0_12], %12 {strides = array<i32>} : memref<32x128xf32, #tpu.memory_space<vmem>>, vector<32x128xf32>,
    } else {
    }
    %c0 = arith.constant 0 : index
    %c0_1 = arith.constant 0 : index
    %3 = vector.load %arg7[%c0, %c0_1] : memref<32x128xf32, #tpu.memory_space<vmem>>, vector<32x128xf32>
    %c0_2 = arith.constant 0 : index
    %c0_3 = arith.constant 0 : index
    %4 = vector.load %arg3[%c0_2, %c0_3] : memref<32x128xf32, #tpu.memory_space<vmem>>, vector<32x128xf32>
    %c0_4 = arith.constant 0 : index
    %c0_5 = arith.constant 0 : index
    %5 = vector.load %arg4[%c0_4, %c0_5] : memref<128x128xf32, #tpu.memory_space<vmem>>, vector<128x128xf32>
    %cst = arith.constant dense<0.000000e+00> : vector<32x128xf32>
    %6 = tpu.matmul %4, %5, %cst {dimension_numbers = #tpu.dot_dimension_numbers<[1], [0], [0], [1], [0, 0, 1, 1], [], []>} : vector<32x128xf32>, vector<128x128xf32>, vector<32x128xf32> -> vector<32x128xf32>
    %7 = arith.addf %3, %6 : vector<32x128xf32>
    %c0_6 = arith.constant 0 : index
    %c0_7 = arith.constant 0 : index
    %8 = vector.load %arg7[%c0_6, %c0_7] : memref<32x128xf32, #tpu.memory_space<vmem>>, vector<32x128xf32>
    tpu.vector_store %arg7[%c0_6, %c0_7], %7 {strides = array<i32>} : memref<32x128xf32, #tpu.memory_space<vmem>>, vector<32x128xf32>,
    %c0_i32_8 = arith.constant 0 : i32
    %9 = arith.cmpi eq, %arg2, %c0_i32_8 : i32
    %10 = arith.extui %9 : i1 to i32
    %c0_i32_9 = arith.constant 0 : i32
    %11 = arith.cmpi ne, %10, %c0_i32_9 : i32
    scf.if %11 {
      %c0_10 = arith.constant 0 : index
      %c0_11 = arith.constant 0 : index
      %12 = vector.load %arg7[%c0_10, %c0_11] : memref<32x128xf32, #tpu.memory_space<vmem>>, vector<32x128xf32>
      %c0_12 = arith.constant 0 : index
      %c0_13 = arith.constant 0 : index
      %13 = vector.load %arg5[%c0_12, %c0_13] : memref<1x128xf32, #tpu.memory_space<vmem>>, vector<1x128xf32>
      %14 = vector.broadcast %13 : vector<1x128xf32> to vector<32x128xf32>
      %15 = arith.addf %12, %14 : vector<32x128xf32>
      %c0_14 = arith.constant 0 : index
      %c0_15 = arith.constant 0 : index
      %16 = vector.load %arg6[%c0_14, %c0_15] : memref<32x128xf32, #tpu.memory_space<vmem>>, vector<32x128xf32>
      tpu.vector_store %arg6[%c0_14, %c0_15], %15 {strides = array<i32>} : memref<32x128xf32, #tpu.memory_space<vmem>>, vector<32x128xf32>,
    } else {
    }
    return
  }
  func.func @transform_0(%arg0: i32, %arg1: i32, %arg2: i32) -> (i32, i32) {
    %c0_i32 = arith.constant 0 : i32
    return %arg0, %arg2 : i32, i32
  }
  func.func @transform_1(%arg0: i32, %arg1: i32, %arg2: i32) -> (i32, i32) {
    %c0_i32 = arith.constant 0 : i32
    return %arg2, %arg1 : i32, i32
  }
  func.func @transform_2(%arg0: i32, %arg1: i32, %arg2: i32) -> (i32, i32) {
    %c0_i32 = arith.constant 0 : i32
    %c0_i32_0 = arith.constant 0 : i32
    return %c0_i32, %arg1 : i32, i32
  }
  func.func @transform_3(%arg0: i32, %arg1: i32, %arg2: i32) -> (i32, i32) {
    %c0_i32 = arith.constant 0 : i32
    return %arg0, %arg1 : i32, i32
  }
}

module attributes {stable_mosaic.version = 11 : i64} {
  func.func @_ffn_kernel(%arg0: i32, %arg1: i32, %arg2: memref<32x128xf32, #tpu.memory_space<vmem>>, %arg3: memref<128x512xf32, #tpu.memory_space<vmem>>, %arg4: memref<1x512xf32, #tpu.memory_space<vmem>>, %arg5: memref<512x128xf32, #tpu.memory_space<vmem>>, %arg6: memref<1x128xf32, #tpu.memory_space<vmem>>, %arg7: memref<32x128xf32, #tpu.memory_space<vmem>>, %arg8: memref<32x128xf32, #tpu.memory_space<vmem>>) attributes {dimension_semantics = [#tpu.dimension_semantics<parallel>, #tpu.dimension_semantics<arbitrary>], iteration_bounds = array<i64: 1, 1>, scalar_prefetch = 0 : i64, scratch_operands = 1 : i64, tpu.core_type = #tpu.core_type<tc>, window_params = [{transform_indices = @transform_0, window_bounds = array<i64: 32, 128>}, {transform_indices = @transform_1, window_bounds = array<i64: 128, 512>}, {transform_indices = @transform_2, window_bounds = array<i64: 1, 512>}, {transform_indices = @transform_3, window_bounds = array<i64: 512, 128>}, {pipeline_mode = #tpu.pipeline_mode<synchronous>, transform_indices = @transform_4, window_bounds = array<i64: 1, 128>}, {transform_indices = @transform_5, window_bounds = array<i64: 32, 128>}]} {
    %c0_i32 = arith.constant 0 : i32
    %0 = arith.cmpi eq, %arg1, %c0_i32 : i32
    %1 = arith.extui %0 : i1 to i32
    %c0_i32_0 = arith.constant 0 : i32
    %2 = arith.cmpi ne, %1, %c0_i32_0 : i32
    scf.if %2 {
      %cst_16 = arith.constant 0.000000e+00 : f32
      %19 = vector.broadcast %cst_16 : f32 to vector<32x128xf32>
      %c0_17 = arith.constant 0 : index
      %c0_18 = arith.constant 0 : index
      %20 = vector.load %arg8[%c0_17, %c0_18] : memref<32x128xf32, #tpu.memory_space<vmem>>, vector<32x128xf32>
      tpu.vector_store %arg8[%c0_17, %c0_18], %19 {strides = array<i32>} : memref<32x128xf32, #tpu.memory_space<vmem>>, vector<32x128xf32>,
    } else {
    }
    %c0 = arith.constant 0 : index
    %c0_1 = arith.constant 0 : index
    %3 = vector.load %arg2[%c0, %c0_1] : memref<32x128xf32, #tpu.memory_space<vmem>>, vector<32x128xf32>
    %c0_2 = arith.constant 0 : index
    %c0_3 = arith.constant 0 : index
    %4 = vector.load %arg3[%c0_2, %c0_3] : memref<128x512xf32, #tpu.memory_space<vmem>>, vector<128x512xf32>
    %cst = arith.constant dense<0.000000e+00> : vector<32x512xf32>
    %5 = tpu.matmul %3, %4, %cst {dimension_numbers = #tpu.dot_dimension_numbers<[1], [0], [0], [1], [0, 0, 1, 1], [], []>} : vector<32x128xf32>, vector<128x512xf32>, vector<32x512xf32> -> vector<32x512xf32>
    %c0_4 = arith.constant 0 : index
    %c0_5 = arith.constant 0 : index
    %6 = vector.load %arg4[%c0_4, %c0_5] : memref<1x512xf32, #tpu.memory_space<vmem>>, vector<1x512xf32>
    %7 = vector.broadcast %6 : vector<1x512xf32> to vector<32x512xf32>
    %8 = arith.addf %5, %7 : vector<32x512xf32>
    %cst_6 = arith.constant 0.000000e+00 : f32
    %9 = vector.broadcast %cst_6 : f32 to vector<32x512xf32>
    %10 = arith.maximumf %8, %9 : vector<32x512xf32>
    %c0_7 = arith.constant 0 : index
    %c0_8 = arith.constant 0 : index
    %11 = vector.load %arg8[%c0_7, %c0_8] : memref<32x128xf32, #tpu.memory_space<vmem>>, vector<32x128xf32>
    %c0_9 = arith.constant 0 : index
    %c0_10 = arith.constant 0 : index
    %12 = vector.load %arg5[%c0_9, %c0_10] : memref<512x128xf32, #tpu.memory_space<vmem>>, vector<512x128xf32>
    %cst_11 = arith.constant dense<0.000000e+00> : vector<32x128xf32>
    %13 = tpu.matmul %10, %12, %cst_11 {dimension_numbers = #tpu.dot_dimension_numbers<[1], [0], [0], [1], [0, 0, 1, 1], [], []>} : vector<32x512xf32>, vector<512x128xf32>, vector<32x128xf32> -> vector<32x128xf32>
    %14 = arith.addf %11, %13 : vector<32x128xf32>
    %c0_12 = arith.constant 0 : index
    %c0_13 = arith.constant 0 : index
    %15 = vector.load %arg8[%c0_12, %c0_13] : memref<32x128xf32, #tpu.memory_space<vmem>>, vector<32x128xf32>
    tpu.vector_store %arg8[%c0_12, %c0_13], %14 {strides = array<i32>} : memref<32x128xf32, #tpu.memory_space<vmem>>, vector<32x128xf32>,
    %c0_i32_14 = arith.constant 0 : i32
    %16 = arith.cmpi eq, %arg1, %c0_i32_14 : i32
    %17 = arith.extui %16 : i1 to i32
    %c0_i32_15 = arith.constant 0 : i32
    %18 = arith.cmpi ne, %17, %c0_i32_15 : i32
    scf.if %18 {
      %c0_16 = arith.constant 0 : index
      %c0_17 = arith.constant 0 : index
      %19 = vector.load %arg8[%c0_16, %c0_17] : memref<32x128xf32, #tpu.memory_space<vmem>>, vector<32x128xf32>
      %c0_18 = arith.constant 0 : index
      %c0_19 = arith.constant 0 : index
      %20 = vector.load %arg6[%c0_18, %c0_19] : memref<1x128xf32, #tpu.memory_space<vmem>>, vector<1x128xf32>
      %21 = vector.broadcast %20 : vector<1x128xf32> to vector<32x128xf32>
      %22 = arith.addf %19, %21 : vector<32x128xf32>
      %c0_20 = arith.constant 0 : index
      %c0_21 = arith.constant 0 : index
      %23 = vector.load %arg7[%c0_20, %c0_21] : memref<32x128xf32, #tpu.memory_space<vmem>>, vector<32x128xf32>
      tpu.vector_store %arg7[%c0_20, %c0_21], %22 {strides = array<i32>} : memref<32x128xf32, #tpu.memory_space<vmem>>, vector<32x128xf32>,
    } else {
    }
    return
  }
  func.func @transform_0(%arg0: i32, %arg1: i32) -> (i32, i32) {
    %c0_i32 = arith.constant 0 : i32
    %c0_i32_0 = arith.constant 0 : i32
    return %arg0, %c0_i32 : i32, i32
  }
  func.func @transform_1(%arg0: i32, %arg1: i32) -> (i32, i32) {
    %c0_i32 = arith.constant 0 : i32
    %c0_i32_0 = arith.constant 0 : i32
    return %c0_i32, %arg1 : i32, i32
  }
  func.func @transform_2(%arg0: i32, %arg1: i32) -> (i32, i32) {
    %c0_i32 = arith.constant 0 : i32
    %c0_i32_0 = arith.constant 0 : i32
    return %c0_i32, %arg1 : i32, i32
  }
  func.func @transform_3(%arg0: i32, %arg1: i32) -> (i32, i32) {
    %c0_i32 = arith.constant 0 : i32
    %c0_i32_0 = arith.constant 0 : i32
    return %arg1, %c0_i32 : i32, i32
  }
  func.func @transform_4(%arg0: i32, %arg1: i32) -> (i32, i32) {
    %c0_i32 = arith.constant 0 : i32
    %c0_i32_0 = arith.constant 0 : i32
    %c0_i32_1 = arith.constant 0 : i32
    return %c0_i32, %c0_i32_0 : i32, i32
  }
  func.func @transform_5(%arg0: i32, %arg1: i32) -> (i32, i32) {
    %c0_i32 = arith.constant 0 : i32
    %c0_i32_0 = arith.constant 0 : i32
    return %arg0, %c0_i32 : i32, i32
  }
}

module attributes {stable_mosaic.version = 11 : i64} {
  func.func @_linear_kernel(%arg0: i32, %arg1: i32, %arg2: i32, %arg3: memref<32x128xf32, #tpu.memory_space<vmem>>, %arg4: memref<128x128xf32, #tpu.memory_space<vmem>>, %arg5: memref<1x128xf32, #tpu.memory_space<vmem>>, %arg6: memref<32x128xf32, #tpu.memory_space<vmem>>, %arg7: memref<32x128xf32, #tpu.memory_space<vmem>>) attributes {dimension_semantics = [#tpu.dimension_semantics<parallel>, #tpu.dimension_semantics<parallel>, #tpu.dimension_semantics<arbitrary>], iteration_bounds = array<i64: 1, 3, 1>, scalar_prefetch = 0 : i64, scratch_operands = 1 : i64, tpu.core_type = #tpu.core_type<tc>, window_params = [{transform_indices = @transform_0, window_bounds = array<i64: 32, 128>}, {transform_indices = @transform_1, window_bounds = array<i64: 128, 128>}, {transform_indices = @transform_2, window_bounds = array<i64: 1, 128>}, {transform_indices = @transform_3, window_bounds = array<i64: 32, 128>}]} {
    %c0_i32 = arith.constant 0 : i32
    %0 = arith.cmpi eq, %arg2, %c0_i32 : i32
    %1 = arith.extui %0 : i1 to i32
    %c0_i32_0 = arith.constant 0 : i32
    %2 = arith.cmpi ne, %1, %c0_i32_0 : i32
    scf.if %2 {
      %cst_10 = arith.constant 0.000000e+00 : f32
      %12 = vector.broadcast %cst_10 : f32 to vector<32x128xf32>
      %c0_11 = arith.constant 0 : index
      %c0_12 = arith.constant 0 : index
      %13 = vector.load %arg7[%c0_11, %c0_12] : memref<32x128xf32, #tpu.memory_space<vmem>>, vector<32x128xf32>
      tpu.vector_store %arg7[%c0_11, %c0_12], %12 {strides = array<i32>} : memref<32x128xf32, #tpu.memory_space<vmem>>, vector<32x128xf32>,
    } else {
    }
    %c0 = arith.constant 0 : index
    %c0_1 = arith.constant 0 : index
    %3 = vector.load %arg7[%c0, %c0_1] : memref<32x128xf32, #tpu.memory_space<vmem>>, vector<32x128xf32>
    %c0_2 = arith.constant 0 : index
    %c0_3 = arith.constant 0 : index
    %4 = vector.load %arg3[%c0_2, %c0_3] : memref<32x128xf32, #tpu.memory_space<vmem>>, vector<32x128xf32>
    %c0_4 = arith.constant 0 : index
    %c0_5 = arith.constant 0 : index
    %5 = vector.load %arg4[%c0_4, %c0_5] : memref<128x128xf32, #tpu.memory_space<vmem>>, vector<128x128xf32>
    %cst = arith.constant dense<0.000000e+00> : vector<32x128xf32>
    %6 = tpu.matmul %4, %5, %cst {dimension_numbers = #tpu.dot_dimension_numbers<[1], [0], [0], [1], [0, 0, 1, 1], [], []>} : vector<32x128xf32>, vector<128x128xf32>, vector<32x128xf32> -> vector<32x128xf32>
    %7 = arith.addf %3, %6 : vector<32x128xf32>
    %c0_6 = arith.constant 0 : index
    %c0_7 = arith.constant 0 : index
    %8 = vector.load %arg7[%c0_6, %c0_7] : memref<32x128xf32, #tpu.memory_space<vmem>>, vector<32x128xf32>
    tpu.vector_store %arg7[%c0_6, %c0_7], %7 {strides = array<i32>} : memref<32x128xf32, #tpu.memory_space<vmem>>, vector<32x128xf32>,
    %c0_i32_8 = arith.constant 0 : i32
    %9 = arith.cmpi eq, %arg2, %c0_i32_8 : i32
    %10 = arith.extui %9 : i1 to i32
    %c0_i32_9 = arith.constant 0 : i32
    %11 = arith.cmpi ne, %10, %c0_i32_9 : i32
    scf.if %11 {
      %c0_10 = arith.constant 0 : index
      %c0_11 = arith.constant 0 : index
      %12 = vector.load %arg7[%c0_10, %c0_11] : memref<32x128xf32, #tpu.memory_space<vmem>>, vector<32x128xf32>
      %c0_12 = arith.constant 0 : index
      %c0_13 = arith.constant 0 : index
      %13 = vector.load %arg5[%c0_12, %c0_13] : memref<1x128xf32, #tpu.memory_space<vmem>>, vector<1x128xf32>
      %14 = vector.broadcast %13 : vector<1x128xf32> to vector<32x128xf32>
      %15 = arith.addf %12, %14 : vector<32x128xf32>
      %c0_14 = arith.constant 0 : index
      %c0_15 = arith.constant 0 : index
      %16 = vector.load %arg6[%c0_14, %c0_15] : memref<32x128xf32, #tpu.memory_space<vmem>>, vector<32x128xf32>
      tpu.vector_store %arg6[%c0_14, %c0_15], %15 {strides = array<i32>} : memref<32x128xf32, #tpu.memory_space<vmem>>, vector<32x128xf32>,
    } else {
    }
    return
  }
  func.func @transform_0(%arg0: i32, %arg1: i32, %arg2: i32) -> (i32, i32) {
    %c0_i32 = arith.constant 0 : i32
    return %arg0, %arg2 : i32, i32
  }
  func.func @transform_1(%arg0: i32, %arg1: i32, %arg2: i32) -> (i32, i32) {
    %c0_i32 = arith.constant 0 : i32
    return %arg2, %arg1 : i32, i32
  }
  func.func @transform_2(%arg0: i32, %arg1: i32, %arg2: i32) -> (i32, i32) {
    %c0_i32 = arith.constant 0 : i32
    %c0_i32_0 = arith.constant 0 : i32
    return %c0_i32, %arg1 : i32, i32
  }
  func.func @transform_3(%arg0: i32, %arg1: i32, %arg2: i32) -> (i32, i32) {
    %c0_i32 = arith.constant 0 : i32
    return %arg0, %arg1 : i32, i32
  }
}

module attributes {stable_mosaic.version = 11 : i64} {
  func.func @_attention_wo_kernel(%arg0: i32, %arg1: memref<1x16x384xf32, #tpu.memory_space<vmem>>, %arg2: memref<128x128xf32, #tpu.memory_space<vmem>>, %arg3: memref<1x128xf32, #tpu.memory_space<vmem>>, %arg4: memref<1x16x128xf32, #tpu.memory_space<vmem>>) attributes {dimension_semantics = [#tpu.dimension_semantics<parallel>], iteration_bounds = array<i64: 2>, scalar_prefetch = 0 : i64, scratch_operands = 0 : i64, tpu.core_type = #tpu.core_type<tc>, window_params = [{transform_indices = @transform_0, window_bounds = array<i64: 1, 16, 384>}, {pipeline_mode = #tpu.pipeline_mode<synchronous>, transform_indices = @transform_1, window_bounds = array<i64: 128, 128>}, {pipeline_mode = #tpu.pipeline_mode<synchronous>, transform_indices = @transform_2, window_bounds = array<i64: 1, 128>}, {transform_indices = @transform_3, window_bounds = array<i64: 1, 16, 128>}]} {
    %c0 = arith.constant 0 : index
    %c0_0 = arith.constant 0 : index
    %c0_1 = arith.constant 0 : index
    %0 = vector.load %arg1[%c0, %c0_0, %c0_1] : memref<1x16x384xf32, #tpu.memory_space<vmem>>, vector<1x16x384xf32>
    %1 = vector.shape_cast %0 : vector<1x16x384xf32> to vector<16x384xf32>
    %2 = vector.extract_strided_slice %1 {offsets = [0, 0], sizes = [16, 128], strides = [1, 1]} : vector<16x384xf32> to vector<16x128xf32>
    %cst = arith.constant 2.500000e-01 : f32
    %3 = vector.broadcast %cst : f32 to vector<16x128xf32>
    %4 = arith.mulf %2, %3 : vector<16x128xf32>
    %5 = vector.extract_strided_slice %1 {offsets = [0, 128], sizes = [16, 128], strides = [1, 1]} : vector<16x384xf32> to vector<16x128xf32>
    %6 = vector.extract_strided_slice %1 {offsets = [0, 256], sizes = [16, 128], strides = [1, 1]} : vector<16x384xf32> to vector<16x128xf32>
    %7 = vector.extract_strided_slice %4 {offsets = [0, 0], sizes = [16, 16], strides = [1, 1]} : vector<16x128xf32> to vector<16x16xf32>
    %8 = vector.extract_strided_slice %5 {offsets = [0, 0], sizes = [16, 16], strides = [1, 1]} : vector<16x128xf32> to vector<16x16xf32>
    %9 = vector.extract_strided_slice %6 {offsets = [0, 0], sizes = [16, 16], strides = [1, 1]} : vector<16x128xf32> to vector<16x16xf32>
    %cst_2 = arith.constant dense<0.000000e+00> : vector<16x16xf32>
    %10 = tpu.matmul %7, %8, %cst_2 {dimension_numbers = #tpu.dot_dimension_numbers<[1], [1], [0], [0], [0, 0, 1, 0], [], []>} : vector<16x16xf32>, vector<16x16xf32>, vector<16x16xf32> -> vector<16x16xf32>
    %cst_3 = arith.constant dense<0xFF800000> : vector<16xf32>
    %11 = vector.multi_reduction <maximumf>, %10, %cst_3 [1] : vector<16x16xf32> to vector<16xf32>
    %12 = vector.shape_cast %11 : vector<16xf32> to vector<16x1xf32>
    %13 = vector.broadcast %12 : vector<16x1xf32> to vector<16x16xf32>
    %14 = arith.subf %10, %13 : vector<16x16xf32>
    %15 = math.exp %14 : vector<16x16xf32>
    %cst_4 = arith.constant dense<0.000000e+00> : vector<16xf32>
    %16 = vector.multi_reduction <add>, %15, %cst_4 [1] : vector<16x16xf32> to vector<16xf32>
    %17 = vector.shape_cast %16 : vector<16xf32> to vector<16x1xf32>
    %18 = tpu.reciprocal %17 {approx = true} : vector<16x1xf32> -> vector<16x1xf32>
    %19 = vector.broadcast %18 : vector<16x1xf32> to vector<16x16xf32>
    %20 = arith.mulf %15, %19 : vector<16x16xf32>
    %cst_5 = arith.constant dense<0.000000e+00> : vector<16x16xf32>
    %21 = tpu.matmul %20, %9, %cst_5 {dimension_numbers = #tpu.dot_dimension_numbers<[1], [0], [0], [1], [0, 0, 1, 1], [], []>} : vector<16x16xf32>, vector<16x16xf32>, vector<16x16xf32> -> vector<16x16xf32>
    %22 = vector.extract_strided_slice %4 {offsets = [0, 16], sizes = [16, 16], strides = [1, 1]} : vector<16x128xf32> to vector<16x16xf32>
    %23 = vector.extract_strided_slice %5 {offsets = [0, 16], sizes = [16, 16], strides = [1, 1]} : vector<16x128xf32> to vector<16x16xf32>
    %24 = vector.extract_strided_slice %6 {offsets = [0, 16], sizes = [16, 16], strides = [1, 1]} : vector<16x128xf32> to vector<16x16xf32>
    %cst_6 = arith.constant dense<0.000000e+00> : vector<16x16xf32>
    %25 = tpu.matmul %22, %23, %cst_6 {dimension_numbers = #tpu.dot_dimension_numbers<[1], [1], [0], [0], [0, 0, 1, 0], [], []>} : vector<16x16xf32>, vector<16x16xf32>, vector<16x16xf32> -> vector<16x16xf32>
    %cst_7 = arith.constant dense<0xFF800000> : vector<16xf32>
    %26 = vector.multi_reduction <maximumf>, %25, %cst_7 [1] : vector<16x16xf32> to vector<16xf32>
    %27 = vector.shape_cast %26 : vector<16xf32> to vector<16x1xf32>
    %28 = vector.broadcast %27 : vector<16x1xf32> to vector<16x16xf32>
    %29 = arith.subf %25, %28 : vector<16x16xf32>
    %30 = math.exp %29 : vector<16x16xf32>
    %cst_8 = arith.constant dense<0.000000e+00> : vector<16xf32>
    %31 = vector.multi_reduction <add>, %30, %cst_8 [1] : vector<16x16xf32> to vector<16xf32>
    %32 = vector.shape_cast %31 : vector<16xf32> to vector<16x1xf32>
    %33 = tpu.reciprocal %32 {approx = true} : vector<16x1xf32> -> vector<16x1xf32>
    %34 = vector.broadcast %33 : vector<16x1xf32> to vector<16x16xf32>
    %35 = arith.mulf %30, %34 : vector<16x16xf32>
    %cst_9 = arith.constant dense<0.000000e+00> : vector<16x16xf32>
    %36 = tpu.matmul %35, %24, %cst_9 {dimension_numbers = #tpu.dot_dimension_numbers<[1], [0], [0], [1], [0, 0, 1, 1], [], []>} : vector<16x16xf32>, vector<16x16xf32>, vector<16x16xf32> -> vector<16x16xf32>
    %37 = vector.extract_strided_slice %4 {offsets = [0, 32], sizes = [16, 16], strides = [1, 1]} : vector<16x128xf32> to vector<16x16xf32>
    %38 = vector.extract_strided_slice %5 {offsets = [0, 32], sizes = [16, 16], strides = [1, 1]} : vector<16x128xf32> to vector<16x16xf32>
    %39 = vector.extract_strided_slice %6 {offsets = [0, 32], sizes = [16, 16], strides = [1, 1]} : vector<16x128xf32> to vector<16x16xf32>
    %cst_10 = arith.constant dense<0.000000e+00> : vector<16x16xf32>
    %40 = tpu.matmul %37, %38, %cst_10 {dimension_numbers = #tpu.dot_dimension_numbers<[1], [1], [0], [0], [0, 0, 1, 0], [], []>} : vector<16x16xf32>, vector<16x16xf32>, vector<16x16xf32> -> vector<16x16xf32>
    %cst_11 = arith.constant dense<0xFF800000> : vector<16xf32>
    %41 = vector.multi_reduction <maximumf>, %40, %cst_11 [1] : vector<16x16xf32> to vector<16xf32>
    %42 = vector.shape_cast %41 : vector<16xf32> to vector<16x1xf32>
    %43 = vector.broadcast %42 : vector<16x1xf32> to vector<16x16xf32>
    %44 = arith.subf %40, %43 : vector<16x16xf32>
    %45 = math.exp %44 : vector<16x16xf32>
    %cst_12 = arith.constant dense<0.000000e+00> : vector<16xf32>
    %46 = vector.multi_reduction <add>, %45, %cst_12 [1] : vector<16x16xf32> to vector<16xf32>
    %47 = vector.shape_cast %46 : vector<16xf32> to vector<16x1xf32>
    %48 = tpu.reciprocal %47 {approx = true} : vector<16x1xf32> -> vector<16x1xf32>
    %49 = vector.broadcast %48 : vector<16x1xf32> to vector<16x16xf32>
    %50 = arith.mulf %45, %49 : vector<16x16xf32>
    %cst_13 = arith.constant dense<0.000000e+00> : vector<16x16xf32>
    %51 = tpu.matmul %50, %39, %cst_13 {dimension_numbers = #tpu.dot_dimension_numbers<[1], [0], [0], [1], [0, 0, 1, 1], [], []>} : vector<16x16xf32>, vector<16x16xf32>, vector<16x16xf32> -> vector<16x16xf32>
    %52 = vector.extract_strided_slice %4 {offsets = [0, 48], sizes = [16, 16], strides = [1, 1]} : vector<16x128xf32> to vector<16x16xf32>
    %53 = vector.extract_strided_slice %5 {offsets = [0, 48], sizes = [16, 16], strides = [1, 1]} : vector<16x128xf32> to vector<16x16xf32>
    %54 = vector.extract_strided_slice %6 {offsets = [0, 48], sizes = [16, 16], strides = [1, 1]} : vector<16x128xf32> to vector<16x16xf32>
    %cst_14 = arith.constant dense<0.000000e+00> : vector<16x16xf32>
    %55 = tpu.matmul %52, %53, %cst_14 {dimension_numbers = #tpu.dot_dimension_numbers<[1], [1], [0], [0], [0, 0, 1, 0], [], []>} : vector<16x16xf32>, vector<16x16xf32>, vector<16x16xf32> -> vector<16x16xf32>
    %cst_15 = arith.constant dense<0xFF800000> : vector<16xf32>
    %56 = vector.multi_reduction <maximumf>, %55, %cst_15 [1] : vector<16x16xf32> to vector<16xf32>
    %57 = vector.shape_cast %56 : vector<16xf32> to vector<16x1xf32>
    %58 = vector.broadcast %57 : vector<16x1xf32> to vector<16x16xf32>
    %59 = arith.subf %55, %58 : vector<16x16xf32>
    %60 = math.exp %59 : vector<16x16xf32>
    %cst_16 = arith.constant dense<0.000000e+00> : vector<16xf32>
    %61 = vector.multi_reduction <add>, %60, %cst_16 [1] : vector<16x16xf32> to vector<16xf32>
    %62 = vector.shape_cast %61 : vector<16xf32> to vector<16x1xf32>
    %63 = tpu.reciprocal %62 {approx = true} : vector<16x1xf32> -> vector<16x1xf32>
    %64 = vector.broadcast %63 : vector<16x1xf32> to vector<16x16xf32>
    %65 = arith.mulf %60, %64 : vector<16x16xf32>
    %cst_17 = arith.constant dense<0.000000e+00> : vector<16x16xf32>
    %66 = tpu.matmul %65, %54, %cst_17 {dimension_numbers = #tpu.dot_dimension_numbers<[1], [0], [0], [1], [0, 0, 1, 1], [], []>} : vector<16x16xf32>, vector<16x16xf32>, vector<16x16xf32> -> vector<16x16xf32>
    %67 = vector.extract_strided_slice %4 {offsets = [0, 64], sizes = [16, 16], strides = [1, 1]} : vector<16x128xf32> to vector<16x16xf32>
    %68 = vector.extract_strided_slice %5 {offsets = [0, 64], sizes = [16, 16], strides = [1, 1]} : vector<16x128xf32> to vector<16x16xf32>
    %69 = vector.extract_strided_slice %6 {offsets = [0, 64], sizes = [16, 16], strides = [1, 1]} : vector<16x128xf32> to vector<16x16xf32>
    %cst_18 = arith.constant dense<0.000000e+00> : vector<16x16xf32>
    %70 = tpu.matmul %67, %68, %cst_18 {dimension_numbers = #tpu.dot_dimension_numbers<[1], [1], [0], [0], [0, 0, 1, 0], [], []>} : vector<16x16xf32>, vector<16x16xf32>, vector<16x16xf32> -> vector<16x16xf32>
    %cst_19 = arith.constant dense<0xFF800000> : vector<16xf32>
    %71 = vector.multi_reduction <maximumf>, %70, %cst_19 [1] : vector<16x16xf32> to vector<16xf32>
    %72 = vector.shape_cast %71 : vector<16xf32> to vector<16x1xf32>
    %73 = vector.broadcast %72 : vector<16x1xf32> to vector<16x16xf32>
    %74 = arith.subf %70, %73 : vector<16x16xf32>
    %75 = math.exp %74 : vector<16x16xf32>
    %cst_20 = arith.constant dense<0.000000e+00> : vector<16xf32>
    %76 = vector.multi_reduction <add>, %75, %cst_20 [1] : vector<16x16xf32> to vector<16xf32>
    %77 = vector.shape_cast %76 : vector<16xf32> to vector<16x1xf32>
    %78 = tpu.reciprocal %77 {approx = true} : vector<16x1xf32> -> vector<16x1xf32>
    %79 = vector.broadcast %78 : vector<16x1xf32> to vector<16x16xf32>
    %80 = arith.mulf %75, %79 : vector<16x16xf32>
    %cst_21 = arith.constant dense<0.000000e+00> : vector<16x16xf32>
    %81 = tpu.matmul %80, %69, %cst_21 {dimension_numbers = #tpu.dot_dimension_numbers<[1], [0], [0], [1], [0, 0, 1, 1], [], []>} : vector<16x16xf32>, vector<16x16xf32>, vector<16x16xf32> -> vector<16x16xf32>
    %82 = vector.extract_strided_slice %4 {offsets = [0, 80], sizes = [16, 16], strides = [1, 1]} : vector<16x128xf32> to vector<16x16xf32>
    %83 = vector.extract_strided_slice %5 {offsets = [0, 80], sizes = [16, 16], strides = [1, 1]} : vector<16x128xf32> to vector<16x16xf32>
    %84 = vector.extract_strided_slice %6 {offsets = [0, 80], sizes = [16, 16], strides = [1, 1]} : vector<16x128xf32> to vector<16x16xf32>
    %cst_22 = arith.constant dense<0.000000e+00> : vector<16x16xf32>
    %85 = tpu.matmul %82, %83, %cst_22 {dimension_numbers = #tpu.dot_dimension_numbers<[1], [1], [0], [0], [0, 0, 1, 0], [], []>} : vector<16x16xf32>, vector<16x16xf32>, vector<16x16xf32> -> vector<16x16xf32>
    %cst_23 = arith.constant dense<0xFF800000> : vector<16xf32>
    %86 = vector.multi_reduction <maximumf>, %85, %cst_23 [1] : vector<16x16xf32> to vector<16xf32>
    %87 = vector.shape_cast %86 : vector<16xf32> to vector<16x1xf32>
    %88 = vector.broadcast %87 : vector<16x1xf32> to vector<16x16xf32>
    %89 = arith.subf %85, %88 : vector<16x16xf32>
    %90 = math.exp %89 : vector<16x16xf32>
    %cst_24 = arith.constant dense<0.000000e+00> : vector<16xf32>
    %91 = vector.multi_reduction <add>, %90, %cst_24 [1] : vector<16x16xf32> to vector<16xf32>
    %92 = vector.shape_cast %91 : vector<16xf32> to vector<16x1xf32>
    %93 = tpu.reciprocal %92 {approx = true} : vector<16x1xf32> -> vector<16x1xf32>
    %94 = vector.broadcast %93 : vector<16x1xf32> to vector<16x16xf32>
    %95 = arith.mulf %90, %94 : vector<16x16xf32>
    %cst_25 = arith.constant dense<0.000000e+00> : vector<16x16xf32>
    %96 = tpu.matmul %95, %84, %cst_25 {dimension_numbers = #tpu.dot_dimension_numbers<[1], [0], [0], [1], [0, 0, 1, 1], [], []>} : vector<16x16xf32>, vector<16x16xf32>, vector<16x16xf32> -> vector<16x16xf32>
    %97 = vector.extract_strided_slice %4 {offsets = [0, 96], sizes = [16, 16], strides = [1, 1]} : vector<16x128xf32> to vector<16x16xf32>
    %98 = vector.extract_strided_slice %5 {offsets = [0, 96], sizes = [16, 16], strides = [1, 1]} : vector<16x128xf32> to vector<16x16xf32>
    %99 = vector.extract_strided_slice %6 {offsets = [0, 96], sizes = [16, 16], strides = [1, 1]} : vector<16x128xf32> to vector<16x16xf32>
    %cst_26 = arith.constant dense<0.000000e+00> : vector<16x16xf32>
    %100 = tpu.matmul %97, %98, %cst_26 {dimension_numbers = #tpu.dot_dimension_numbers<[1], [1], [0], [0], [0, 0, 1, 0], [], []>} : vector<16x16xf32>, vector<16x16xf32>, vector<16x16xf32> -> vector<16x16xf32>
    %cst_27 = arith.constant dense<0xFF800000> : vector<16xf32>
    %101 = vector.multi_reduction <maximumf>, %100, %cst_27 [1] : vector<16x16xf32> to vector<16xf32>
    %102 = vector.shape_cast %101 : vector<16xf32> to vector<16x1xf32>
    %103 = vector.broadcast %102 : vector<16x1xf32> to vector<16x16xf32>
    %104 = arith.subf %100, %103 : vector<16x16xf32>
    %105 = math.exp %104 : vector<16x16xf32>
    %cst_28 = arith.constant dense<0.000000e+00> : vector<16xf32>
    %106 = vector.multi_reduction <add>, %105, %cst_28 [1] : vector<16x16xf32> to vector<16xf32>
    %107 = vector.shape_cast %106 : vector<16xf32> to vector<16x1xf32>
    %108 = tpu.reciprocal %107 {approx = true} : vector<16x1xf32> -> vector<16x1xf32>
    %109 = vector.broadcast %108 : vector<16x1xf32> to vector<16x16xf32>
    %110 = arith.mulf %105, %109 : vector<16x16xf32>
    %cst_29 = arith.constant dense<0.000000e+00> : vector<16x16xf32>
    %111 = tpu.matmul %110, %99, %cst_29 {dimension_numbers = #tpu.dot_dimension_numbers<[1], [0], [0], [1], [0, 0, 1, 1], [], []>} : vector<16x16xf32>, vector<16x16xf32>, vector<16x16xf32> -> vector<16x16xf32>
    %112 = vector.extract_strided_slice %4 {offsets = [0, 112], sizes = [16, 16], strides = [1, 1]} : vector<16x128xf32> to vector<16x16xf32>
    %113 = vector.extract_strided_slice %5 {offsets = [0, 112], sizes = [16, 16], strides = [1, 1]} : vector<16x128xf32> to vector<16x16xf32>
    %114 = vector.extract_strided_slice %6 {offsets = [0, 112], sizes = [16, 16], strides = [1, 1]} : vector<16x128xf32> to vector<16x16xf32>
    %cst_30 = arith.constant dense<0.000000e+00> : vector<16x16xf32>
    %115 = tpu.matmul %112, %113, %cst_30 {dimension_numbers = #tpu.dot_dimension_numbers<[1], [1], [0], [0], [0, 0, 1, 0], [], []>} : vector<16x16xf32>, vector<16x16xf32>, vector<16x16xf32> -> vector<16x16xf32>
    %cst_31 = arith.constant dense<0xFF800000> : vector<16xf32>
    %116 = vector.multi_reduction <maximumf>, %115, %cst_31 [1] : vector<16x16xf32> to vector<16xf32>
    %117 = vector.shape_cast %116 : vector<16xf32> to vector<16x1xf32>
    %118 = vector.broadcast %117 : vector<16x1xf32> to vector<16x16xf32>
    %119 = arith.subf %115, %118 : vector<16x16xf32>
    %120 = math.exp %119 : vector<16x16xf32>
    %cst_32 = arith.constant dense<0.000000e+00> : vector<16xf32>
    %121 = vector.multi_reduction <add>, %120, %cst_32 [1] : vector<16x16xf32> to vector<16xf32>
    %122 = vector.shape_cast %121 : vector<16xf32> to vector<16x1xf32>
    %123 = tpu.reciprocal %122 {approx = true} : vector<16x1xf32> -> vector<16x1xf32>
    %124 = vector.broadcast %123 : vector<16x1xf32> to vector<16x16xf32>
    %125 = arith.mulf %120, %124 : vector<16x16xf32>
    %cst_33 = arith.constant dense<0.000000e+00> : vector<16x16xf32>
    %126 = tpu.matmul %125, %114, %cst_33 {dimension_numbers = #tpu.dot_dimension_numbers<[1], [0], [0], [1], [0, 0, 1, 1], [], []>} : vector<16x16xf32>, vector<16x16xf32>, vector<16x16xf32> -> vector<16x16xf32>
    %127 = tpu.concatenate %21, %36, %51, %66, %81, %96, %111, %126 in 1 : vector<16x16xf32>, vector<16x16xf32>, vector<16x16xf32>, vector<16x16xf32>, vector<16x16xf32>, vector<16x16xf32>, vector<16x16xf32>, vector<16x16xf32> -> vector<16x128xf32>
    %c0_34 = arith.constant 0 : index
    %c0_35 = arith.constant 0 : index
    %128 = vector.load %arg2[%c0_34, %c0_35] : memref<128x128xf32, #tpu.memory_space<vmem>>, vector<128x128xf32>
    %cst_36 = arith.constant dense<0.000000e+00> : vector<16x128xf32>
    %129 = tpu.matmul %127, %128, %cst_36 {dimension_numbers = #tpu.dot_dimension_numbers<[1], [0], [0], [1], [0, 0, 1, 1], [], []>} : vector<16x128xf32>, vector<128x128xf32>, vector<16x128xf32> -> vector<16x128xf32>
    %c0_37 = arith.constant 0 : index
    %c0_38 = arith.constant 0 : index
    %130 = vector.load %arg3[%c0_37, %c0_38] : memref<1x128xf32, #tpu.memory_space<vmem>>, vector<1x128xf32>
    %131 = vector.broadcast %130 : vector<1x128xf32> to vector<16x128xf32>
    %132 = arith.addf %129, %131 : vector<16x128xf32>
    %c0_39 = arith.constant 0 : index
    %c0_40 = arith.constant 0 : index
    %c0_41 = arith.constant 0 : index
    %133 = vector.load %arg4[%c0_39, %c0_40, %c0_41] : memref<1x16x128xf32, #tpu.memory_space<vmem>>, vector<1x16x128xf32>
    %134 = vector.shape_cast %133 : vector<1x16x128xf32> to vector<16x128xf32>
    %135 = vector.shape_cast %132 : vector<16x128xf32> to vector<1x16x128xf32>
    tpu.vector_store %arg4[%c0_39, %c0_40, %c0_41], %135 {strides = array<i32>} : memref<1x16x128xf32, #tpu.memory_space<vmem>>, vector<1x16x128xf32>,
    return
  }
  func.func @transform_0(%arg0: i32) -> (i32, i32, i32) {
    %c0_i32 = arith.constant 0 : i32
    %c0_i32_0 = arith.constant 0 : i32
    %c0_i32_1 = arith.constant 0 : i32
    return %arg0, %c0_i32, %c0_i32_0 : i32, i32, i32
  }
  func.func @transform_1(%arg0: i32) -> (i32, i32) {
    %c0_i32 = arith.constant 0 : i32
    %c0_i32_0 = arith.constant 0 : i32
    %c0_i32_1 = arith.constant 0 : i32
    return %c0_i32, %c0_i32_0 : i32, i32
  }
  func.func @transform_2(%arg0: i32) -> (i32, i32) {
    %c0_i32 = arith.constant 0 : i32
    %c0_i32_0 = arith.constant 0 : i32
    %c0_i32_1 = arith.constant 0 : i32
    return %c0_i32, %c0_i32_0 : i32, i32
  }
  func.func @transform_3(%arg0: i32) -> (i32, i32, i32) {
    %c0_i32 = arith.constant 0 : i32
    %c0_i32_0 = arith.constant 0 : i32
    %c0_i32_1 = arith.constant 0 : i32
    return %arg0, %c0_i32, %c0_i32_0 : i32, i32, i32
  }
}

module attributes {stable_mosaic.version = 11 : i64} {
  func.func @_ffn_kernel(%arg0: i32, %arg1: i32, %arg2: memref<32x128xf32, #tpu.memory_space<vmem>>, %arg3: memref<128x512xf32, #tpu.memory_space<vmem>>, %arg4: memref<1x512xf32, #tpu.memory_space<vmem>>, %arg5: memref<512x128xf32, #tpu.memory_space<vmem>>, %arg6: memref<1x128xf32, #tpu.memory_space<vmem>>, %arg7: memref<32x128xf32, #tpu.memory_space<vmem>>, %arg8: memref<32x128xf32, #tpu.memory_space<vmem>>) attributes {dimension_semantics = [#tpu.dimension_semantics<parallel>, #tpu.dimension_semantics<arbitrary>], iteration_bounds = array<i64: 1, 1>, scalar_prefetch = 0 : i64, scratch_operands = 1 : i64, tpu.core_type = #tpu.core_type<tc>, window_params = [{transform_indices = @transform_0, window_bounds = array<i64: 32, 128>}, {transform_indices = @transform_1, window_bounds = array<i64: 128, 512>}, {transform_indices = @transform_2, window_bounds = array<i64: 1, 512>}, {transform_indices = @transform_3, window_bounds = array<i64: 512, 128>}, {pipeline_mode = #tpu.pipeline_mode<synchronous>, transform_indices = @transform_4, window_bounds = array<i64: 1, 128>}, {transform_indices = @transform_5, window_bounds = array<i64: 32, 128>}]} {
    %c0_i32 = arith.constant 0 : i32
    %0 = arith.cmpi eq, %arg1, %c0_i32 : i32
    %1 = arith.extui %0 : i1 to i32
    %c0_i32_0 = arith.constant 0 : i32
    %2 = arith.cmpi ne, %1, %c0_i32_0 : i32
    scf.if %2 {
      %cst_16 = arith.constant 0.000000e+00 : f32
      %19 = vector.broadcast %cst_16 : f32 to vector<32x128xf32>
      %c0_17 = arith.constant 0 : index
      %c0_18 = arith.constant 0 : index
      %20 = vector.load %arg8[%c0_17, %c0_18] : memref<32x128xf32, #tpu.memory_space<vmem>>, vector<32x128xf32>
      tpu.vector_store %arg8[%c0_17, %c0_18], %19 {strides = array<i32>} : memref<32x128xf32, #tpu.memory_space<vmem>>, vector<32x128xf32>,
    } else {
    }
    %c0 = arith.constant 0 : index
    %c0_1 = arith.constant 0 : index
    %3 = vector.load %arg2[%c0, %c0_1] : memref<32x128xf32, #tpu.memory_space<vmem>>, vector<32x128xf32>
    %c0_2 = arith.constant 0 : index
    %c0_3 = arith.constant 0 : index
    %4 = vector.load %arg3[%c0_2, %c0_3] : memref<128x512xf32, #tpu.memory_space<vmem>>, vector<128x512xf32>
    %cst = arith.constant dense<0.000000e+00> : vector<32x512xf32>
    %5 = tpu.matmul %3, %4, %cst {dimension_numbers = #tpu.dot_dimension_numbers<[1], [0], [0], [1], [0, 0, 1, 1], [], []>} : vector<32x128xf32>, vector<128x512xf32>, vector<32x512xf32> -> vector<32x512xf32>
    %c0_4 = arith.constant 0 : index
    %c0_5 = arith.constant 0 : index
    %6 = vector.load %arg4[%c0_4, %c0_5] : memref<1x512xf32, #tpu.memory_space<vmem>>, vector<1x512xf32>
    %7 = vector.broadcast %6 : vector<1x512xf32> to vector<32x512xf32>
    %8 = arith.addf %5, %7 : vector<32x512xf32>
    %cst_6 = arith.constant 0.000000e+00 : f32
    %9 = vector.broadcast %cst_6 : f32 to vector<32x512xf32>
    %10 = arith.maximumf %8, %9 : vector<32x512xf32>
    %c0_7 = arith.constant 0 : index
    %c0_8 = arith.constant 0 : index
    %11 = vector.load %arg8[%c0_7, %c0_8] : memref<32x128xf32, #tpu.memory_space<vmem>>, vector<32x128xf32>
    %c0_9 = arith.constant 0 : index
    %c0_10 = arith.constant 0 : index
    %12 = vector.load %arg5[%c0_9, %c0_10] : memref<512x128xf32, #tpu.memory_space<vmem>>, vector<512x128xf32>
    %cst_11 = arith.constant dense<0.000000e+00> : vector<32x128xf32>
    %13 = tpu.matmul %10, %12, %cst_11 {dimension_numbers = #tpu.dot_dimension_numbers<[1], [0], [0], [1], [0, 0, 1, 1], [], []>} : vector<32x512xf32>, vector<512x128xf32>, vector<32x128xf32> -> vector<32x128xf32>
    %14 = arith.addf %11, %13 : vector<32x128xf32>
    %c0_12 = arith.constant 0 : index
    %c0_13 = arith.constant 0 : index
    %15 = vector.load %arg8[%c0_12, %c0_13] : memref<32x128xf32, #tpu.memory_space<vmem>>, vector<32x128xf32>
    tpu.vector_store %arg8[%c0_12, %c0_13], %14 {strides = array<i32>} : memref<32x128xf32, #tpu.memory_space<vmem>>, vector<32x128xf32>,
    %c0_i32_14 = arith.constant 0 : i32
    %16 = arith.cmpi eq, %arg1, %c0_i32_14 : i32
    %17 = arith.extui %16 : i1 to i32
    %c0_i32_15 = arith.constant 0 : i32
    %18 = arith.cmpi ne, %17, %c0_i32_15 : i32
    scf.if %18 {
      %c0_16 = arith.constant 0 : index
      %c0_17 = arith.constant 0 : index
      %19 = vector.load %arg8[%c0_16, %c0_17] : memref<32x128xf32, #tpu.memory_space<vmem>>, vector<32x128xf32>
      %c0_18 = arith.constant 0 : index
      %c0_19 = arith.constant 0 : index
      %20 = vector.load %arg6[%c0_18, %c0_19] : memref<1x128xf32, #tpu.memory_space<vmem>>, vector<1x128xf32>
      %21 = vector.broadcast %20 : vector<1x128xf32> to vector<32x128xf32>
      %22 = arith.addf %19, %21 : vector<32x128xf32>
      %c0_20 = arith.constant 0 : index
      %c0_21 = arith.constant 0 : index
      %23 = vector.load %arg7[%c0_20, %c0_21] : memref<32x128xf32, #tpu.memory_space<vmem>>, vector<32x128xf32>
      tpu.vector_store %arg7[%c0_20, %c0_21], %22 {strides = array<i32>} : memref<32x128xf32, #tpu.memory_space<vmem>>, vector<32x128xf32>,
    } else {
    }
    return
  }
  func.func @transform_0(%arg0: i32, %arg1: i32) -> (i32, i32) {
    %c0_i32 = arith.constant 0 : i32
    %c0_i32_0 = arith.constant 0 : i32
    return %arg0, %c0_i32 : i32, i32
  }
  func.func @transform_1(%arg0: i32, %arg1: i32) -> (i32, i32) {
    %c0_i32 = arith.constant 0 : i32
    %c0_i32_0 = arith.constant 0 : i32
    return %c0_i32, %arg1 : i32, i32
  }
  func.func @transform_2(%arg0: i32, %arg1: i32) -> (i32, i32) {
    %c0_i32 = arith.constant 0 : i32
    %c0_i32_0 = arith.constant 0 : i32
    return %c0_i32, %arg1 : i32, i32
  }
  func.func @transform_3(%arg0: i32, %arg1: i32) -> (i32, i32) {
    %c0_i32 = arith.constant 0 : i32
    %c0_i32_0 = arith.constant 0 : i32
    return %arg1, %c0_i32 : i32, i32
  }
  func.func @transform_4(%arg0: i32, %arg1: i32) -> (i32, i32) {
    %c0_i32 = arith.constant 0 : i32
    %c0_i32_0 = arith.constant 0 : i32
    %c0_i32_1 = arith.constant 0 : i32
    return %c0_i32, %c0_i32_0 : i32, i32
  }
  func.func @transform_5(%arg0: i32, %arg1: i32) -> (i32, i32) {
    %c0_i32 = arith.constant 0 : i32
    %c0_i32_0 = arith.constant 0 : i32
    return %arg0, %c0_i32 : i32, i32
  }
}

module attributes {stable_mosaic.version = 11 : i64} {
  func.func @_attention_wo_kernel(%arg0: i32, %arg1: memref<1x16x384xf32, #tpu.memory_space<vmem>>, %arg2: memref<128x128xf32, #tpu.memory_space<vmem>>, %arg3: memref<1x128xf32, #tpu.memory_space<vmem>>, %arg4: memref<1x16x128xf32, #tpu.memory_space<vmem>>) attributes {dimension_semantics = [#tpu.dimension_semantics<parallel>], iteration_bounds = array<i64: 2>, scalar_prefetch = 0 : i64, scratch_operands = 0 : i64, tpu.core_type = #tpu.core_type<tc>, window_params = [{transform_indices = @transform_0, window_bounds = array<i64: 1, 16, 384>}, {pipeline_mode = #tpu.pipeline_mode<synchronous>, transform_indices = @transform_1, window_bounds = array<i64: 128, 128>}, {pipeline_mode = #tpu.pipeline_mode<synchronous>, transform_indices = @transform_2, window_bounds = array<i64: 1, 128>}, {transform_indices = @transform_3, window_bounds = array<i64: 1, 16, 128>}]} {
    %c0 = arith.constant 0 : index
    %c0_0 = arith.constant 0 : index
    %c0_1 = arith.constant 0 : index
    %0 = vector.load %arg1[%c0, %c0_0, %c0_1] : memref<1x16x384xf32, #tpu.memory_space<vmem>>, vector<1x16x384xf32>
    %1 = vector.shape_cast %0 : vector<1x16x384xf32> to vector<16x384xf32>
    %2 = vector.extract_strided_slice %1 {offsets = [0, 0], sizes = [16, 128], strides = [1, 1]} : vector<16x384xf32> to vector<16x128xf32>
    %cst = arith.constant 2.500000e-01 : f32
    %3 = vector.broadcast %cst : f32 to vector<16x128xf32>
    %4 = arith.mulf %2, %3 : vector<16x128xf32>
    %5 = vector.extract_strided_slice %1 {offsets = [0, 128], sizes = [16, 128], strides = [1, 1]} : vector<16x384xf32> to vector<16x128xf32>
    %6 = vector.extract_strided_slice %1 {offsets = [0, 256], sizes = [16, 128], strides = [1, 1]} : vector<16x384xf32> to vector<16x128xf32>
    %7 = vector.extract_strided_slice %4 {offsets = [0, 0], sizes = [16, 16], strides = [1, 1]} : vector<16x128xf32> to vector<16x16xf32>
    %8 = vector.extract_strided_slice %5 {offsets = [0, 0], sizes = [16, 16], strides = [1, 1]} : vector<16x128xf32> to vector<16x16xf32>
    %9 = vector.extract_strided_slice %6 {offsets = [0, 0], sizes = [16, 16], strides = [1, 1]} : vector<16x128xf32> to vector<16x16xf32>
    %cst_2 = arith.constant dense<0.000000e+00> : vector<16x16xf32>
    %10 = tpu.matmul %7, %8, %cst_2 {dimension_numbers = #tpu.dot_dimension_numbers<[1], [1], [0], [0], [0, 0, 1, 0], [], []>} : vector<16x16xf32>, vector<16x16xf32>, vector<16x16xf32> -> vector<16x16xf32>
    %cst_3 = arith.constant dense<0xFF800000> : vector<16xf32>
    %11 = vector.multi_reduction <maximumf>, %10, %cst_3 [1] : vector<16x16xf32> to vector<16xf32>
    %12 = vector.shape_cast %11 : vector<16xf32> to vector<16x1xf32>
    %13 = vector.broadcast %12 : vector<16x1xf32> to vector<16x16xf32>
    %14 = arith.subf %10, %13 : vector<16x16xf32>
    %15 = math.exp %14 : vector<16x16xf32>
    %cst_4 = arith.constant dense<0.000000e+00> : vector<16xf32>
    %16 = vector.multi_reduction <add>, %15, %cst_4 [1] : vector<16x16xf32> to vector<16xf32>
    %17 = vector.shape_cast %16 : vector<16xf32> to vector<16x1xf32>
    %18 = tpu.reciprocal %17 {approx = true} : vector<16x1xf32> -> vector<16x1xf32>
    %19 = vector.broadcast %18 : vector<16x1xf32> to vector<16x16xf32>
    %20 = arith.mulf %15, %19 : vector<16x16xf32>
    %cst_5 = arith.constant dense<0.000000e+00> : vector<16x16xf32>
    %21 = tpu.matmul %20, %9, %cst_5 {dimension_numbers = #tpu.dot_dimension_numbers<[1], [0], [0], [1], [0, 0, 1, 1], [], []>} : vector<16x16xf32>, vector<16x16xf32>, vector<16x16xf32> -> vector<16x16xf32>
    %22 = vector.extract_strided_slice %4 {offsets = [0, 16], sizes = [16, 16], strides = [1, 1]} : vector<16x128xf32> to vector<16x16xf32>
    %23 = vector.extract_strided_slice %5 {offsets = [0, 16], sizes = [16, 16], strides = [1, 1]} : vector<16x128xf32> to vector<16x16xf32>
    %24 = vector.extract_strided_slice %6 {offsets = [0, 16], sizes = [16, 16], strides = [1, 1]} : vector<16x128xf32> to vector<16x16xf32>
    %cst_6 = arith.constant dense<0.000000e+00> : vector<16x16xf32>
    %25 = tpu.matmul %22, %23, %cst_6 {dimension_numbers = #tpu.dot_dimension_numbers<[1], [1], [0], [0], [0, 0, 1, 0], [], []>} : vector<16x16xf32>, vector<16x16xf32>, vector<16x16xf32> -> vector<16x16xf32>
    %cst_7 = arith.constant dense<0xFF800000> : vector<16xf32>
    %26 = vector.multi_reduction <maximumf>, %25, %cst_7 [1] : vector<16x16xf32> to vector<16xf32>
    %27 = vector.shape_cast %26 : vector<16xf32> to vector<16x1xf32>
    %28 = vector.broadcast %27 : vector<16x1xf32> to vector<16x16xf32>
    %29 = arith.subf %25, %28 : vector<16x16xf32>
    %30 = math.exp %29 : vector<16x16xf32>
    %cst_8 = arith.constant dense<0.000000e+00> : vector<16xf32>
    %31 = vector.multi_reduction <add>, %30, %cst_8 [1] : vector<16x16xf32> to vector<16xf32>
    %32 = vector.shape_cast %31 : vector<16xf32> to vector<16x1xf32>
    %33 = tpu.reciprocal %32 {approx = true} : vector<16x1xf32> -> vector<16x1xf32>
    %34 = vector.broadcast %33 : vector<16x1xf32> to vector<16x16xf32>
    %35 = arith.mulf %30, %34 : vector<16x16xf32>
    %cst_9 = arith.constant dense<0.000000e+00> : vector<16x16xf32>
    %36 = tpu.matmul %35, %24, %cst_9 {dimension_numbers = #tpu.dot_dimension_numbers<[1], [0], [0], [1], [0, 0, 1, 1], [], []>} : vector<16x16xf32>, vector<16x16xf32>, vector<16x16xf32> -> vector<16x16xf32>
    %37 = vector.extract_strided_slice %4 {offsets = [0, 32], sizes = [16, 16], strides = [1, 1]} : vector<16x128xf32> to vector<16x16xf32>
    %38 = vector.extract_strided_slice %5 {offsets = [0, 32], sizes = [16, 16], strides = [1, 1]} : vector<16x128xf32> to vector<16x16xf32>
    %39 = vector.extract_strided_slice %6 {offsets = [0, 32], sizes = [16, 16], strides = [1, 1]} : vector<16x128xf32> to vector<16x16xf32>
    %cst_10 = arith.constant dense<0.000000e+00> : vector<16x16xf32>
    %40 = tpu.matmul %37, %38, %cst_10 {dimension_numbers = #tpu.dot_dimension_numbers<[1], [1], [0], [0], [0, 0, 1, 0], [], []>} : vector<16x16xf32>, vector<16x16xf32>, vector<16x16xf32> -> vector<16x16xf32>
    %cst_11 = arith.constant dense<0xFF800000> : vector<16xf32>
    %41 = vector.multi_reduction <maximumf>, %40, %cst_11 [1] : vector<16x16xf32> to vector<16xf32>
    %42 = vector.shape_cast %41 : vector<16xf32> to vector<16x1xf32>
    %43 = vector.broadcast %42 : vector<16x1xf32> to vector<16x16xf32>
    %44 = arith.subf %40, %43 : vector<16x16xf32>
    %45 = math.exp %44 : vector<16x16xf32>
    %cst_12 = arith.constant dense<0.000000e+00> : vector<16xf32>
    %46 = vector.multi_reduction <add>, %45, %cst_12 [1] : vector<16x16xf32> to vector<16xf32>
    %47 = vector.shape_cast %46 : vector<16xf32> to vector<16x1xf32>
    %48 = tpu.reciprocal %47 {approx = true} : vector<16x1xf32> -> vector<16x1xf32>
    %49 = vector.broadcast %48 : vector<16x1xf32> to vector<16x16xf32>
    %50 = arith.mulf %45, %49 : vector<16x16xf32>
    %cst_13 = arith.constant dense<0.000000e+00> : vector<16x16xf32>
    %51 = tpu.matmul %50, %39, %cst_13 {dimension_numbers = #tpu.dot_dimension_numbers<[1], [0], [0], [1], [0, 0, 1, 1], [], []>} : vector<16x16xf32>, vector<16x16xf32>, vector<16x16xf32> -> vector<16x16xf32>
    %52 = vector.extract_strided_slice %4 {offsets = [0, 48], sizes = [16, 16], strides = [1, 1]} : vector<16x128xf32> to vector<16x16xf32>
    %53 = vector.extract_strided_slice %5 {offsets = [0, 48], sizes = [16, 16], strides = [1, 1]} : vector<16x128xf32> to vector<16x16xf32>
    %54 = vector.extract_strided_slice %6 {offsets = [0, 48], sizes = [16, 16], strides = [1, 1]} : vector<16x128xf32> to vector<16x16xf32>
    %cst_14 = arith.constant dense<0.000000e+00> : vector<16x16xf32>
    %55 = tpu.matmul %52, %53, %cst_14 {dimension_numbers = #tpu.dot_dimension_numbers<[1], [1], [0], [0], [0, 0, 1, 0], [], []>} : vector<16x16xf32>, vector<16x16xf32>, vector<16x16xf32> -> vector<16x16xf32>
    %cst_15 = arith.constant dense<0xFF800000> : vector<16xf32>
    %56 = vector.multi_reduction <maximumf>, %55, %cst_15 [1] : vector<16x16xf32> to vector<16xf32>
    %57 = vector.shape_cast %56 : vector<16xf32> to vector<16x1xf32>
    %58 = vector.broadcast %57 : vector<16x1xf32> to vector<16x16xf32>
    %59 = arith.subf %55, %58 : vector<16x16xf32>
    %60 = math.exp %59 : vector<16x16xf32>
    %cst_16 = arith.constant dense<0.000000e+00> : vector<16xf32>
    %61 = vector.multi_reduction <add>, %60, %cst_16 [1] : vector<16x16xf32> to vector<16xf32>
    %62 = vector.shape_cast %61 : vector<16xf32> to vector<16x1xf32>
    %63 = tpu.reciprocal %62 {approx = true} : vector<16x1xf32> -> vector<16x1xf32>
    %64 = vector.broadcast %63 : vector<16x1xf32> to vector<16x16xf32>
    %65 = arith.mulf %60, %64 : vector<16x16xf32>
    %cst_17 = arith.constant dense<0.000000e+00> : vector<16x16xf32>
    %66 = tpu.matmul %65, %54, %cst_17 {dimension_numbers = #tpu.dot_dimension_numbers<[1], [0], [0], [1], [0, 0, 1, 1], [], []>} : vector<16x16xf32>, vector<16x16xf32>, vector<16x16xf32> -> vector<16x16xf32>
    %67 = vector.extract_strided_slice %4 {offsets = [0, 64], sizes = [16, 16], strides = [1, 1]} : vector<16x128xf32> to vector<16x16xf32>
    %68 = vector.extract_strided_slice %5 {offsets = [0, 64], sizes = [16, 16], strides = [1, 1]} : vector<16x128xf32> to vector<16x16xf32>
    %69 = vector.extract_strided_slice %6 {offsets = [0, 64], sizes = [16, 16], strides = [1, 1]} : vector<16x128xf32> to vector<16x16xf32>
    %cst_18 = arith.constant dense<0.000000e+00> : vector<16x16xf32>
    %70 = tpu.matmul %67, %68, %cst_18 {dimension_numbers = #tpu.dot_dimension_numbers<[1], [1], [0], [0], [0, 0, 1, 0], [], []>} : vector<16x16xf32>, vector<16x16xf32>, vector<16x16xf32> -> vector<16x16xf32>
    %cst_19 = arith.constant dense<0xFF800000> : vector<16xf32>
    %71 = vector.multi_reduction <maximumf>, %70, %cst_19 [1] : vector<16x16xf32> to vector<16xf32>
    %72 = vector.shape_cast %71 : vector<16xf32> to vector<16x1xf32>
    %73 = vector.broadcast %72 : vector<16x1xf32> to vector<16x16xf32>
    %74 = arith.subf %70, %73 : vector<16x16xf32>
    %75 = math.exp %74 : vector<16x16xf32>
    %cst_20 = arith.constant dense<0.000000e+00> : vector<16xf32>
    %76 = vector.multi_reduction <add>, %75, %cst_20 [1] : vector<16x16xf32> to vector<16xf32>
    %77 = vector.shape_cast %76 : vector<16xf32> to vector<16x1xf32>
    %78 = tpu.reciprocal %77 {approx = true} : vector<16x1xf32> -> vector<16x1xf32>
    %79 = vector.broadcast %78 : vector<16x1xf32> to vector<16x16xf32>
    %80 = arith.mulf %75, %79 : vector<16x16xf32>
    %cst_21 = arith.constant dense<0.000000e+00> : vector<16x16xf32>
    %81 = tpu.matmul %80, %69, %cst_21 {dimension_numbers = #tpu.dot_dimension_numbers<[1], [0], [0], [1], [0, 0, 1, 1], [], []>} : vector<16x16xf32>, vector<16x16xf32>, vector<16x16xf32> -> vector<16x16xf32>
    %82 = vector.extract_strided_slice %4 {offsets = [0, 80], sizes = [16, 16], strides = [1, 1]} : vector<16x128xf32> to vector<16x16xf32>
    %83 = vector.extract_strided_slice %5 {offsets = [0, 80], sizes = [16, 16], strides = [1, 1]} : vector<16x128xf32> to vector<16x16xf32>
    %84 = vector.extract_strided_slice %6 {offsets = [0, 80], sizes = [16, 16], strides = [1, 1]} : vector<16x128xf32> to vector<16x16xf32>
    %cst_22 = arith.constant dense<0.000000e+00> : vector<16x16xf32>
    %85 = tpu.matmul %82, %83, %cst_22 {dimension_numbers = #tpu.dot_dimension_numbers<[1], [1], [0], [0], [0, 0, 1, 0], [], []>} : vector<16x16xf32>, vector<16x16xf32>, vector<16x16xf32> -> vector<16x16xf32>
    %cst_23 = arith.constant dense<0xFF800000> : vector<16xf32>
    %86 = vector.multi_reduction <maximumf>, %85, %cst_23 [1] : vector<16x16xf32> to vector<16xf32>
    %87 = vector.shape_cast %86 : vector<16xf32> to vector<16x1xf32>
    %88 = vector.broadcast %87 : vector<16x1xf32> to vector<16x16xf32>
    %89 = arith.subf %85, %88 : vector<16x16xf32>
    %90 = math.exp %89 : vector<16x16xf32>
    %cst_24 = arith.constant dense<0.000000e+00> : vector<16xf32>
    %91 = vector.multi_reduction <add>, %90, %cst_24 [1] : vector<16x16xf32> to vector<16xf32>
    %92 = vector.shape_cast %91 : vector<16xf32> to vector<16x1xf32>
    %93 = tpu.reciprocal %92 {approx = true} : vector<16x1xf32> -> vector<16x1xf32>
    %94 = vector.broadcast %93 : vector<16x1xf32> to vector<16x16xf32>
    %95 = arith.mulf %90, %94 : vector<16x16xf32>
    %cst_25 = arith.constant dense<0.000000e+00> : vector<16x16xf32>
    %96 = tpu.matmul %95, %84, %cst_25 {dimension_numbers = #tpu.dot_dimension_numbers<[1], [0], [0], [1], [0, 0, 1, 1], [], []>} : vector<16x16xf32>, vector<16x16xf32>, vector<16x16xf32> -> vector<16x16xf32>
    %97 = vector.extract_strided_slice %4 {offsets = [0, 96], sizes = [16, 16], strides = [1, 1]} : vector<16x128xf32> to vector<16x16xf32>
    %98 = vector.extract_strided_slice %5 {offsets = [0, 96], sizes = [16, 16], strides = [1, 1]} : vector<16x128xf32> to vector<16x16xf32>
    %99 = vector.extract_strided_slice %6 {offsets = [0, 96], sizes = [16, 16], strides = [1, 1]} : vector<16x128xf32> to vector<16x16xf32>
    %cst_26 = arith.constant dense<0.000000e+00> : vector<16x16xf32>
    %100 = tpu.matmul %97, %98, %cst_26 {dimension_numbers = #tpu.dot_dimension_numbers<[1], [1], [0], [0], [0, 0, 1, 0], [], []>} : vector<16x16xf32>, vector<16x16xf32>, vector<16x16xf32> -> vector<16x16xf32>
    %cst_27 = arith.constant dense<0xFF800000> : vector<16xf32>
    %101 = vector.multi_reduction <maximumf>, %100, %cst_27 [1] : vector<16x16xf32> to vector<16xf32>
    %102 = vector.shape_cast %101 : vector<16xf32> to vector<16x1xf32>
    %103 = vector.broadcast %102 : vector<16x1xf32> to vector<16x16xf32>
    %104 = arith.subf %100, %103 : vector<16x16xf32>
    %105 = math.exp %104 : vector<16x16xf32>
    %cst_28 = arith.constant dense<0.000000e+00> : vector<16xf32>
    %106 = vector.multi_reduction <add>, %105, %cst_28 [1] : vector<16x16xf32> to vector<16xf32>
    %107 = vector.shape_cast %106 : vector<16xf32> to vector<16x1xf32>
    %108 = tpu.reciprocal %107 {approx = true} : vector<16x1xf32> -> vector<16x1xf32>
    %109 = vector.broadcast %108 : vector<16x1xf32> to vector<16x16xf32>
    %110 = arith.mulf %105, %109 : vector<16x16xf32>
    %cst_29 = arith.constant dense<0.000000e+00> : vector<16x16xf32>
    %111 = tpu.matmul %110, %99, %cst_29 {dimension_numbers = #tpu.dot_dimension_numbers<[1], [0], [0], [1], [0, 0, 1, 1], [], []>} : vector<16x16xf32>, vector<16x16xf32>, vector<16x16xf32> -> vector<16x16xf32>
    %112 = vector.extract_strided_slice %4 {offsets = [0, 112], sizes = [16, 16], strides = [1, 1]} : vector<16x128xf32> to vector<16x16xf32>
    %113 = vector.extract_strided_slice %5 {offsets = [0, 112], sizes = [16, 16], strides = [1, 1]} : vector<16x128xf32> to vector<16x16xf32>
    %114 = vector.extract_strided_slice %6 {offsets = [0, 112], sizes = [16, 16], strides = [1, 1]} : vector<16x128xf32> to vector<16x16xf32>
    %cst_30 = arith.constant dense<0.000000e+00> : vector<16x16xf32>
    %115 = tpu.matmul %112, %113, %cst_30 {dimension_numbers = #tpu.dot_dimension_numbers<[1], [1], [0], [0], [0, 0, 1, 0], [], []>} : vector<16x16xf32>, vector<16x16xf32>, vector<16x16xf32> -> vector<16x16xf32>
    %cst_31 = arith.constant dense<0xFF800000> : vector<16xf32>
    %116 = vector.multi_reduction <maximumf>, %115, %cst_31 [1] : vector<16x16xf32> to vector<16xf32>
    %117 = vector.shape_cast %116 : vector<16xf32> to vector<16x1xf32>
    %118 = vector.broadcast %117 : vector<16x1xf32> to vector<16x16xf32>
    %119 = arith.subf %115, %118 : vector<16x16xf32>
    %120 = math.exp %119 : vector<16x16xf32>
    %cst_32 = arith.constant dense<0.000000e+00> : vector<16xf32>
    %121 = vector.multi_reduction <add>, %120, %cst_32 [1] : vector<16x16xf32> to vector<16xf32>
    %122 = vector.shape_cast %121 : vector<16xf32> to vector<16x1xf32>
    %123 = tpu.reciprocal %122 {approx = true} : vector<16x1xf32> -> vector<16x1xf32>
    %124 = vector.broadcast %123 : vector<16x1xf32> to vector<16x16xf32>
    %125 = arith.mulf %120, %124 : vector<16x16xf32>
    %cst_33 = arith.constant dense<0.000000e+00> : vector<16x16xf32>
    %126 = tpu.matmul %125, %114, %cst_33 {dimension_numbers = #tpu.dot_dimension_numbers<[1], [0], [0], [1], [0, 0, 1, 1], [], []>} : vector<16x16xf32>, vector<16x16xf32>, vector<16x16xf32> -> vector<16x16xf32>
    %127 = tpu.concatenate %21, %36, %51, %66, %81, %96, %111, %126 in 1 : vector<16x16xf32>, vector<16x16xf32>, vector<16x16xf32>, vector<16x16xf32>, vector<16x16xf32>, vector<16x16xf32>, vector<16x16xf32>, vector<16x16xf32> -> vector<16x128xf32>
    %c0_34 = arith.constant 0 : index
    %c0_35 = arith.constant 0 : index
    %128 = vector.load %arg2[%c0_34, %c0_35] : memref<128x128xf32, #tpu.memory_space<vmem>>, vector<128x128xf32>
    %cst_36 = arith.constant dense<0.000000e+00> : vector<16x128xf32>
    %129 = tpu.matmul %127, %128, %cst_36 {dimension_numbers = #tpu.dot_dimension_numbers<[1], [0], [0], [1], [0, 0, 1, 1], [], []>} : vector<16x128xf32>, vector<128x128xf32>, vector<16x128xf32> -> vector<16x128xf32>
    %c0_37 = arith.constant 0 : index
    %c0_38 = arith.constant 0 : index
    %130 = vector.load %arg3[%c0_37, %c0_38] : memref<1x128xf32, #tpu.memory_space<vmem>>, vector<1x128xf32>
    %131 = vector.broadcast %130 : vector<1x128xf32> to vector<16x128xf32>
    %132 = arith.addf %129, %131 : vector<16x128xf32>
    %c0_39 = arith.constant 0 : index
    %c0_40 = arith.constant 0 : index
    %c0_41 = arith.constant 0 : index
    %133 = vector.load %arg4[%c0_39, %c0_40, %c0_41] : memref<1x16x128xf32, #tpu.memory_space<vmem>>, vector<1x16x128xf32>
    %134 = vector.shape_cast %133 : vector<1x16x128xf32> to vector<16x128xf32>
    %135 = vector.shape_cast %132 : vector<16x128xf32> to vector<1x16x128xf32>
    tpu.vector_store %arg4[%c0_39, %c0_40, %c0_41], %135 {strides = array<i32>} : memref<1x16x128xf32, #tpu.memory_space<vmem>>, vector<1x16x128xf32>,
    return
  }
  func.func @transform_0(%arg0: i32) -> (i32, i32, i32) {
    %c0_i32 = arith.constant 0 : i32
    %c0_i32_0 = arith.constant 0 : i32
    %c0_i32_1 = arith.constant 0 : i32
    return %arg0, %c0_i32, %c0_i32_0 : i32, i32, i32
  }
  func.func @transform_1(%arg0: i32) -> (i32, i32) {
    %c0_i32 = arith.constant 0 : i32
    %c0_i32_0 = arith.constant 0 : i32
    %c0_i32_1 = arith.constant 0 : i32
    return %c0_i32, %c0_i32_0 : i32, i32
  }
  func.func @transform_2(%arg0: i32) -> (i32, i32) {
    %c0_i32 = arith.constant 0 : i32
    %c0_i32_0 = arith.constant 0 : i32
    %c0_i32_1 = arith.constant 0 : i32
    return %c0_i32, %c0_i32_0 : i32, i32
  }
  func.func @transform_3(%arg0: i32) -> (i32, i32, i32) {
    %c0_i32 = arith.constant 0 : i32
    %c0_i32_0 = arith.constant 0 : i32
    %c0_i32_1 = arith.constant 0 : i32
    return %arg0, %c0_i32, %c0_i32_0 : i32, i32, i32
  }
}

</mosaic_0001>

<bundles_post_ra>
// kernel: _lambda_.9
= control target key start
LH: loop header
LB: loop body
LE: loop exit
PB: predicated region body
PF: predicated region fallthrough
CT: control target
= control target key end

     0   :  { %s843_s12 = smov 0   ;;  %s845_s13 = smov 0   ;;  %s972_s0 = inlined_call_operand.vmem [shape: f32[32,128], index: 0, kind: input, shape index: {}]   ;;  %s973_s1 = inlined_call_operand.vmem [shape: f32[128,384], index: 1, kind: input, shape index: {}]   ;;  %s974_s2 = inlined_call_operand.vmem [shape: f32[1,384], index: 2, kind: input, shape index: {}]   ;;  %s975_s3 = inlined_call_operand.vmem [shape: f32[32,384], index: 3, kind: output, shape index: {}]  }
   0x1   :  { %s847_s14 = smov 0   ;;  %s849_s15 = smov 0  }
   0x2   :  { %s851_s16 = smov 0  }
   0x3 LB: > { %s28_s17 = sadd.s32 1, %s817_s15  ;;  %s638_s18 = sadd.s32 4294967295, %s821_s16   ;;  %s821_s16 = sphi %s851_s16, %s13_s16   ;;  %s817_s15 = sphi %s849_s15, %s980_s15   ;;  %s813_s14 = sphi %s847_s14, %s979_s14   ;;  %s809_s13 = sphi %s845_s13, %s978_s13   ;;  %s805_s12 = sphi %s843_s12, %s977_s12  }
   0x4   : > { %p30_p0 = scmp.ge.s32.totalorder %s28_s17, 3  ;;  %p76_p1 = scmp.ne.s32.totalorder %s809_s13, %s805_s12 }
   0x5   : > { %p77_p2 = scmp.eq.s32.totalorder %s821_s16, 0  ;;  %p134_p4 = scmp.eq.s32.totalorder %s638_s18, 2 }
   0x6   : > { %s982_s17 = smov (%p30_p0, %s28_s17), 0  ;;  %s69_s20 = sadd.s32 1, %s809_s13 }
   0x7   : > { %p78_p3 = por %p77_p2, %p76_p1  ;;  %s65_s19 = ssub.s32 %s817_s15, %s982_s17 }
   0x8   : > { %p67_p5 = scmp.eq.s32.totalorder %s65_s19, 0  ;;  %p878_p6 = por %p134_p4, %p76_p1 }
   0x9   : > { %p642_p7 = scmp.ge.s32.totalorder %s821_s16, 3 }
   0xa   : > { %s883_s22 = scalar_select %p67_p5, %s809_s13, %s69_s20  }
   0xb   : > { %168 = sbr.rel (%p642_p7) target bundleno = 28 (0x1c), region = 20 }
  0x10   : > { %171 = sbr.rel (!%p78_p3) target bundleno = 28 (0x1c), region = 24  ;;  %s173_s23 = sand.u32 (%p78_p3), 1, %s809_s13  }
  0x11   : > { %s644_s24 = sshll.u32 (%p78_p3), %s817_s15, 3  ;;  %s643_s25 = sshll.u32 (%p78_p3), %s173_s23, 7 }
  0x12   : > { %s891_s28 = scalar_lea.vmem (%p78_p3), %s973_s1, %s644_s24  ;;  %s175_s29 = scalar_lea.vmem (%p78_p3), [#allocation3], %s643_s25 }
  0x13   : > { %v239_v0 = vld [vmem:[%s891_s28] sm:$0xff] (%p78_p3)  ;;  %v241_v1 = vld [vmem:[%s891_s28 + $0x18] sm:$0xff] (%p78_p3)  ;;  %v243_v2 = vld [vmem:[%s891_s28 + $0x30] sm:$0xff] (%p78_p3) }
  0x14   : > { %240 = vst [vmem:[%s175_s29] sm:$0xff] (%p78_p3), %v239_v0  ;;  %242 = vst [vmem:[%s175_s29 + $0x8] sm:$0xff] (%p78_p3), %v241_v1  ;;  %v245_v3 = vld [vmem:[%s891_s28 + $0x48] sm:$0xff] (%p78_p3)  ;;  %v247_v4 = vld [vmem:[%s891_s28 + $0x60] sm:$0xff] (%p78_p3) }
  0x15   : > { %244 = vst [vmem:[%s175_s29 + $0x10] sm:$0xff] %v243_v2  ;;  %v249_v5 = vld [vmem:[%s891_s28 + $0x78] sm:$0xff]  ;;  %246 = vst [vmem:[%s175_s29 + $0x18] sm:$0xff] %v245_v3  ;;  %v251_v6 = vld [vmem:[%s891_s28 + $0x90] sm:$0xff] }
  0x16   : > { %248 = vst [vmem:[%s175_s29 + $0x20] sm:$0xff] %v247_v4  ;;  %250 = vst [vmem:[%s175_s29 + $0x28] sm:$0xff] %v249_v5  ;;  %v253_v7 = vld [vmem:[%s891_s28 + $0xa8] sm:$0xff]  ;;  %v255_v8 = vld [vmem:[%s891_s28 + $0xc0] sm:$0xff] }
  0x17   : > { %252 = vst [vmem:[%s175_s29 + $0x30] sm:$0xff] %v251_v6  ;;  %254 = vst [vmem:[%s175_s29 + $0x38] sm:$0xff] %v253_v7  ;;  %v257_v9 = vld [vmem:[%s891_s28 + $0xd8] sm:$0xff]  ;;  %v259_v10 = vld [vmem:[%s891_s28 + $0xf0] sm:$0xff] }
  0x18   : > { %256 = vst [vmem:[%s175_s29 + $0x40] sm:$0xff] %v255_v8  ;;  %v261_v11 = vld [vmem:[%s891_s28 + $0x108] sm:$0xff]  ;;  %258 = vst [vmem:[%s175_s29 + $0x48] sm:$0xff] %v257_v9  ;;  %v263_v12 = vld [vmem:[%s891_s28 + $0x120] sm:$0xff] }
  0x19   : > { %260 = vst [vmem:[%s175_s29 + $0x50] sm:$0xff] %v259_v10  ;;  %262 = vst [vmem:[%s175_s29 + $0x58] sm:$0xff] %v261_v11  ;;  %v265_v13 = vld [vmem:[%s891_s28 + $0x138] sm:$0xff]  ;;  %v267_v14 = vld [vmem:[%s891_s28 + $0x150] sm:$0xff] }
  0x1a   : > { %264 = vst [vmem:[%s175_s29 + $0x60] sm:$0xff] %v263_v12  ;;  %266 = vst [vmem:[%s175_s29 + $0x68] sm:$0xff] %v265_v13  ;;  %v269_v15 = vld [vmem:[%s891_s28 + $0x168] sm:$0xff] }
  0x1b   : > { %268 = vst [vmem:[%s175_s29 + $0x70] sm:$0xff] %v267_v14  ;;  %270 = vst [vmem:[%s175_s29 + $0x78] sm:$0xff] %v269_v15 }
  0x1c PF: > { %p645_p8 = scmp.ge.s32.totalorder %s821_s16, 1  ;;  %p281_p9 = scmp.lt.s32.totalorder %s821_s16, 4 }
  0x1e   : > { %p282_p10 = pnand %p645_p8, %p281_p9 }
  0x1f   : > { %s288_s30 = sand.u32 (!%p282_p10), 1, %s805_s12   ;;  %p331_p11 = scmp.lt.s32.totalorder (!%p282_p10), %s813_s14, 2 }
  0x20   : > { %285 = sbr.rel (%p282_p10) target bundleno = 277 (0x115), region = 66  ;;  %s646_s8 = sshll.u32 (!%p282_p10), %s288_s30, 7 }
  0x21   : > { %s920_s9 = scalar_lea.vmem (!%p282_p10), [#allocation3], %s646_s8  ;;  %s647_s26 = sshll.u32 (!%p282_p10), %s288_s30, 5 }
  0x22   : > { %s320_s27 = scalar_lea.vmem (!%p282_p10), [#allocation4], %s647_s26 }
  0x25   : > { %v347_v16 = vld [vmem:[%s972_s0] sm:$0xff]  ;;  %v349_v17 = vld [vmem:[%s972_s0 + $0x10] sm:$0xff]  ;;  %v366_v18 = vld [vmem:[%s920_s9 + $0x78] sm:$0xff]  ;;  %s332_s20 = scalar_select %p331_p11, %s813_s14, 2 }
  0x26   : > { %705 = vmatprep.mubr.f32.mxu0 %v347_v16  ;;  %708 = vmatprep.mubr.f32.mxu1 %v349_v17  ;;  %v365_v19 = vld [vmem:[%s920_s9 + $0x70] sm:$0xff]  ;;  %v364_v20 = vld [vmem:[%s920_s9 + $0x68] sm:$0xff]  ;;  %v363_v21 = vld [vmem:[%s920_s9 + $0x60] sm:$0xff]  ;;  %s650_s12 = sshll.u32 (%p878_p6), %s813_s14, 3 }
  0x27   : > { %673 = vmatprep.subr.mxu0 %v366_v18  ;;  %711 = vmatprep.subr.mxu1 %v366_v18  ;;  %v362_v22 = vld [vmem:[%s920_s9 + $0x58] sm:$0xff]  ;;  %v361_v23 = vld [vmem:[%s920_s9 + $0x50] sm:$0xff]  ;;  %v360_v24 = vld [vmem:[%s920_s9 + $0x48] sm:$0xff]  ;;  %s333_s25 = scalar_lea.vmem %s974_s2, %s332_s20  ;;  %s493_s30 = scalar_lea.vmem (%p878_p6), %s975_s3, %s650_s12 }
  0x28   : > { %674 = vmatpush3.msra.mxu0 %v366_v18  ;;  %727 = vmatpush3.msra.mxu1 %v366_v18  ;;  %v359_v25 = vld [vmem:[%s920_s9 + $0x40] sm:$0xff]  ;;  %v358_v26 = vld [vmem:[%s920_s9 + $0x38] sm:$0xff]  ;;  %v357_v27 = vld [vmem:[%s920_s9 + $0x30] sm:$0xff] }
  0x29   : > { %675 = vmatprep.subr.mxu0 %v365_v19  ;;  %712 = vmatprep.subr.mxu1 %v365_v19  ;;  %v356_v28 = vld [vmem:[%s920_s9 + $0x28] sm:$0xff]  ;;  %v355_v29 = vld [vmem:[%s920_s9 + $0x20] sm:$0xff]  ;;  %v354_v30 = vld [vmem:[%s920_s9 + $0x18] sm:$0xff] }
  0x2a   : > { %676 = vmatpush3.msra.mxu0 %v365_v19  ;;  %728 = vmatpush3.msra.mxu1 %v365_v19  ;;  %v353_v31 = vld [vmem:[%s920_s9 + $0x10] sm:$0xff]  ;;  %v352_v32 = vld [vmem:[%s920_s9 + $0x8] sm:$0xff]  ;;  %v351_v33 = vld [vmem:[%s920_s9] sm:$0xff] }
  0x2b   : > { %677 = vmatprep.subr.mxu0 %v364_v20  ;;  %713 = vmatprep.subr.mxu1 %v364_v20  ;;  %v348_v34 = vld [vmem:[%s972_s0 + $0x8] sm:$0xff]  ;;  %v350_v35 = vld [vmem:[%s972_s0 + $0x18] sm:$0xff]  ;;  %v648_v36 = vld [vmem:[%s333_s25] ss:$0 sm:$0xff] }
  0x2c   : > { %678 = vmatpush3.msra.mxu0 %v364_v20  ;;  %729 = vmatpush3.msra.mxu1 %v364_v20 }
  0x2d   : > { %679 = vmatprep.subr.mxu0 %v363_v21  ;;  %714 = vmatprep.subr.mxu1 %v363_v21 }
  0x2e   : > { %680 = vmatpush3.msra.mxu0 %v363_v21  ;;  %730 = vmatpush3.msra.mxu1 %v363_v21 }
  0x2f   : > { %681 = vmatprep.subr.mxu0 %v362_v22  ;;  %715 = vmatprep.subr.mxu1 %v362_v22 }
  0x30   : > { %682 = vmatpush3.msra.mxu0 %v362_v22  ;;  %731 = vmatpush3.msra.mxu1 %v362_v22 }
  0x31   : > { %683 = vmatprep.subr.mxu0 %v361_v23  ;;  %716 = vmatprep.subr.mxu1 %v361_v23 }
  0x32   : > { %684 = vmatpush3.msra.mxu0 %v361_v23  ;;  %732 = vmatpush3.msra.mxu1 %v361_v23 }
  0x33   : > { %685 = vmatprep.subr.mxu0 %v360_v24  ;;  %717 = vmatprep.subr.mxu1 %v360_v24 }
  0x34   : > { %686 = vmatpush3.msra.mxu0 %v360_v24  ;;  %733 = vmatpush3.msra.mxu1 %v360_v24 }
  0x35   : > { %687 = vmatprep.subr.mxu0 %v359_v25  ;;  %718 = vmatprep.subr.mxu1 %v359_v25 }
  0x36   : > { %688 = vmatpush3.msra.mxu0 %v359_v25  ;;  %734 = vmatpush3.msra.mxu1 %v359_v25 }
  0x37   : > { %689 = vmatprep.subr.mxu0 %v358_v26  ;;  %719 = vmatprep.subr.mxu1 %v358_v26 }
  0x38   : > { %690 = vmatpush3.msra.mxu0 %v358_v26  ;;  %735 = vmatpush3.msra.mxu1 %v358_v26 }
  0x39   : > { %691 = vmatprep.subr.mxu0 %v357_v27  ;;  %720 = vmatprep.subr.mxu1 %v357_v27 }
  0x3a   : > { %692 = vmatpush3.msra.mxu0 %v357_v27  ;;  %736 = vmatpush3.msra.mxu1 %v357_v27 }
  0x3b   : > { %693 = vmatprep.subr.mxu0 %v356_v28  ;;  %721 = vmatprep.subr.mxu1 %v356_v28 }
  0x3c   : > { %694 = vmatpush3.msra.mxu0 %v356_v28  ;;  %737 = vmatpush3.msra.mxu1 %v356_v28 }
  0x3d   : > { %695 = vmatprep.subr.mxu0 %v355_v29  ;;  %722 = vmatprep.subr.mxu1 %v355_v29 }
  0x3e   : > { %696 = vmatpush3.msra.mxu0 %v355_v29  ;;  %738 = vmatpush3.msra.mxu1 %v355_v29 }
  0x3f   : > { %697 = vmatprep.subr.mxu0 %v354_v30  ;;  %723 = vmatprep.subr.mxu1 %v354_v30 }
  0x40   : > { %698 = vmatpush3.msra.mxu0 %v354_v30  ;;  %739 = vmatpush3.msra.mxu1 %v354_v30 }
  0x41   : > { %699 = vmatprep.subr.mxu0 %v353_v31  ;;  %724 = vmatprep.subr.mxu1 %v353_v31 }
  0x42   : > { %700 = vmatpush3.msra.mxu0 %v353_v31  ;;  %740 = vmatpush3.msra.mxu1 %v353_v31 }
  0x43   : > { %701 = vmatprep.subr.mxu0 %v352_v32  ;;  %725 = vmatprep.subr.mxu1 %v352_v32 }
  0x44   : > { %702 = vmatpush3.msra.mxu0 %v352_v32  ;;  %741 = vmatpush3.msra.mxu1 %v352_v32 }
  0x45   : > { %703 = vmatprep.subr.mxu0 %v351_v33  ;;  %726 = vmatprep.subr.mxu1 %v351_v33 }
  0x46   : > { %704 = vmatpush3.msra.mxu0 %v351_v33  ;;  %742 = vmatpush3.msra.mxu1 %v351_v33 }
  0x47   : > { %706 = vmatmul.mubr.f32.vlgmr.msra.gmra.mxu0 %v348_v34  ;;  %709 = vmatmul.mubr.f32.vlgmr.msra.gmra.mxu1 %v350_v35 }
 0x107   : > { %v707_v37 = vpop.f32.mrf.mxu0  ;;  %v710_v38 = vpop.f32.mrf.mxu1 }
 0x108   : > { %v475_v39 = vadd.f32 %v707_v37, %v648_v36  ;;  %v477_v40 = vadd.f32 %v710_v38, %v648_v36  ;;  %488 = sbr.rel (!%p878_p6) target bundleno = 277 (0x115), region = 82 }
 0x109   : > { %v433_v41 = vpop.f32.mrf.mxu0  ;;  %v443_v42 = vpop.f32.mrf.mxu1 }
 0x10a   : > { %479 = vst [vmem:[%s320_s27 + $0x8] sm:$0xff] %v475_v39  ;;  %481 = vst [vmem:[%s320_s27 + $0x18] sm:$0xff] %v477_v40  ;;  %v474_v43 = vadd.f32 %v648_v36, %v433_v41  ;;  %v476_v44 = vadd.f32 %v648_v36, %v443_v42 }
 0x10c   : > { %478 = vst [vmem:[%s320_s27] sm:$0xff] %v474_v43  ;;  %480 = vst [vmem:[%s320_s27 + $0x10] sm:$0xff] %v476_v44 }
 0x111   : > { %v530_v46 = vld [vmem:[%s320_s27 + $0x8] sm:$0xff]  ;;  %v534_v48 = vld [vmem:[%s320_s27 + $0x18] sm:$0xff] }
 0x112   : > { %531 = vst [vmem:[%s493_s30 + $0x18] sm:$0xff] %v530_v46  ;;  %535 = vst [vmem:[%s493_s30 + $0x48] sm:$0xff] %v534_v48 }
 0x113   : > { %v528_v45 = vld [vmem:[%s320_s27] sm:$0xff]  ;;  %v532_v47 = vld [vmem:[%s320_s27 + $0x10] sm:$0xff] }
 0x114   : > { %529 = vst [vmem:[%s493_s30] sm:$0xff] %v528_v45  ;;  %533 = vst [vmem:[%s493_s30 + $0x30] sm:$0xff] %v532_v47 }
 0x115 PF: > { %s13_s16 = sadd.s32 1, %s821_s16   ;;  %s977_s12 = smov %s809_s13 }
 0x116   : > { %p10_p12 = scmp.ge.s32.totalorder %s13_s16, 5   ;;  %s978_s13 = smov %s883_s22 }
 0x117   : > { %s979_s14 = smov %s817_s15  ;;  %s980_s15 = smov %s982_s17 }
 0x118   :  { %12 = sbr.rel (!%p10_p12) target bundleno = 3 (0x3), region = 157 }

// kernel: _lambda_.6
= control target key start
LH: loop header
LB: loop body
LE: loop exit
PB: predicated region body
PF: predicated region fallthrough
CT: control target
= control target key end

     0   :  { %8 = vsyncpa [#allocation4], 0  ;;  %s1123_s0 = inlined_call_operand.hbm [shape: f32[32,128], index: 0, kind: input, shape index: {}]   ;;  %s1124_s1 = inlined_call_operand.hbm [shape: f32[128,384], index: 1, kind: input, shape index: {}]   ;;  %s1125_s2 = inlined_call_operand.hbm [shape: f32[1,384], index: 2, kind: input, shape index: {}]   ;;  %s1126_s3 = inlined_call_operand.vmem [shape: f32[32,384], index: 3, kind: output, shape index: {}]  }
   0x1   :  { %9 = vsyncpa [#allocation6], 0 }
   0x2   :  { %11 = vsyncpa [#allocation6 + $0x1], 0  ;;  %s929_s12 = smov 0   ;;  %s931_s13 = smov 0  }
   0x3   :  { %s933_s14 = smov 0   ;;  %s935_s15 = smov 0  }
   0x4   :  { %s937_s16 = smov 0   ;;  %s939_s17 = smov 0  }
   0x5 LB: > { %s32_s18 = sadd.s32 1, %s897_s16  ;;  %s73_s19 = sadd.s32 1, %s889_s14  ;;  %s901_s17 = sphi %s939_s17, %s17_s17   ;;  %s897_s16 = sphi %s937_s16, %s1142_s16   ;;  %s893_s15 = sphi %s935_s15, %s1141_s15   ;;  %s889_s14 = sphi %s933_s14, %s1140_s14   ;;  %s885_s13 = sphi %s931_s13, %s1139_s13   ;;  %s881_s12 = sphi %s929_s12, %s1138_s12  }
   0x6   : > { %p34_p0 = scmp.ge.s32.totalorder %s32_s18, 3  ;;  %p80_p1 = scmp.ne.s32.totalorder %s889_s14, %s885_s13 }
   0x7   : > { %p81_p2 = scmp.eq.s32.totalorder %s901_s17, 0  ;;  %p711_p5 = scmp.lt.s32.totalorder %s901_s17, 3 }
   0x8   : > { %s1144_s18 = smov (%p34_p0, %s32_s18), 0  ;;  %s181_s22 = sand.u32 1, %s901_s17  }
   0x9   : > { %p969_p3 = por %p81_p2, %p80_p1  ;;  %s69_s21 = ssub.s32 %s897_s16, %s1144_s18 }
   0xa   : > { %p71_p4 = scmp.eq.s32.totalorder %s69_s21, 0  ;;  %s183_s23 = sand.u32 1, %s889_s14  }
   0xb   : > { %s589_s25 = sshll.u32 %s183_s23, 7  ;;  %s590_s26 = sshll.u32 %s897_s16, 7 }
   0xc   : > { %s979_s24 = scalar_select %p71_p4, %s889_s14, %s73_s19  }
   0xd   : > { %s193_s29 = scalar_lea.hbm %s1124_s1, %s590_s26  ;;  %s185_s30 = scalar_lea.vmem [#allocation5], %s589_s25 }
   0xe   : > { %s194_s4 = sshll.u32 %s185_s30, 4  ;;  %p989_p6 = pnand %p711_p5, %p969_p3  ;;  %s195_s4 = int_to_ptr.vmem [resolvable:$true] %s194_s4 }
   0xf   : > { %s993_s6 = scalar_lea.sflag [#allocation6], %s181_s22  ;;  %s778_s7 = scalar_lea.vmem %s195_s4, 2048 }
  0x10   : > { %p1128_p7 = pneg %p989_p6  ;;  %p779_p8 = scmp.ne.s32.totalorder %s195_s4, %s778_s7 }
  0x11   : > { %s903_s8 = smov [#allocation5]  }
  0x12   : > { %p781_p9 = pnand %p779_p8, %p1128_p7  ;;  %s783_s9 = sshll.u32 %s903_s8, 4  ;;  %s784_s9 = int_to_ptr.vmem [resolvable:$false] %s783_s9 }
  0x13   : > { %s785_s10 = scalar_lea.vmem %s784_s9, 4096  ;;  %p786_p11 = scmp.lt.s32.totalorder %s195_s4, %s784_s9 }
  0x14   : > { %p782_p10 = pneg %p781_p9  ;;  %p787_p12 = scmp.lt.s32.totalorder %s785_s10, %s778_s7 }
  0x16   : > { %p788_p13 = por %p787_p12, %p786_p11 }
  0x18   : > { %p789_p0 = pnand %p788_p13, %p782_p10 }
  0x1a   : > { %792 = shalt.err (!%p789_p0)
}
  0x1b   : > { %s904_s11 = smov 384   ;;  %s905_s19 = smov 128  }
  0x1c   : > { %s906_s20 = smov 8   ;;  %s1006_s21 = sadd.s32 4294967295, %s901_s17  }
  0x1d   : > { %706 = dma.hbm_to_vmem [thread:$0]  (!%p989_p6), %s193_s29, 2048, %s195_s4, %s993_s6, %s904_s11, %s905_s19, %s906_s20  }
  0x1e   : > { %p86_p2 = scmp.ne.s32.totalorder %s885_s13, %s881_s12  ;;  %p1127_p3 = scmp.eq.s32.totalorder %s1006_s21, 0 }
  0x1f   : > { %p138_p4 = scmp.eq.s32.totalorder %s1006_s21, 2  ;;  %p586_p5 = scmp.ge.s32.totalorder %s901_s17, 1 }
  0x20   : > { %p151_p8 = scmp.lt.s32.totalorder %s901_s17, 4  ;;  %p1016_p9 = por %p1127_p3, %p86_p2 }
  0x21   : > { %p1023_p10 = por %p138_p4, %p80_p1  ;;  %s907_s12 = smov [#allocation3]  }
  0x22   : > { %p1027_p11 = pnand %p586_p5, %p151_p8  ;;  %s167_s27 = sshll.u32 %s907_s12, 4  ;;  %s168_s27 = int_to_ptr.vmem [resolvable:$true] %s167_s27 }
  0x23   : > { %s591_s28 = sshll.u32 %s897_s16, 4  ;;  %s207_s8 = scalar_lea.vmem [#allocation7], %s183_s23 }
  0x24   : > { %p699_p12 = pneg %p1027_p11  ;;  %s1043_s7 = scalar_lea.hbm %s1125_s2, %s591_s28 }
  0x25   : > { %s214_s9 = sshll.u32 %s207_s8, 4  ;;  %s804_s10 = scalar_lea.vmem %s168_s27, 512  ;;  %s215_s9 = int_to_ptr.vmem [resolvable:$true] %s214_s9 }
  0x26   : > { %p1036_p13 = pnand %p699_p12, %p1127_p3  ;;  %p805_p0 = scmp.ne.s32.totalorder %s168_s27, %s804_s10 }
  0x27   : > { %p812_p5 = scmp.lt.s32.totalorder %s168_s27, %s168_s27  ;;  %p813_p8 = scmp.lt.s32.totalorder %s804_s10, %s804_s10 }
  0x28   : > { %p795_p1 = pneg %p1036_p13 }
  0x29   : > { %p814_p12 = por %p813_p8, %p812_p5 }
  0x2a   : > { %p807_p2 = pnand %p805_p0, %p795_p1 }
  0x2c   : > { %p808_p4 = pneg %p807_p2 }
  0x2e   : > { %p815_p3 = pnand %p814_p12, %p808_p4 }
  0x30   : > { %818 = shalt.err (!%p815_p3)
}
  0x31   : > { %702 = dma.hbm_to_vmem [thread:$0]  (!%p1036_p13), %s1123_s0, 512, %s168_s27, [#allocation4], %s905_s19, %s905_s19, %s906_s20  }
  0x32   : > { %s832_s12 = scalar_lea.vmem %s215_s9, 16  ;;  %p1135_p1 = pneg %p989_p6 }
  0x33   : > { %p833_p7 = scmp.ne.s32.totalorder %s215_s9, %s832_s12  ;;  %s908_s28 = smov [#allocation7]  }
  0x34   : > { %s837_s30 = sshll.u32 %s908_s28, 4  ;;  %s838_s30 = int_to_ptr.vmem [resolvable:$false] %s837_s30 }
  0x35   : > { %p835_p0 = pnand %p833_p7, %p1135_p1  ;;  %s839_s4 = scalar_lea.vmem %s838_s30, 32 }
  0x36   : > { %p840_p3 = scmp.lt.s32.totalorder %s215_s9, %s838_s30  ;;  %p841_p4 = scmp.lt.s32.totalorder %s839_s4, %s832_s12 }
  0x37   : > { %p836_p2 = pneg %p835_p0 }
  0x38   : > { %p842_p5 = por %p841_p4, %p840_p3 }
  0x3a   : > { %p843_p8 = pnand %p842_p5, %p836_p2 }
  0x3c   : > { %846 = shalt.err (!%p843_p8)
}
  0x3d   : > { %709 = dma.hbm_to_vmem [thread:$0]  (!%p989_p6), %s1043_s7, 16, %s215_s9, %s993_s6  }
  0x3e   : > { %223 = sbr.rel (%p1027_p11) target bundleno = 312 (0x138), region = 32  ;;  %p1136_p7 = scmp.eq.s32.totalorder (!%p1027_p11), %s1006_s21, 0 }
  0x43   : > { %872 = dma.done.wait (%p1136_p7), [#allocation4], 512   ;;  %p1137_p13 = pmov %p1136_p7 }
  0x44   : > { %s229_s19 = sand.u32 1, %s1006_s21   ;;  %s1072_s20 = sand.u32 1, %s885_s13  }
  0x45   : > { %874 = vsyncadd (%p1137_p13), [#allocation4], 4294966784  ;;  %s594_s5 = sshll.u32 %s1072_s20, 7  ;;  %s230_s27 = scalar_lea.sflag [#allocation6], %s229_s19 }
  0x46   : > { %s1075_s29 = scalar_lea.vmem [#allocation5], %s594_s5 }
  0x47   : > { %876 = dma.done.wait (%p1016_p9), %s230_s27, 2064  }
  0x48   : > { %878 = vsyncadd (%p1016_p9), %s230_s27, 4294965232  ;;  %v301_v0 = vld [vmem:[%s1075_s29 + $0x78] sm:$0xff]  ;;  %v300_v1 = vld [vmem:[%s1075_s29 + $0x70] sm:$0xff]  ;;  %s595_s6 = sshll.u32 %s1072_s20, 5  ;;  %s241_s21 = scalar_lea.vmem [#allocation7], %s1072_s20 }
  0x49   : > { %621 = vmatprep.subr.mxu0 %v301_v0  ;;  %659 = vmatprep.subr.mxu1 %v301_v0  ;;  %v299_v2 = vld [vmem:[%s1075_s29 + $0x68] sm:$0xff]  ;;  %v298_v3 = vld [vmem:[%s1075_s29 + $0x60] sm:$0xff]  ;;  %v297_v4 = vld [vmem:[%s1075_s29 + $0x58] sm:$0xff]  ;;  %s266_s22 = scalar_lea.vmem [#allocation8], %s595_s6  ;;  %s598_s26 = sshll.u32 (%p1023_p10), %s893_s15, 3 }
  0x4a   : > { %622 = vmatpush3.msra.mxu0 %v301_v0  ;;  %675 = vmatpush3.msra.mxu1 %v301_v0  ;;  %v296_v5 = vld [vmem:[%s1075_s29 + $0x50] sm:$0xff]  ;;  %v295_v6 = vld [vmem:[%s1075_s29 + $0x48] sm:$0xff]  ;;  %v294_v7 = vld [vmem:[%s1075_s29 + $0x40] sm:$0xff]  ;;  %s428_s9 = scalar_lea.vmem (%p1023_p10), %s1126_s3, %s598_s26 }
  0x4b   : > { %623 = vmatprep.subr.mxu0 %v300_v1  ;;  %660 = vmatprep.subr.mxu1 %v300_v1  ;;  %v293_v8 = vld [vmem:[%s1075_s29 + $0x38] sm:$0xff]  ;;  %v292_v9 = vld [vmem:[%s1075_s29 + $0x30] sm:$0xff]  ;;  %v291_v10 = vld [vmem:[%s1075_s29 + $0x28] sm:$0xff] }
  0x4c   : > { %624 = vmatpush3.msra.mxu0 %v300_v1  ;;  %676 = vmatpush3.msra.mxu1 %v300_v1  ;;  %v290_v11 = vld [vmem:[%s1075_s29 + $0x20] sm:$0xff]  ;;  %v289_v12 = vld [vmem:[%s1075_s29 + $0x18] sm:$0xff]  ;;  %v288_v13 = vld [vmem:[%s1075_s29 + $0x10] sm:$0xff] }
  0x4d   : > { %625 = vmatprep.subr.mxu0 %v299_v2  ;;  %661 = vmatprep.subr.mxu1 %v299_v2  ;;  %v287_v14 = vld [vmem:[%s1075_s29 + $0x8] sm:$0xff]  ;;  %v286_v15 = vld [vmem:[%s1075_s29] sm:$0xff]  ;;  %v284_v17 = vld [vmem:[#allocation3 + $0x10] sm:$0xff] }
  0x4e   : > { %626 = vmatpush3.msra.mxu0 %v299_v2  ;;  %677 = vmatpush3.msra.mxu1 %v299_v2  ;;  %v282_v16 = vld [vmem:[#allocation3] sm:$0xff]  ;;  %v283_v18 = vld [vmem:[#allocation3 + $0x8] sm:$0xff]  ;;  %v285_v19 = vld [vmem:[#allocation3 + $0x18] sm:$0xff] }
  0x4f   : > { %627 = vmatprep.subr.mxu0 %v298_v3  ;;  %662 = vmatprep.subr.mxu1 %v298_v3  ;;  %v596_v20 = vld [vmem:[%s241_s21] ss:$0 sm:$0xff] }
  0x50   : > { %628 = vmatpush3.msra.mxu0 %v298_v3  ;;  %678 = vmatpush3.msra.mxu1 %v298_v3 }
  0x51   : > { %629 = vmatprep.subr.mxu0 %v297_v4  ;;  %663 = vmatprep.subr.mxu1 %v297_v4 }
  0x52   : > { %630 = vmatpush3.msra.mxu0 %v297_v4  ;;  %679 = vmatpush3.msra.mxu1 %v297_v4 }
  0x53   : > { %631 = vmatprep.subr.mxu0 %v296_v5  ;;  %664 = vmatprep.subr.mxu1 %v296_v5 }
  0x54   : > { %632 = vmatpush3.msra.mxu0 %v296_v5  ;;  %680 = vmatpush3.msra.mxu1 %v296_v5 }
  0x55   : > { %633 = vmatprep.subr.mxu0 %v295_v6  ;;  %665 = vmatprep.subr.mxu1 %v295_v6 }
  0x56   : > { %634 = vmatpush3.msra.mxu0 %v295_v6  ;;  %681 = vmatpush3.msra.mxu1 %v295_v6 }
  0x57   : > { %635 = vmatprep.subr.mxu0 %v294_v7  ;;  %666 = vmatprep.subr.mxu1 %v294_v7 }
  0x58   : > { %636 = vmatpush3.msra.mxu0 %v294_v7  ;;  %682 = vmatpush3.msra.mxu1 %v294_v7 }
  0x59   : > { %637 = vmatprep.subr.mxu0 %v293_v8  ;;  %667 = vmatprep.subr.mxu1 %v293_v8 }
  0x5a   : > { %638 = vmatpush3.msra.mxu0 %v293_v8  ;;  %683 = vmatpush3.msra.mxu1 %v293_v8 }
  0x5b   : > { %639 = vmatprep.subr.mxu0 %v292_v9  ;;  %668 = vmatprep.subr.mxu1 %v292_v9 }
  0x5c   : > { %640 = vmatpush3.msra.mxu0 %v292_v9  ;;  %684 = vmatpush3.msra.mxu1 %v292_v9 }
  0x5d   : > { %641 = vmatprep.subr.mxu0 %v291_v10  ;;  %669 = vmatprep.subr.mxu1 %v291_v10 }
  0x5e   : > { %642 = vmatpush3.msra.mxu0 %v291_v10  ;;  %685 = vmatpush3.msra.mxu1 %v291_v10 }
  0x5f   : > { %643 = vmatprep.subr.mxu0 %v290_v11  ;;  %670 = vmatprep.subr.mxu1 %v290_v11 }
  0x60   : > { %644 = vmatpush3.msra.mxu0 %v290_v11  ;;  %686 = vmatpush3.msra.mxu1 %v290_v11 }
  0x61   : > { %645 = vmatprep.subr.mxu0 %v289_v12  ;;  %671 = vmatprep.subr.mxu1 %v289_v12 }
  0x62   : > { %646 = vmatpush3.msra.mxu0 %v289_v12  ;;  %687 = vmatpush3.msra.mxu1 %v289_v12 }
  0x63   : > { %647 = vmatprep.subr.mxu0 %v288_v13  ;;  %672 = vmatprep.subr.mxu1 %v288_v13 }
  0x64   : > { %648 = vmatpush3.msra.mxu0 %v288_v13  ;;  %688 = vmatpush3.msra.mxu1 %v288_v13 }
  0x65   : > { %649 = vmatprep.subr.mxu0 %v287_v14  ;;  %673 = vmatprep.subr.mxu1 %v287_v14 }
  0x66   : > { %650 = vmatpush3.msra.mxu0 %v287_v14  ;;  %689 = vmatpush3.msra.mxu1 %v287_v14 }
  0x67   : > { %651 = vmatprep.subr.mxu0 %v286_v15  ;;  %674 = vmatprep.subr.mxu1 %v286_v15 }
  0x68   : > { %652 = vmatpush3.msra.mxu0 %v286_v15  ;;  %690 = vmatpush3.msra.mxu1 %v286_v15 }
  0x69   : > { %653 = vmatprep.mubr.f32.mxu0 %v282_v16  ;;  %656 = vmatprep.mubr.f32.mxu1 %v284_v17 }
  0x6a   : > { %654 = vmatmul.mubr.f32.vlgmr.msra.gmra.mxu0 %v283_v18  ;;  %657 = vmatmul.mubr.f32.vlgmr.msra.gmra.mxu1 %v285_v19 }
 0x12a   : > { %v655_v21 = vpop.f32.mrf.mxu0  ;;  %v658_v22 = vpop.f32.mrf.mxu1 }
 0x12b   : > { %v410_v23 = vadd.f32 %v655_v21, %v596_v20  ;;  %v412_v24 = vadd.f32 %v658_v22, %v596_v20  ;;  %423 = sbr.rel (!%p1023_p10) target bundleno = 312 (0x138), region = 56 }
 0x12c   : > { %v368_v25 = vpop.f32.mrf.mxu0  ;;  %v378_v26 = vpop.f32.mrf.mxu1 }
 0x12d   : > { %414 = vst [vmem:[%s266_s22 + $0x8] sm:$0xff] %v410_v23  ;;  %416 = vst [vmem:[%s266_s22 + $0x18] sm:$0xff] %v412_v24  ;;  %v409_v27 = vadd.f32 %v596_v20, %v368_v25  ;;  %v411_v28 = vadd.f32 %v596_v20, %v378_v26 }
 0x12f   : > { %413 = vst [vmem:[%s266_s22] sm:$0xff] %v409_v27  ;;  %415 = vst [vmem:[%s266_s22 + $0x10] sm:$0xff] %v411_v28 }
 0x134   : > { %v465_v30 = vld [vmem:[%s266_s22 + $0x8] sm:$0xff]  ;;  %v469_v32 = vld [vmem:[%s266_s22 + $0x18] sm:$0xff] }
 0x135   : > { %466 = vst [vmem:[%s428_s9 + $0x18] sm:$0xff] %v465_v30  ;;  %470 = vst [vmem:[%s428_s9 + $0x48] sm:$0xff] %v469_v32 }
 0x136   : > { %v463_v29 = vld [vmem:[%s266_s22] sm:$0xff]  ;;  %v467_v31 = vld [vmem:[%s266_s22 + $0x10] sm:$0xff] }
 0x137   : > { %464 = vst [vmem:[%s428_s9] sm:$0xff] %v463_v29  ;;  %468 = vst [vmem:[%s428_s9 + $0x30] sm:$0xff] %v467_v31 }
 0x138 PF: > { %s17_s17 = sadd.s32 1, %s901_s17   ;;  %s1138_s12 = smov %s885_s13 }
 0x139   : > { %p14_p6 = scmp.ge.s32.totalorder %s17_s17, 5   ;;  %s1139_s13 = smov %s889_s14 }
 0x13a   : > { %s1140_s14 = smov %s979_s24  ;;  %s1141_s15 = smov %s897_s16 }
 0x13b   : > { %s1142_s16 = smov %s1144_s18  ;;  %16 = sbr.rel (!%p14_p6) target bundleno = 5 (0x5), region = 135 }
 0x140   :  { %486 = vsyncpa [#allocation4], 1 }
 0x141   :  { %488 = vsyncpa [#allocation4 + $0x1], 1 }
 0x142   :  { %489 = vsyncpa [#allocation6], 1 }
 0x143   :  { %491 = vsyncpa [#allocation6 + $0x1], 1 }

// kernel: _lambda_.8
= control target key start
LH: loop header
LB: loop body
LE: loop exit
PB: predicated region body
PF: predicated region fallthrough
CT: control target
= control target key end

     0   :  { %10 = vsyncpa [#allocation4], 0  ;;  %s714_s18 = smov [#allocation3]   ;;  %s981_s0 = inlined_call_operand.vmem [shape: f32[32,128], index: 0, kind: input, shape index: {}]   ;;  %s982_s1 = inlined_call_operand.vmem [shape: f32[128,512], index: 1, kind: input, shape index: {}]   ;;  %s983_s2 = inlined_call_operand.vmem [shape: f32[1,512], index: 2, kind: input, shape index: {}]   ;;  %s984_s3 = inlined_call_operand.hbm [shape: f32[512,128], index: 3, kind: input, shape index: {}]   ;;  %s985_s4 = inlined_call_operand.vmem [shape: f32[1,128], index: 4, kind: input, shape index: {}]   ;;  %s986_s5 = inlined_call_operand.vmem [shape: f32[32,128], index: 5, kind: output, shape index: {}]  }
   0x1   :  { %s22_s19 = sshll.u32 %s714_s18, 4  ;;  %s23_s19 = int_to_ptr.vmem [resolvable:$true] %s22_s19 }
   0x2   :  { %s700_s20 = scalar_lea.vmem %s23_s19, 8192  ;;  %p705_p1 = scmp.lt.s32.totalorder %s23_s19, %s23_s19 }
   0x3   :  { %p701_p0 = scmp.ne.s32.totalorder %s23_s19, %s700_s20  ;;  %p706_p2 = scmp.lt.s32.totalorder %s700_s20, %s700_s20 }
   0x5   :  { %p707_p3 = por %p706_p2, %p705_p1 }
   0x7   :  { %p708_p4 = pnand %p707_p3, %p701_p0 }
   0x9   :  { %711 = shalt.err (!%p708_p4)
}
   0xa   :  { %s715_s21 = smov 128   ;;  %s716_s22 = smov 8  }
   0xb   :  { %28 = dma.hbm_to_vmem [thread:$0]  %s984_s3, 8192, %s23_s19, [#allocation4], %s715_s21, %s715_s21, %s716_s22  }
   0xc   :  { %712 = dma.done.wait [#allocation4], 8192  }
   0xd   :  { %713 = vsyncadd [#allocation4], 4294959104  ;;  %v717_v0 = vmov 0.0   ;;  %v107_v1 = vld [vmem:[%s982_s1 + $0x1e8] sm:$0xff]  ;;  %v109_v2 = vld [vmem:[%s982_s1 + $0x1f8] sm:$0xff] }
   0xe   :  { %196 = vmatprep.mubr.f32.mxu0 %v717_v0  ;;  %285 = vmatprep.mubr.f32.mxu1 %v717_v0  ;;  %v106_v3 = vld [vmem:[%s982_s1 + $0x1e0] sm:$0xff]  ;;  %v108_v4 = vld [vmem:[%s982_s1 + $0x1f0] sm:$0xff]  ;;  %v103_v5 = vld [vmem:[%s982_s1 + $0x1c8] sm:$0xff] }
   0xf   :  { %132 = vmatprep.subr.mxu0 %v107_v1  ;;  %221 = vmatprep.subr.mxu1 %v109_v2  ;;  %v105_v6 = vld [vmem:[%s982_s1 + $0x1d8] sm:$0xff]  ;;  %v102_v7 = vld [vmem:[%s982_s1 + $0x1c0] sm:$0xff]  ;;  %v104_v8 = vld [vmem:[%s982_s1 + $0x1d0] sm:$0xff] }
  0x10   :  { %133 = vmatpush1.msra.mxu0 %v106_v3  ;;  %222 = vmatpush1.msra.mxu1 %v108_v4  ;;  %v99_v9 = vld [vmem:[%s982_s1 + $0x1a8] sm:$0xff]  ;;  %v101_v10 = vld [vmem:[%s982_s1 + $0x1b8] sm:$0xff]  ;;  %v98_v11 = vld [vmem:[%s982_s1 + $0x1a0] sm:$0xff] }
  0x11   :  { %134 = vmatprep.subr.mxu0 %v103_v5  ;;  %223 = vmatprep.subr.mxu1 %v105_v6  ;;  %v100_v12 = vld [vmem:[%s982_s1 + $0x1b0] sm:$0xff]  ;;  %v95_v13 = vld [vmem:[%s982_s1 + $0x188] sm:$0xff]  ;;  %v97_v14 = vld [vmem:[%s982_s1 + $0x198] sm:$0xff] }
  0x12   :  { %135 = vmatpush1.msra.mxu0 %v102_v7  ;;  %224 = vmatpush1.msra.mxu1 %v104_v8  ;;  %v94_v15 = vld [vmem:[%s982_s1 + $0x180] sm:$0xff]  ;;  %v96_v16 = vld [vmem:[%s982_s1 + $0x190] sm:$0xff]  ;;  %v91_v17 = vld [vmem:[%s982_s1 + $0x168] sm:$0xff] }
  0x13   :  { %136 = vmatprep.subr.mxu0 %v99_v9  ;;  %225 = vmatprep.subr.mxu1 %v101_v10  ;;  %v93_v18 = vld [vmem:[%s982_s1 + $0x178] sm:$0xff]  ;;  %v90_v19 = vld [vmem:[%s982_s1 + $0x160] sm:$0xff]  ;;  %v92_v20 = vld [vmem:[%s982_s1 + $0x170] sm:$0xff] }
  0x14   :  { %137 = vmatpush1.msra.mxu0 %v98_v11  ;;  %226 = vmatpush1.msra.mxu1 %v100_v12  ;;  %v87_v21 = vld [vmem:[%s982_s1 + $0x148] sm:$0xff]  ;;  %v89_v22 = vld [vmem:[%s982_s1 + $0x158] sm:$0xff]  ;;  %v86_v23 = vld [vmem:[%s982_s1 + $0x140] sm:$0xff] }
  0x15   :  { %138 = vmatprep.subr.mxu0 %v95_v13  ;;  %227 = vmatprep.subr.mxu1 %v97_v14  ;;  %v88_v24 = vld [vmem:[%s982_s1 + $0x150] sm:$0xff]  ;;  %v83_v25 = vld [vmem:[%s982_s1 + $0x128] sm:$0xff]  ;;  %v85_v26 = vld [vmem:[%s982_s1 + $0x138] sm:$0xff] }
  0x16   :  { %139 = vmatpush1.msra.mxu0 %v94_v15  ;;  %228 = vmatpush1.msra.mxu1 %v96_v16  ;;  %v82_v27 = vld [vmem:[%s982_s1 + $0x120] sm:$0xff]  ;;  %v84_v28 = vld [vmem:[%s982_s1 + $0x130] sm:$0xff]  ;;  %v79_v29 = vld [vmem:[%s982_s1 + $0x108] sm:$0xff] }
  0x17   :  { %140 = vmatprep.subr.mxu0 %v91_v17  ;;  %229 = vmatprep.subr.mxu1 %v93_v18  ;;  %v81_v30 = vld [vmem:[%s982_s1 + $0x118] sm:$0xff]  ;;  %v78_v31 = vld [vmem:[%s982_s1 + $0x100] sm:$0xff]  ;;  %v80_v32 = vld [vmem:[%s982_s1 + $0x110] sm:$0xff] }
  0x18   :  { %141 = vmatpush1.msra.mxu0 %v90_v19  ;;  %230 = vmatpush1.msra.mxu1 %v92_v20  ;;  %v75_v33 = vld [vmem:[%s982_s1 + $0xe8] sm:$0xff]  ;;  %v77_v34 = vld [vmem:[%s982_s1 + $0xf8] sm:$0xff]  ;;  %v74_v35 = vld [vmem:[%s982_s1 + $0xe0] sm:$0xff] }
  0x19   :  { %142 = vmatprep.subr.mxu0 %v87_v21  ;;  %231 = vmatprep.subr.mxu1 %v89_v22  ;;  %v76_v36 = vld [vmem:[%s982_s1 + $0xf0] sm:$0xff]  ;;  %v71_v37 = vld [vmem:[%s982_s1 + $0xc8] sm:$0xff]  ;;  %v73_v38 = vld [vmem:[%s982_s1 + $0xd8] sm:$0xff] }
  0x1a   :  { %143 = vmatpush1.msra.mxu0 %v86_v23  ;;  %232 = vmatpush1.msra.mxu1 %v88_v24  ;;  %v70_v39 = vld [vmem:[%s982_s1 + $0xc0] sm:$0xff]  ;;  %v72_v40 = vld [vmem:[%s982_s1 + $0xd0] sm:$0xff]  ;;  %v67_v41 = vld [vmem:[%s982_s1 + $0xa8] sm:$0xff] }
  0x1b   :  { %144 = vmatprep.subr.mxu0 %v83_v25  ;;  %233 = vmatprep.subr.mxu1 %v85_v26  ;;  %v69_v42 = vld [vmem:[%s982_s1 + $0xb8] sm:$0xff]  ;;  %v66_v43 = vld [vmem:[%s982_s1 + $0xa0] sm:$0xff]  ;;  %v68_v44 = vld [vmem:[%s982_s1 + $0xb0] sm:$0xff] }
  0x1c   :  { %145 = vmatpush1.msra.mxu0 %v82_v27  ;;  %234 = vmatpush1.msra.mxu1 %v84_v28  ;;  %v63_v45 = vld [vmem:[%s982_s1 + $0x88] sm:$0xff]  ;;  %v65_v46 = vld [vmem:[%s982_s1 + $0x98] sm:$0xff]  ;;  %v62_v47 = vld [vmem:[%s982_s1 + $0x80] sm:$0xff] }
  0x1d   :  { %146 = vmatprep.subr.mxu0 %v79_v29  ;;  %235 = vmatprep.subr.mxu1 %v81_v30  ;;  %v64_v48 = vld [vmem:[%s982_s1 + $0x90] sm:$0xff]  ;;  %v59_v49 = vld [vmem:[%s982_s1 + $0x68] sm:$0xff]  ;;  %v61_v50 = vld [vmem:[%s982_s1 + $0x78] sm:$0xff] }
  0x1e   :  { %147 = vmatpush1.msra.mxu0 %v78_v31  ;;  %236 = vmatpush1.msra.mxu1 %v80_v32  ;;  %v58_v51 = vld [vmem:[%s982_s1 + $0x60] sm:$0xff]  ;;  %v60_v52 = vld [vmem:[%s982_s1 + $0x70] sm:$0xff]  ;;  %v55_v53 = vld [vmem:[%s982_s1 + $0x48] sm:$0xff] }
  0x1f   :  { %148 = vmatprep.subr.mxu0 %v75_v33  ;;  %237 = vmatprep.subr.mxu1 %v77_v34  ;;  %v57_v54 = vld [vmem:[%s982_s1 + $0x58] sm:$0xff]  ;;  %v54_v55 = vld [vmem:[%s982_s1 + $0x40] sm:$0xff]  ;;  %v56_v56 = vld [vmem:[%s982_s1 + $0x50] sm:$0xff] }
  0x20   :  { %149 = vmatpush1.msra.mxu0 %v74_v35  ;;  %238 = vmatpush1.msra.mxu1 %v76_v36  ;;  %v51_v57 = vld [vmem:[%s982_s1 + $0x28] sm:$0xff]  ;;  %v53_v58 = vld [vmem:[%s982_s1 + $0x38] sm:$0xff]  ;;  %v50_v59 = vld [vmem:[%s982_s1 + $0x20] sm:$0xff] }
  0x21   :  { %150 = vmatprep.subr.mxu0 %v71_v37  ;;  %239 = vmatprep.subr.mxu1 %v73_v38  ;;  %v52_v60 = vld [vmem:[%s982_s1 + $0x30] sm:$0xff]  ;;  %v47_v61 = vld [vmem:[%s982_s1 + $0x8] sm:$0xff]  ;;  %v49_v62 = vld [vmem:[%s982_s1 + $0x18] sm:$0xff] }
  0x22   :  { %151 = vmatpush1.msra.mxu0 %v70_v39  ;;  %240 = vmatpush1.msra.mxu1 %v72_v40  ;;  %v46_v63 = vld [vmem:[%s982_s1] sm:$0xff]  ;;  %v48_v1 = vld [vmem:[%s982_s1 + $0x10] sm:$0xff]  ;;  %v361_v3 = vld [vmem:[#allocation3 + $0xf8] sm:$0xff] }
  0x23   :  { %152 = vmatprep.subr.mxu0 %v67_v41  ;;  %241 = vmatprep.subr.mxu1 %v69_v42  ;;  %v42_v2 = vld [vmem:[%s981_s0] sm:$0xff]  ;;  %v393_v4 = vld [vmem:[#allocation3 + $0x1f8] sm:$0xff]  ;;  %v43_v7 = vld [vmem:[%s981_s0 + $0x8] sm:$0xff] }
  0x24   :  { %153 = vmatpush1.msra.mxu0 %v66_v43  ;;  %242 = vmatpush1.msra.mxu1 %v68_v44  ;;  %v345_v5 = vld [vmem:[#allocation3 + $0x78] sm:$0xff]  ;;  %v360_v8 = vld [vmem:[#allocation3 + $0xf0] sm:$0xff]  ;;  %v359_v13 = vld [vmem:[#allocation3 + $0xe8] sm:$0xff] }
  0x25   :  { %154 = vmatprep.subr.mxu0 %v63_v45  ;;  %243 = vmatprep.subr.mxu1 %v65_v46  ;;  %v377_v6 = vld [vmem:[#allocation3 + $0x178] sm:$0xff]  ;;  %v392_v9 = vld [vmem:[#allocation3 + $0x1f0] sm:$0xff]  ;;  %v391_v14 = vld [vmem:[#allocation3 + $0x1e8] sm:$0xff] }
  0x26   :  { %155 = vmatpush1.msra.mxu0 %v62_v47  ;;  %244 = vmatpush1.msra.mxu1 %v64_v48  ;;  %v344_v10 = vld [vmem:[#allocation3 + $0x70] sm:$0xff]  ;;  %v343_v15 = vld [vmem:[#allocation3 + $0x68] sm:$0xff]  ;;  %v45_v17 = vld [vmem:[%s981_s0 + $0x18] sm:$0xff] }
  0x27   :  { %156 = vmatprep.subr.mxu0 %v59_v49  ;;  %245 = vmatprep.subr.mxu1 %v61_v50  ;;  %v376_v11 = vld [vmem:[#allocation3 + $0x170] sm:$0xff]  ;;  %v375_v16 = vld [vmem:[#allocation3 + $0x168] sm:$0xff]  ;;  %v358_v18 = vld [vmem:[#allocation3 + $0xe0] sm:$0xff] }
  0x28   :  { %157 = vmatpush1.msra.mxu0 %v58_v51  ;;  %246 = vmatpush1.msra.mxu1 %v60_v52  ;;  %v44_v12 = vld [vmem:[%s981_s0 + $0x10] sm:$0xff]  ;;  %v390_v19 = vld [vmem:[#allocation3 + $0x1e0] sm:$0xff]  ;;  %v357_v22 = vld [vmem:[#allocation3 + $0xd8] sm:$0xff] }
  0x29   :  { %158 = vmatprep.subr.mxu0 %v55_v53  ;;  %247 = vmatprep.subr.mxu1 %v57_v54  ;;  %v342_v20 = vld [vmem:[#allocation3 + $0x60] sm:$0xff]  ;;  %v389_v23 = vld [vmem:[#allocation3 + $0x1d8] sm:$0xff]  ;;  %v356_v25 = vld [vmem:[#allocation3 + $0xd0] sm:$0xff] }
  0x2a   :  { %159 = vmatpush1.msra.mxu0 %v54_v55  ;;  %248 = vmatpush1.msra.mxu1 %v56_v56  ;;  %v374_v21 = vld [vmem:[#allocation3 + $0x160] sm:$0xff]  ;;  %v341_v24 = vld [vmem:[#allocation3 + $0x58] sm:$0xff]  ;;  %v388_v26 = vld [vmem:[#allocation3 + $0x1d0] sm:$0xff] }
  0x2b   :  { %160 = vmatprep.subr.mxu0 %v51_v57  ;;  %249 = vmatprep.subr.mxu1 %v53_v58  ;;  %v340_v27 = vld [vmem:[#allocation3 + $0x50] sm:$0xff]  ;;  %v355_v29 = vld [vmem:[#allocation3 + $0xc8] sm:$0xff]  ;;  %v354_v33 = vld [vmem:[#allocation3 + $0xc0] sm:$0xff] }
  0x2c   :  { %161 = vmatpush1.msra.mxu0 %v50_v59  ;;  %250 = vmatpush1.msra.mxu1 %v52_v60  ;;  %v372_v28 = vld [vmem:[#allocation3 + $0x150] sm:$0xff]  ;;  %v387_v30 = vld [vmem:[#allocation3 + $0x1c8] sm:$0xff]  ;;  %v386_v34 = vld [vmem:[#allocation3 + $0x1c0] sm:$0xff] }
  0x2d   :  { %162 = vmatprep.subr.mxu0 %v47_v61  ;;  %251 = vmatprep.subr.mxu1 %v49_v62  ;;  %v339_v31 = vld [vmem:[#allocation3 + $0x48] sm:$0xff]  ;;  %v338_v35 = vld [vmem:[#allocation3 + $0x40] sm:$0xff]  ;;  %v353_v37 = vld [vmem:[#allocation3 + $0xb8] sm:$0xff] }
  0x2e   :  { %163 = vmatpush1.msra.mxu0 %v46_v63  ;;  %252 = vmatpush1.msra.mxu1 %v48_v1  ;;  %v371_v32 = vld [vmem:[#allocation3 + $0x148] sm:$0xff]  ;;  %v370_v36 = vld [vmem:[#allocation3 + $0x140] sm:$0xff]  ;;  %v385_v38 = vld [vmem:[#allocation3 + $0x1b8] sm:$0xff] }
  0x2f   :  { %197 = vmatmul.mubr.f32.vlgmr.msra.gmra.mxu0 %v42_v2  ;;  %286 = vmatmul.mubr.f32.vlgmr.msra.gmra.mxu1 %v42_v2  ;;  %v337_v39 = vld [vmem:[#allocation3 + $0x38] sm:$0xff]  ;;  %v352_v41 = vld [vmem:[#allocation3 + $0xb0] sm:$0xff]  ;;  %v351_v45 = vld [vmem:[#allocation3 + $0xa8] sm:$0xff] }
  0x30   :  { %202 = vmatprep.mubr.f32.mxu0 %v717_v0  ;;  %291 = vmatprep.mubr.f32.mxu1 %v717_v0  ;;  %v369_v40 = vld [vmem:[#allocation3 + $0x138] sm:$0xff]  ;;  %v384_v42 = vld [vmem:[#allocation3 + $0x1b0] sm:$0xff]  ;;  %v383_v46 = vld [vmem:[#allocation3 + $0x1a8] sm:$0xff] }
  0x31   :  { %600 = vmatprep.subr.mxu0 %v361_v3  ;;  %644 = vmatprep.subr.mxu1 %v393_v4  ;;  %v336_v43 = vld [vmem:[#allocation3 + $0x30] sm:$0xff]  ;;  %v335_v47 = vld [vmem:[#allocation3 + $0x28] sm:$0xff]  ;;  %v350_v49 = vld [vmem:[#allocation3 + $0xa0] sm:$0xff] }
  0x32   :  { %601 = vmatpush3.msra.mxu0 %v345_v5  ;;  %645 = vmatpush3.msra.mxu1 %v377_v6  ;;  %v368_v44 = vld [vmem:[#allocation3 + $0x130] sm:$0xff]  ;;  %v367_v48 = vld [vmem:[#allocation3 + $0x128] sm:$0xff]  ;;  %v382_v50 = vld [vmem:[#allocation3 + $0x1a0] sm:$0xff]  ;;  %v112_v6 = vlaneseq }
  0x33   :  { %203 = vmatmul.mubr.f32.gmra.mxu0 %v43_v7  ;;  %292 = vmatmul.mubr.f32.gmra.mxu1 %v43_v7  ;;  %v334_v51 = vld [vmem:[#allocation3 + $0x20] sm:$0xff]  ;;  %v349_v53 = vld [vmem:[#allocation3 + $0x98] sm:$0xff]  ;;  %v348_v57 = vld [vmem:[#allocation3 + $0x90] sm:$0xff] }
  0x34   :  { %208 = vmatprep.mubr.f32.mxu0 %v717_v0  ;;  %297 = vmatprep.mubr.f32.mxu1 %v717_v0  ;;  %v366_v52 = vld [vmem:[#allocation3 + $0x120] sm:$0xff]  ;;  %v381_v54 = vld [vmem:[#allocation3 + $0x198] sm:$0xff]  ;;  %v380_v58 = vld [vmem:[#allocation3 + $0x190] sm:$0xff]  ;;  %v113_v7 = vshrl.u32 %v112_v6, 7 }
  0x35   :  { %602 = vmatprep.subr.mxu0 %v360_v8  ;;  %646 = vmatprep.subr.mxu1 %v392_v9  ;;  %v333_v55 = vld [vmem:[#allocation3 + $0x18] sm:$0xff]  ;;  %v332_v59 = vld [vmem:[#allocation3 + $0x10] sm:$0xff]  ;;  %v347_v61 = vld [vmem:[#allocation3 + $0x88] sm:$0xff] }
  0x36   :  { %603 = vmatpush3.msra.mxu0 %v344_v10  ;;  %647 = vmatpush3.msra.mxu1 %v376_v11  ;;  %v365_v56 = vld [vmem:[#allocation3 + $0x118] sm:$0xff]  ;;  %v364_v60 = vld [vmem:[#allocation3 + $0x110] sm:$0xff]  ;;  %v379_v62 = vld [vmem:[#allocation3 + $0x188] sm:$0xff]  ;;  %v114_v8 = vsub.s32 0, %v113_v7  ;;  %v122_v9 = vsub.s32 2, %v113_v7  ;;  %v118_v11 = vsub.s32 1, %v113_v7 }
  0x37   :  { %209 = vmatmul.mubr.f32.gmra.mxu0 %v44_v12  ;;  %298 = vmatmul.mubr.f32.gmra.mxu1 %v44_v12  ;;  %v331_v63 = vld [vmem:[#allocation3 + $0x8] sm:$0xff]  ;;  %v346_v2 = vld [vmem:[#allocation3 + $0x80] sm:$0xff]  ;;  %v126_v12 = vsub.s32 3, %v113_v7 }
  0x38   :  { %214 = vmatprep.mubr.f32.mxu0 %v717_v0  ;;  %303 = vmatprep.mubr.f32.mxu1 %v717_v0  ;;  %v373_v0 = vld [vmem:[#allocation3 + $0x158] sm:$0xff]  ;;  %v363_v1 = vld [vmem:[#allocation3 + $0x108] sm:$0xff]  ;;  %v378_v3 = vld [vmem:[#allocation3 + $0x180] sm:$0xff] }
  0x39   :  { %604 = vmatprep.subr.mxu0 %v359_v13  ;;  %648 = vmatprep.subr.mxu1 %v391_v14  ;;  %v330_v4 = vld [vmem:[#allocation3] sm:$0xff] }
  0x3a   :  { %605 = vmatpush3.msra.mxu0 %v343_v15  ;;  %649 = vmatpush3.msra.mxu1 %v375_v16  ;;  %v362_v5 = vld [vmem:[#allocation3 + $0x100] sm:$0xff] }
  0x3b   :  { %215 = vmatmul.mubr.f32.gmra.mxu0 %v45_v17  ;;  %304 = vmatmul.mubr.f32.gmra.mxu1 %v45_v17  ;;  %v110_v10 = vld [vmem:[%s983_s2] sm:$0xf] }
  0x3c   :  { %606 = vmatprep.subr.mxu0 %v358_v18  ;;  %650 = vmatprep.subr.mxu1 %v390_v19  ;;  %v115_v13 = vrot.slane %v110_v10, %v114_v8  ;;  %v123_v14 = vrot.slane %v110_v10, %v122_v9  ;;  %v119_v15 = vrot.slane %v110_v10, %v118_v11  ;;  %v599_v7 = vld [vmem:[%s985_s4] ss:$0 sm:$0xff] }
  0x3d   :  { %607 = vmatpush3.msra.mxu0 %v342_v20  ;;  %651 = vmatpush3.msra.mxu1 %v374_v21  ;;  %v127_v16 = vrot.slane %v110_v10, %v126_v12 }
  0x3e   :  { %608 = vmatprep.subr.mxu0 %v357_v22  ;;  %652 = vmatprep.subr.mxu1 %v389_v23 }
  0x3f   :  { %609 = vmatpush3.msra.mxu0 %v341_v24  ;;  %653 = vmatpush3.msra.mxu1 %v373_v0 }
  0x40   :  { %610 = vmatprep.subr.mxu0 %v356_v25  ;;  %654 = vmatprep.subr.mxu1 %v388_v26 }
  0x41   :  { %611 = vmatpush3.msra.mxu0 %v340_v27  ;;  %655 = vmatpush3.msra.mxu1 %v372_v28 }
  0x42   :  { %612 = vmatprep.subr.mxu0 %v355_v29  ;;  %656 = vmatprep.subr.mxu1 %v387_v30 }
  0x43   :  { %613 = vmatpush3.msra.mxu0 %v339_v31  ;;  %657 = vmatpush3.msra.mxu1 %v371_v32 }
  0x44   :  { %614 = vmatprep.subr.mxu0 %v354_v33  ;;  %658 = vmatprep.subr.mxu1 %v386_v34 }
  0x45   :  { %615 = vmatpush3.msra.mxu0 %v338_v35  ;;  %659 = vmatpush3.msra.mxu1 %v370_v36 }
  0x46   :  { %616 = vmatprep.subr.mxu0 %v353_v37  ;;  %660 = vmatprep.subr.mxu1 %v385_v38 }
  0x47   :  { %617 = vmatpush3.msra.mxu0 %v337_v39  ;;  %661 = vmatpush3.msra.mxu1 %v369_v40 }
  0x48   :  { %618 = vmatprep.subr.mxu0 %v352_v41  ;;  %662 = vmatprep.subr.mxu1 %v384_v42 }
  0x49   :  { %619 = vmatpush3.msra.mxu0 %v336_v43  ;;  %663 = vmatpush3.msra.mxu1 %v368_v44 }
  0x4a   :  { %620 = vmatprep.subr.mxu0 %v351_v45  ;;  %664 = vmatprep.subr.mxu1 %v383_v46 }
  0x4b   :  { %621 = vmatpush3.msra.mxu0 %v335_v47  ;;  %665 = vmatpush3.msra.mxu1 %v367_v48 }
  0x4c   :  { %622 = vmatprep.subr.mxu0 %v350_v49  ;;  %666 = vmatprep.subr.mxu1 %v382_v50 }
  0x4d   :  { %623 = vmatpush3.msra.mxu0 %v334_v51  ;;  %667 = vmatpush3.msra.mxu1 %v366_v52 }
  0x4e   :  { %624 = vmatprep.subr.mxu0 %v349_v53  ;;  %668 = vmatprep.subr.mxu1 %v381_v54 }
  0x4f   :  { %625 = vmatpush3.msra.mxu0 %v333_v55  ;;  %669 = vmatpush3.msra.mxu1 %v365_v56 }
  0x50   :  { %626 = vmatprep.subr.mxu0 %v348_v57  ;;  %670 = vmatprep.subr.mxu1 %v380_v58 }
  0x51   :  { %627 = vmatpush3.msra.mxu0 %v332_v59  ;;  %671 = vmatpush3.msra.mxu1 %v364_v60 }
  0x52   :  { %628 = vmatprep.subr.mxu0 %v347_v61  ;;  %672 = vmatprep.subr.mxu1 %v379_v62 }
  0x53   :  { %629 = vmatpush3.msra.mxu0 %v331_v63  ;;  %673 = vmatpush3.msra.mxu1 %v363_v1 }
  0x54   :  { %630 = vmatprep.subr.mxu0 %v346_v2  ;;  %674 = vmatprep.subr.mxu1 %v378_v3 }
  0x55   :  { %631 = vmatpush3.msra.mxu0 %v330_v4  ;;  %675 = vmatpush3.msra.mxu1 %v362_v5 }
  0xef   :  { %v198_v17 = vpop.f32.mrf.mxu0  ;;  %v287_v18 = vpop.f32.mrf.mxu1 }
  0xf0   :  { %v199_v19 = vadd.f32 %v198_v17, %v115_v13  ;;  %v288_v20 = vadd.f32 %v287_v18, %v123_v14 }
  0xf1   :  { %v200_v21 = vpop.f32.mrf.mxu0  ;;  %v289_v22 = vpop.f32.mrf.mxu1 }
  0xf2   :  { %v201_v23 = vadd.f32 %v200_v21, %v119_v15  ;;  %v290_v24 = vadd.f32 %v289_v22, %v127_v16  ;;  %v310_v28 = vmax.f32 %v199_v19, 0.0  ;;  %v312_v29 = vmax.f32 %v288_v20, 0.0 }
  0xf3   :  { %v204_v0 = vpop.f32.mrf.mxu0  ;;  %v293_v25 = vpop.f32.mrf.mxu1 }
  0xf4   :  { %v311_v26 = vmax.f32 %v201_v23, 0.0  ;;  %v313_v27 = vmax.f32 %v290_v24, 0.0  ;;  %v205_v30 = vadd.f32 %v204_v0, %v115_v13  ;;  %v294_v31 = vadd.f32 %v293_v25, %v123_v14 }
  0xf5   :  { %v206_v32 = vpop.f32.mrf.mxu0  ;;  %v295_v33 = vpop.f32.mrf.mxu1 }
  0xf6   :  { %v207_v34 = vadd.f32 %v206_v32, %v119_v15  ;;  %v296_v35 = vadd.f32 %v295_v33, %v127_v16  ;;  %458 = vmatprep.mubr.f32.mxu0 %v311_v26  ;;  %543 = vmatprep.mubr.f32.mxu1 %v313_v27  ;;  %v314_v40 = vmax.f32 %v205_v30, 0.0  ;;  %v316_v41 = vmax.f32 %v294_v31, 0.0 }
  0xf7   :  { %v210_v36 = vpop.f32.mrf.mxu0  ;;  %v299_v37 = vpop.f32.mrf.mxu1  ;;  %459 = vmatmul.mubr.f32.vlgmr.msra.gmra.mxu0 %v310_v28  ;;  %544 = vmatmul.mubr.f32.vlgmr.msra.gmra.mxu1 %v312_v29 }
  0xf8   :  { %v315_v38 = vmax.f32 %v207_v34, 0.0  ;;  %v317_v39 = vmax.f32 %v296_v35, 0.0  ;;  %v211_v42 = vadd.f32 %v210_v36, %v115_v13  ;;  %v300_v43 = vadd.f32 %v299_v37, %v123_v14 }
  0xf9   :  { %v212_v44 = vpop.f32.mrf.mxu0  ;;  %v301_v45 = vpop.f32.mrf.mxu1 }
  0xfa   :  { %v213_v46 = vadd.f32 %v212_v44, %v119_v15  ;;  %v302_v47 = vadd.f32 %v301_v45, %v127_v16  ;;  %463 = vmatprep.mubr.f32.mxu0 %v315_v38  ;;  %548 = vmatprep.mubr.f32.mxu1 %v317_v39  ;;  %v318_v52 = vmax.f32 %v211_v42, 0.0  ;;  %v320_v53 = vmax.f32 %v300_v43, 0.0 }
  0xfb   :  { %v216_v48 = vpop.f32.mrf.mxu0  ;;  %v305_v49 = vpop.f32.mrf.mxu1  ;;  %464 = vmatmul.mubr.f32.gmra.mxu0 %v314_v40  ;;  %549 = vmatmul.mubr.f32.gmra.mxu1 %v316_v41 }
  0xfc   :  { %v319_v50 = vmax.f32 %v213_v46, 0.0  ;;  %v321_v51 = vmax.f32 %v302_v47, 0.0  ;;  %v217_v54 = vadd.f32 %v216_v48, %v115_v13  ;;  %v306_v55 = vadd.f32 %v305_v49, %v123_v14 }
  0xfd   :  { %v218_v56 = vpop.f32.mrf.mxu0  ;;  %v307_v57 = vpop.f32.mrf.mxu1 }
  0xfe   :  { %v219_v58 = vadd.f32 %v218_v56, %v119_v15  ;;  %v308_v59 = vadd.f32 %v307_v57, %v127_v16  ;;  %468 = vmatprep.mubr.f32.mxu0 %v319_v50  ;;  %553 = vmatprep.mubr.f32.mxu1 %v321_v51  ;;  %v322_v62 = vmax.f32 %v217_v54, 0.0  ;;  %v324_v63 = vmax.f32 %v306_v55, 0.0 }
  0xff   :  { %469 = vmatmul.mubr.f32.gmra.mxu0 %v318_v52  ;;  %554 = vmatmul.mubr.f32.gmra.mxu1 %v320_v53 }
 0x100   :  { %v323_v60 = vmax.f32 %v219_v58, 0.0  ;;  %v325_v61 = vmax.f32 %v308_v59, 0.0 }
 0x102   :  { %473 = vmatprep.mubr.f32.mxu0 %v323_v60  ;;  %558 = vmatprep.mubr.f32.mxu1 %v325_v61 }
 0x103   :  { %474 = vmatmul.mubr.f32.gmra.mxu0 %v322_v62  ;;  %559 = vmatmul.mubr.f32.gmra.mxu1 %v324_v63 }
 0x1b7   :  { %v632_v1 = vpop.f32.mrf.mxu0  ;;  %v676_v2 = vpop.f32.mrf.mxu1 }
 0x1b9   :  { %v633_v3 = vpop.f32.mrf.mxu0  ;;  %v677_v4 = vpop.f32.mrf.mxu1 }
 0x1ba   :  { %v634_v5 = vadd.f32 %v633_v3, %v632_v1  ;;  %v678_v6 = vadd.f32 %v677_v4, %v676_v2 }
 0x1bb   :  { %v635_v8 = vpop.f32.mrf.mxu0  ;;  %v679_v9 = vpop.f32.mrf.mxu1 }
 0x1bc   :  { %v546_v10 = vadd.f32 %v678_v6, %v634_v5 }
 0x1bd   :  { %v636_v11 = vpop.f32.mrf.mxu0  ;;  %v680_v12 = vpop.f32.mrf.mxu1 }
 0x1be   :  { %v586_v13 = vadd.f32 %v599_v7, %v546_v10  ;;  %v637_v14 = vadd.f32 %v636_v11, %v635_v8  ;;  %v681_v15 = vadd.f32 %v680_v12, %v679_v9 }
 0x1bf   :  { %v638_v16 = vpop.f32.mrf.mxu0  ;;  %v682_v17 = vpop.f32.mrf.mxu1 }
 0x1c0   :  { %590 = vst [vmem:[%s986_s5] sm:$0xff] %v586_v13  ;;  %v551_v18 = vadd.f32 %v681_v15, %v637_v14 }
 0x1c1   :  { %v639_v19 = vpop.f32.mrf.mxu0  ;;  %v683_v20 = vpop.f32.mrf.mxu1 }
 0x1c2   :  { %v587_v21 = vadd.f32 %v599_v7, %v551_v18  ;;  %v640_v22 = vadd.f32 %v639_v19, %v638_v16  ;;  %v684_v23 = vadd.f32 %v683_v20, %v682_v17 }
 0x1c3   :  { %v641_v24 = vpop.f32.mrf.mxu0  ;;  %v685_v0 = vpop.f32.mrf.mxu1 }
 0x1c4   :  { %591 = vst [vmem:[%s986_s5 + $0x8] sm:$0xff] %v587_v21  ;;  %v556_v25 = vadd.f32 %v684_v23, %v640_v22 }
 0x1c5   :  { %v642_v26 = vpop.f32.mrf.mxu0  ;;  %v686_v27 = vpop.f32.mrf.mxu1 }
 0x1c6   :  { %v588_v28 = vadd.f32 %v599_v7, %v556_v25  ;;  %v643_v29 = vadd.f32 %v642_v26, %v641_v24  ;;  %v687_v30 = vadd.f32 %v686_v27, %v685_v0 }
 0x1c8   :  { %592 = vst [vmem:[%s986_s5 + $0x10] sm:$0xff] %v588_v28  ;;  %v561_v31 = vadd.f32 %v687_v30, %v643_v29 }
 0x1ca   :  { %v589_v32 = vadd.f32 %v599_v7, %v561_v31 }
 0x1cc   :  { %593 = vst [vmem:[%s986_s5 + $0x18] sm:$0xff] %v589_v32 }
 0x1cd   :  { %598 = vsyncpa [#allocation4], 1 }

// kernel: _lambda_.7
= control target key start
LH: loop header
LB: loop body
LE: loop exit
PB: predicated region body
PF: predicated region fallthrough
CT: control target
= control target key end

     0   :  { %8 = vsyncpa [#allocation3], 0  ;;  %s2517_s12 = smov 0   ;;  %s2830_s0 = inlined_call_operand.vmem [shape: f32[2,16,384], index: 0, kind: input, shape index: {}]   ;;  %s2831_s1 = inlined_call_operand.hbm [shape: f32[128,128], index: 1, kind: input, shape index: {}]   ;;  %s2832_s2 = inlined_call_operand.vmem [shape: f32[1,128], index: 2, kind: input, shape index: {}]   ;;  %s2833_s3 = inlined_call_operand.vmem [shape: f32[2,16,128], index: 3, kind: output, shape index: {}]  }
   0x1 LB: > { %s2030_s13 = sadd.s32 4294967295, %s2485_s12   ;;  %p2032_p0 = scmp.ge.s32.totalorder %s2485_s12, 1  ;;  %s2485_s12 = sphi %s2517_s12, %s14_s12  }
   0x2   : > { %p113_p1 = scmp.lt.s32.totalorder %s2485_s12, 3  ;;  %s2487_s14 = smov [#allocation2]  }
   0x3   : > { %s125_s15 = sshll.u32 %s2487_s14, 4  ;;  %p2330_p3 = scmp.eq.s32.totalorder %s2030_s13, 0  ;;  %s126_s15 = int_to_ptr.vmem [resolvable:$true] %s125_s15 }
   0x4   : > { %p2525_p2 = pnand %p2032_p0, %p113_p1  ;;  %s2460_s17 = scalar_lea.vmem %s126_s15, 2048 }
   0x5   : > { %p2461_p7 = scmp.ne.s32.totalorder %s126_s15, %s2460_s17  ;;  %p2468_p10 = scmp.lt.s32.totalorder %s126_s15, %s126_s15 }
   0x6   : > { %p2326_p4 = pneg %p2525_p2  ;;  %p2469_p11 = scmp.lt.s32.totalorder %s2460_s17, %s2460_s17 }
   0x8   : > { %p2327_p5 = pnand %p2330_p3, %p2326_p4  ;;  %p2470_p12 = por %p2469_p11, %p2468_p10 }
   0xa   : > { %p2451_p6 = pneg %p2327_p5 }
   0xc   : > { %p2463_p8 = pnand %p2461_p7, %p2451_p6 }
   0xe   : > { %p2464_p9 = pneg %p2463_p8 }
  0x10   : > { %p2471_p13 = pnand %p2470_p12, %p2464_p9 }
  0x12   : > { %2474 = shalt.err (!%p2471_p13)
}
  0x13   : > { %s2488_s18 = smov 128   ;;  %s2489_s19 = smov 8  }
  0x14   : > { %2329 = dma.hbm_to_vmem [thread:$0]  (!%p2327_p5), %s2831_s1, 2048, %s126_s15, [#allocation3], %s2488_s18, %s2488_s18, %s2489_s19  }
  0x15   : > { %152 = sbr.rel (%p2525_p2) target bundleno = 4189 (0x105d), region = 32 }
  0x1a   : > { %2480 = dma.done.wait (%p2330_p3), [#allocation3], 2048  }
  0x1b   : > { %2482 = vsyncadd (%p2330_p3), [#allocation3], 4294965248  ;;  %p176_p0 = scmp.lt.s32.totalorder %s2030_s13, 1  ;;  %vm194_vm0 = vcmask 130048   ;;  %s2490_s26 = smov 112   ;;  %vm1845_vm1 = vcmask 261120  }
  0x1c   : > { %s2491_s27 = smov 96   ;;  %s2492_s28 = smov 80   ;;  %vm1848_vm2 = vcmask 392192   ;;  %vm1851_vm3 = vcmask 523264   ;;  %vm1854_vm4 = vcmask 654336   ;;  %vm1857_vm5 = vcmask 785408  }
  0x1d   : > { %s2836_s13 = smov (!%p176_p0, %s2030_s13), 1  ;;  %s2493_s29 = smov 64   ;;  %vm1860_vm6 = vcmask 916480  }
  0x1e   : > { %s2321_s22 = smul.u32 48, %s2836_s13  ;;  %s2494_s30 = smov 48  }
  0x1f   : > { %s2495_s4 = smov 32   ;;  %s2496_s5 = smov 16  }
  0x20   : > { %s2545_s25 = scalar_lea.vmem %s2830_s0, %s2321_s22  ;;  %s2091_s6 = sshll.u32 %s2836_s13, 4 }
  0x21   : > { %v2548_v0 = vld [vmem:[%s2545_s25 + $0x20] sm:$0xff]  ;;  %v2551_v1 = vld [vmem:[%s2545_s25 + $0x8] sm:$0xff]  ;;  %v189_v4 = vld [vmem:[%s2545_s25 + $0x18] sm:$0xff]  ;;  %s185_s11 = scalar_lea.vmem %s2833_s3, %s2091_s6 }
  0x22   : > { %v186_v2 = vld [vmem:[%s2545_s25] sm:$0xff]  ;;  %2174 = vmatprep.subr.msk.mxu1 %vm194_vm0, %v2548_v0  ;;  %v2565_v5 = vmul.f32 0.25, %v189_v4  ;;  %389 = vrot.lane.b32.xlu1 %v2551_v1, %s2490_s26  ;;  %v2586_v20 = vld [vmem:[%s2545_s25 + $0x28] sm:$0xff]  ;;  %v2589_v21 = vld [vmem:[%s2545_s25 + $0x10] sm:$0xff] }
  0x23   : > { %v2556_v3 = vmul.f32 0.25, %v186_v2  ;;  %2175 = vmatpush3.xpose.msk.msra.mxu1 %vm194_vm0, %v2548_v0 }
  0x24   : > { %2176 = vmatprep.subr.msk.mxu1 %vm194_vm0, %v2551_v1 }
  0x25   : > { %2178 = vmatprep.mubr.msk.f32.mxu1 %vm194_vm0, %v2556_v3 }
  0x26   : > { %385 = vrot.lane.b32.xlu1 %v2556_v3, %s2490_s26 }
  0x27   : > { %2177 = vmatpush3.xpose.msk.msra.mxu1 %vm194_vm0, %v2551_v1 }
  0x28   : > { %2181 = vmatprep.subr.mxu1 %v2586_v20 }
  0x2a   : > { %2179 = vmatmul.mubr.msk.f32.vlgmr.msra.gmra.mxu1 %vm194_vm0, %v2565_v5 }
  0x2b   : > { %2182 = vmatpush3.msra.mxu1 %v2586_v20 }
  0x2c   : > { %2183 = vmatprep.subr.mxu1 %v2589_v21 }
  0x2d   : > { %2184 = vmatpush3.msra.mxu1 %v2589_v21 }
  0x94   : > { %v390_v23 = vpop.permute.xlu1 %389 }
  0x98   : > { %v386_v24 = vpop.permute.xlu1 %385 }
  0xea   : > { %v2180_v6 = vpop.f32.mrf.mxu1 }
  0xeb   : > { %v285_v9 = vsel %vm194_vm0, %v2180_v6, -inf }
  0xec   : > { %v273_v7 = vpop.f32.mrf.mxu1 }
  0xed   : > { %v282_v8 = vsel %vm194_vm0, %v273_v7, -inf }
  0xee   : > { %283 = vmax.xlane.f32.xlu0 %v282_v8 }
  0xf2   : > { %286 = vmax.xlane.f32.xlu0 %v285_v9 }
 0x108   : > { %391 = vrot.lane.b32.xlu0 %v2548_v0, %s2490_s26 }
 0x10c   : > { %387 = vrot.lane.b32.xlu0 %v2565_v5, %s2490_s26 }
 0x110   : > { %587 = vrot.lane.b32.xlu0 %v2556_v3, %s2491_s27 }
 0x177   : > { %v284_v10 = vpop.xlane.xlu0 %283 }
 0x178   : > { %v288_v11 = vsub.f32 %v273_v7, %v284_v10 }
 0x17a   : > { %v290_v14 = vmul.f32 1.442695, %v288_v11 }
 0x17b   : > { %v287_v12 = vpop.xlane.xlu0 %286 }
 0x17c   : > { %v289_v13 = vsub.f32 %v2180_v6, %v287_v12 }
 0x17e   : > { %v292_v15 = vmul.f32 1.442695, %v289_v13 }
 0x17f   : > { %v392_v22 = vpop.permute.xlu0 %391 }
 0x180   : > { %2385 = vpow2.f32 %v292_v15  ;;  %2188 = vmatprep.subr.msk.mxu1 %vm194_vm0, %v392_v22 }
 0x181   : > { %2387 = vpow2.f32 %v290_v14 }
 0x183   : > { %v388_v32 = vpop.permute.xlu0 %387 }
 0x187   : > { %v588_v33 = vpop.permute.xlu0 %587 }
 0x18d   : > { %v2386_v16 = vpop.eup %2385 }
 0x18e   : > { %v297_v17 = vsel %vm194_vm0, %v2386_v16, 0.0  ;;  %v2388_v18 = vpop.eup %2387 }
 0x18f   : > { %298 = vadd.xlane.f32.xlu1 %v297_v17  ;;  %v294_v19 = vsel %vm194_vm0, %v2388_v18, 0.0 }
 0x193   : > { %295 = vadd.xlane.f32.xlu1 %v294_v19 }
 0x1a4   : > { %593 = vrot.lane.b32.xlu1 %v2548_v0, %s2491_s27 }
 0x1a8   : > { %591 = vrot.lane.b32.xlu1 %v2551_v1, %s2491_s27 }
 0x1ac   : > { %589 = vrot.lane.b32.xlu1 %v2565_v5, %s2491_s27 }
 0x218   : > { %v299_v25 = vpop.xlane.xlu1 %298 }
 0x219   : > { %2389 = vrcp.f32 %v299_v25 }
 0x21c   : > { %v296_v26 = vpop.xlane.xlu1 %295 }
 0x21d   : > { %2391 = vrcp.f32 %v296_v26 }
 0x220   : > { %v594_v31 = vpop.permute.xlu1 %593 }
 0x224   : > { %v592_v34 = vpop.permute.xlu1 %591 }
 0x226   : > { %v2390_v27 = vpop.eup %2389 }
 0x227   : > { %v303_v30 = vmul.f32 %v2390_v27, %v2386_v16 }
 0x228   : > { %v590_v35 = vpop.permute.xlu1 %589 }
 0x22a   : > { %v2392_v28 = vpop.eup %2391 }
 0x22b   : > { %v302_v29 = vmul.f32 %v2392_v28, %v2388_v18 }
 0x22d   : > { %2185 = vmatprep.mubr.msk.f32.mxu1 %vm194_vm0, %v302_v29 }
 0x22e   : > { %2186 = vmatmul.mubr.msk.f32.vlgmr.msra.gmra.mxu1 %vm194_vm0, %v303_v30 }
 0x22f   : > { %2189 = vmatpush3.xpose.msk.msra.mxu1 %vm194_vm0, %v392_v22  ;;  %2192 = vmatprep.mubr.msk.f32.mxu1 %vm194_vm0, %v386_v24 }
 0x230   : > { %2190 = vmatprep.subr.msk.mxu1 %vm194_vm0, %v390_v23 }
 0x233   : > { %2191 = vmatpush3.xpose.msk.msra.mxu1 %vm194_vm0, %v390_v23 }
 0x234   : > { %2202 = vmatprep.subr.msk.mxu1 %vm194_vm0, %v594_v31 }
 0x236   : > { %2193 = vmatmul.mubr.msk.f32.vlgmr.msra.gmra.mxu1 %vm194_vm0, %v388_v32 }
 0x237   : > { %2203 = vmatpush3.xpose.msk.msra.mxu1 %vm194_vm0, %v594_v31  ;;  %2206 = vmatprep.mubr.msk.f32.mxu1 %vm194_vm0, %v588_v33 }
 0x238   : > { %2204 = vmatprep.subr.msk.mxu1 %vm194_vm0, %v592_v34 }
 0x23b   : > { %2205 = vmatpush3.xpose.msk.msra.mxu1 %vm194_vm0, %v592_v34 }
 0x23e   : > { %2207 = vmatmul.mubr.msk.f32.vlgmr.msra.gmra.mxu1 %vm194_vm0, %v590_v35 }
 0x2ee   : > { %v2615_v36 = vpop.f32.mrf.mxu1 }
 0x2f0   : > { %v2617_v37 = vpop.f32.mrf.mxu1 }
 0x2f6   : > { %v2194_v38 = vpop.f32.mrf.mxu1 }
 0x2f7   : > { %v479_v44 = vsel %vm194_vm0, %v2194_v38, -inf }
 0x2f8   : > { %v2619_v39 = vpop.f32.mrf.mxu1 }
 0x2f9   : > { %v476_v62 = vsel %vm194_vm0, %v2619_v39, -inf }
 0x2fe   : > { %v2208_v40 = vpop.f32.mrf.mxu1 }
 0x2ff   : > { %v681_v41 = vsel %vm194_vm0, %v2208_v40, -inf }
 0x300   : > { %682 = vmax.xlane.f32.xlu1 %v681_v41  ;;  %v669_v42 = vpop.f32.mrf.mxu1 }
 0x301   : > { %v678_v43 = vsel %vm194_vm0, %v669_v42, -inf }
 0x302   : > { %679 = vmax.xlane.f32.xlu0 %v678_v43 }
 0x311   : > { %700 = vrot.lane.b32.xlu1 %v2589_v21, %s2491_s27 }
 0x315   : > { %793 = vrot.lane.b32.xlu1 %v2548_v0, %s2492_s28 }
 0x319   : > { %791 = vrot.lane.b32.xlu1 %v2551_v1, %s2492_s28 }
 0x31d   : > { %789 = vrot.lane.b32.xlu1 %v2565_v5, %s2492_s28 }
 0x341   : > { %480 = vmax.xlane.f32.xlu1 %v479_v44 }
 0x389   : > { %v683_v45 = vpop.xlane.xlu1 %682 }
 0x38a   : > { %v685_v46 = vsub.f32 %v2208_v40, %v683_v45 }
 0x38b   : > { %v680_v47 = vpop.xlane.xlu0 %679 }
 0x38c   : > { %v688_v48 = vmul.f32 1.442695, %v685_v46  ;;  %v684_v49 = vsub.f32 %v669_v42, %v680_v47 }
 0x38d   : > { %v701_v55 = vpop.permute.xlu1 %700 }
 0x38e   : > { %2393 = vpow2.f32 %v688_v48  ;;  %v686_v50 = vmul.f32 1.442695, %v684_v49 }
 0x390   : > { %2395 = vpow2.f32 %v686_v50 }
 0x391   : > { %v794_v56 = vpop.permute.xlu1 %793 }
 0x395   : > { %v792_v57 = vpop.permute.xlu1 %791 }
 0x399   : > { %v790_v58 = vpop.permute.xlu1 %789 }
 0x39b   : > { %v2394_v51 = vpop.eup %2393 }
 0x39c   : > { %v693_v52 = vsel %vm194_vm0, %v2394_v51, 0.0 }
 0x39d   : > { %v2396_v53 = vpop.eup %2395  ;;  %694 = vadd.xlane.f32.xlu0 %v693_v52 }
 0x39e   : > { %v690_v54 = vsel %vm194_vm0, %v2396_v53, 0.0 }
 0x3a1   : > { %691 = vadd.xlane.f32.xlu0 %v690_v54 }
 0x3b7   : > { %702 = vrot.lane.b32.xlu0 %v2586_v20, %s2491_s27 }
 0x3bb   : > { %787 = vrot.lane.b32.xlu0 %v2556_v3, %s2492_s28 }
 0x3ca   : > { %v481_v59 = vpop.xlane.xlu1 %480 }
 0x3cb   : > { %v483_v60 = vsub.f32 %v2194_v38, %v481_v59 }
 0x3cd   : > { %v486_v61 = vmul.f32 1.442695, %v483_v60 }
 0x3cf   : > { %2397 = vpow2.f32 %v486_v61 }
 0x3da   : > { %477 = vmax.xlane.f32.xlu0 %v476_v62 }
 0x3dc   : > { %v2640_v63 = vpop.eup %2397 }
 0x3dd   : > { %v491_v2 = vsel %vm194_vm0, %v2640_v63, 0.0 }
 0x3de   : > { %492 = vadd.xlane.f32.xlu1 %v491_v2 }
 0x3ef   : > { %500 = vrot.lane.b32.xlu1 %v2589_v21, %s2490_s26 }
 0x3f3   : > { %902 = vrot.lane.b32.xlu1 %v2586_v20, %s2492_s28 }
 0x3f7   : > { %900 = vrot.lane.b32.xlu1 %v2589_v21, %s2492_s28 }
 0x426   : > { %v695_v4 = vpop.xlane.xlu0 %694 }
 0x427   : > { %2399 = vrcp.f32 %v695_v4 }
 0x42a   : > { %v692_v6 = vpop.xlane.xlu0 %691 }
 0x42b   : > { %2401 = vrcp.f32 %v692_v6 }
 0x42e   : > { %v703_v7 = vpop.permute.xlu0 %702 }
 0x42f   : > { %2209 = vmatprep.subr.mxu1 %v703_v7 }
 0x430   : > { %2210 = vmatpush3.msra.mxu1 %v703_v7 }
 0x431   : > { %2211 = vmatprep.subr.mxu1 %v701_v55 }
 0x432   : > { %2212 = vmatpush3.msra.mxu1 %v701_v55  ;;  %v788_v12 = vpop.permute.xlu0 %787 }
 0x433   : > { %2216 = vmatprep.subr.msk.mxu1 %vm194_vm0, %v794_v56 }
 0x434   : > { %v2400_v8 = vpop.eup %2399 }
 0x435   : > { %v699_v11 = vmul.f32 %v2400_v8, %v2394_v51 }
 0x438   : > { %v2402_v9 = vpop.eup %2401 }
 0x439   : > { %v698_v10 = vmul.f32 %v2402_v9, %v2396_v53 }
 0x43b   : > { %2213 = vmatprep.mubr.msk.f32.mxu1 %vm194_vm0, %v698_v10 }
 0x43c   : > { %2214 = vmatmul.mubr.msk.f32.vlgmr.msra.gmra.mxu1 %vm194_vm0, %v699_v11 }
 0x43d   : > { %2217 = vmatpush3.xpose.msk.msra.mxu1 %vm194_vm0, %v794_v56  ;;  %2220 = vmatprep.mubr.msk.f32.mxu1 %vm194_vm0, %v788_v12 }
 0x43e   : > { %2218 = vmatprep.subr.msk.mxu1 %vm194_vm0, %v792_v57 }
 0x441   : > { %2219 = vmatpush3.xpose.msk.msra.mxu1 %vm194_vm0, %v792_v57 }
 0x444   : > { %2221 = vmatmul.mubr.msk.f32.vlgmr.msra.gmra.mxu1 %vm194_vm0, %v790_v58 }
 0x463   : > { %v478_v13 = vpop.xlane.xlu0 %477 }
 0x464   : > { %v482_v14 = vsub.f32 %v2619_v39, %v478_v13 }
 0x466   : > { %v484_v15 = vmul.f32 1.442695, %v482_v14 }
 0x467   : > { %v493_v31 = vpop.xlane.xlu1 %492 }
 0x468   : > { %2403 = vpow2.f32 %v484_v15 }
 0x46b   : > { %v501_v35 = vpop.permute.xlu1 %500 }
 0x46f   : > { %v903_v39 = vpop.permute.xlu1 %902 }
 0x473   : > { %v901_v48 = vpop.permute.xlu1 %900 }
 0x475   : > { %v2404_v25 = vpop.eup %2403 }
 0x476   : > { %v488_v26 = vsel %vm194_vm0, %v2404_v25, 0.0 }
 0x4fc   : > { %v2659_v16 = vpop.f32.mrf.mxu1 }
 0x4fe   : > { %v2661_v17 = vpop.f32.mrf.mxu1 }
 0x4ff   : > { %v2355_v18 = vpack.i.bf16 %v2659_v16, %v2661_v17 }
 0x504   : > { %v2222_v19 = vpop.f32.mrf.mxu1 }
 0x505   : > { %v881_v24 = vsel %vm194_vm0, %v2222_v19, -inf }
 0x506   : > { %v869_v22 = vpop.f32.mrf.mxu1 }
 0x507   : > { %v878_v23 = vsel %vm194_vm0, %v869_v22, -inf }
 0x508   : > { %879 = vmax.xlane.f32.xlu0 %v878_v23 }
 0x50c   : > { %882 = vmax.xlane.f32.xlu0 %v881_v24 }
 0x510   : > { %489 = vadd.xlane.f32.xlu0 %v488_v26 }
 0x526   : > { %502 = vrot.lane.b32.xlu0 %v2586_v20, %s2490_s26 }
 0x591   : > { %v880_v27 = vpop.xlane.xlu0 %879 }
 0x592   : > { %v884_v28 = vsub.f32 %v869_v22, %v880_v27 }
 0x594   : > { %v886_v29 = vmul.f32 1.442695, %v884_v28 }
 0x595   : > { %v883_v30 = vpop.xlane.xlu0 %882 }
 0x596   : > { %2405 = vpow2.f32 %v886_v29  ;;  %v885_v32 = vsub.f32 %v2222_v19, %v883_v30 }
 0x597   : > { %2407 = vrcp.f32 %v493_v31 }
 0x598   : > { %v888_v33 = vmul.f32 1.442695, %v885_v32 }
 0x599   : > { %v490_v34 = vpop.xlane.xlu0 %489 }
 0x59a   : > { %2409 = vpow2.f32 %v888_v33 }
 0x59b   : > { %2411 = vrcp.f32 %v490_v34 }
 0x59d   : > { %v503_v38 = vpop.permute.xlu0 %502 }
 0x59e   : > { %2195 = vmatprep.subr.mxu0 %v503_v38 }
 0x59f   : > { %2196 = vmatpush3.msra.mxu0 %v503_v38 }
 0x5a0   : > { %2197 = vmatprep.subr.mxu0 %v501_v35 }
 0x5a1   : > { %2198 = vmatpush3.msra.mxu0 %v501_v35 }
 0x5a2   : > { %2223 = vmatprep.subr.mxu0 %v903_v39 }
 0x5a3   : > { %v2406_v40 = vpop.eup %2405 }
 0x5a4   : > { %v890_v41 = vsel %vm194_vm0, %v2406_v40, 0.0  ;;  %v2408_v42 = vpop.eup %2407 }
 0x5a5   : > { %891 = vadd.xlane.f32.xlu0 %v890_v41  ;;  %v497_v47 = vmul.f32 %v2408_v42, %v2640_v63 }
 0x5a7   : > { %v2410_v43 = vpop.eup %2409 }
 0x5a8   : > { %v2412_v44 = vpop.eup %2411  ;;  %v893_v45 = vsel %vm194_vm0, %v2410_v43, 0.0 }
 0x5a9   : > { %894 = vadd.xlane.f32.xlu1 %v893_v45  ;;  %v496_v46 = vmul.f32 %v2412_v44, %v2404_v25 }
 0x5ab   : > { %2199 = vmatprep.mubr.msk.f32.mxu0 %vm194_vm0, %v496_v46 }
 0x5ac   : > { %2200 = vmatmul.mubr.msk.f32.vlgmr.msra.gmra.mxu0 %vm194_vm0, %v497_v47 }
 0x5ad   : > { %2224 = vmatpush3.msra.mxu0 %v903_v39 }
 0x5ae   : > { %2225 = vmatprep.subr.mxu0 %v901_v48 }
 0x5af   : > { %2226 = vmatpush3.msra.mxu0 %v901_v48 }
 0x5ba   : > { %991 = vrot.lane.b32.xlu1 %v2551_v1, %s2493_s29 }
 0x5bb   : > { %993 = vrot.lane.b32.xlu0 %v2548_v0, %s2493_s29 }
 0x5be   : > { %989 = vrot.lane.b32.xlu1 %v2565_v5, %s2493_s29 }
 0x5bf   : > { %987 = vrot.lane.b32.xlu0 %v2556_v3, %s2493_s29 }
 0x62e   : > { %v892_v49 = vpop.xlane.xlu0 %891 }
 0x62f   : > { %2413 = vrcp.f32 %v892_v49 }
 0x632   : > { %v895_v50 = vpop.xlane.xlu1 %894  ;;  %v994_v51 = vpop.permute.xlu0 %993 }
 0x633   : > { %2415 = vrcp.f32 %v895_v50  ;;  %2230 = vmatprep.subr.msk.mxu0 %vm194_vm0, %v994_v51 }
 0x636   : > { %v988_v56 = vpop.permute.xlu0 %987  ;;  %v992_v57 = vpop.permute.xlu1 %991 }
 0x63a   : > { %v990_v58 = vpop.permute.xlu1 %989 }
 0x63c   : > { %v2414_v52 = vpop.eup %2413 }
 0x63d   : > { %v898_v53 = vmul.f32 %v2414_v52, %v2406_v40 }
 0x63f   : > { %2227 = vmatprep.mubr.msk.f32.mxu0 %vm194_vm0, %v898_v53 }
 0x640   : > { %v2416_v54 = vpop.eup %2415 }
 0x641   : > { %v899_v55 = vmul.f32 %v2416_v54, %v2410_v43 }
 0x643   : > { %2228 = vmatmul.mubr.msk.f32.vlgmr.msra.gmra.mxu0 %vm194_vm0, %v899_v55 }
 0x644   : > { %2231 = vmatpush3.xpose.msk.msra.mxu0 %vm194_vm0, %v994_v51  ;;  %2234 = vmatprep.mubr.msk.f32.mxu0 %vm194_vm0, %v988_v56 }
 0x645   : > { %2232 = vmatprep.subr.msk.mxu0 %vm194_vm0, %v992_v57 }
 0x648   : > { %2233 = vmatpush3.xpose.msk.msra.mxu0 %vm194_vm0, %v992_v57 }
 0x64b   : > { %2235 = vmatmul.mubr.msk.f32.vlgmr.msra.gmra.mxu0 %vm194_vm0, %v990_v58 }
 0x66c   : > { %v2691_v59 = vpop.f32.mrf.mxu0 }
 0x66e   : > { %v2693_v60 = vpop.f32.mrf.mxu0 }
 0x703   : > { %v2695_v61 = vpop.f32.mrf.mxu0 }
 0x705   : > { %v2697_v62 = vpop.f32.mrf.mxu0 }
 0x706   : > { %v2360_v63 = vpack.i.bf16 %v2695_v61, %v2697_v62  ;;  %v1878_v62 = vld [vmem:[#allocation2 + $0x78] sm:$0xff] }
 0x70b   : > { %v2236_v2 = vpop.f32.mrf.mxu0 }
 0x70c   : > { %v1081_v4 = vsel %vm194_vm0, %v2236_v2, -inf }
 0x70d   : > { %1082 = vmax.xlane.f32.xlu1 %v1081_v4  ;;  %v1069_v6 = vpop.f32.mrf.mxu0 }
 0x70e   : > { %v1078_v7 = vsel %vm194_vm0, %v1069_v6, -inf }
 0x70f   : > { %1079 = vmax.xlane.f32.xlu0 %v1078_v7 }
 0x71e   : > { %1100 = vrot.lane.b32.xlu1 %v2589_v21, %s2493_s29 }
 0x722   : > { %1193 = vrot.lane.b32.xlu1 %v2548_v0, %s2494_s30 }
 0x726   : > { %1191 = vrot.lane.b32.xlu1 %v2551_v1, %s2494_s30 }
 0x72a   : > { %1189 = vrot.lane.b32.xlu1 %v2565_v5, %s2494_s30 }
 0x796   : > { %v1083_v8 = vpop.xlane.xlu1 %1082 }
 0x797   : > { %v1085_v9 = vsub.f32 %v2236_v2, %v1083_v8 }
 0x798   : > { %v1080_v10 = vpop.xlane.xlu0 %1079 }
 0x799   : > { %v1088_v11 = vmul.f32 1.442695, %v1085_v9  ;;  %v1084_v12 = vsub.f32 %v1069_v6, %v1080_v10 }
 0x79a   : > { %v1101_v25 = vpop.permute.xlu1 %1100 }
 0x79b   : > { %2417 = vpow2.f32 %v1088_v11  ;;  %v1086_v13 = vmul.f32 1.442695, %v1084_v12 }
 0x79d   : > { %2419 = vpow2.f32 %v1086_v13 }
 0x79e   : > { %v1194_v27 = vpop.permute.xlu1 %1193 }
 0x7a2   : > { %v1192_v33 = vpop.permute.xlu1 %1191 }
 0x7a6   : > { %v1190_v34 = vpop.permute.xlu1 %1189 }
 0x7a8   : > { %v2418_v14 = vpop.eup %2417 }
 0x7a9   : > { %v1093_v15 = vsel %vm194_vm0, %v2418_v14, 0.0 }
 0x7aa   : > { %v2420_v19 = vpop.eup %2419  ;;  %1094 = vadd.xlane.f32.xlu0 %v1093_v15 }
 0x7ab   : > { %v1090_v22 = vsel %vm194_vm0, %v2420_v19, 0.0 }
 0x7ae   : > { %1091 = vadd.xlane.f32.xlu0 %v1090_v22 }
 0x7c4   : > { %1102 = vrot.lane.b32.xlu0 %v2586_v20, %s2493_s29 }
 0x7c8   : > { %1187 = vrot.lane.b32.xlu0 %v2556_v3, %s2494_s30 }
 0x833   : > { %v1095_v23 = vpop.xlane.xlu0 %1094 }
 0x834   : > { %2421 = vrcp.f32 %v1095_v23 }
 0x837   : > { %v1092_v24 = vpop.xlane.xlu0 %1091 }
 0x838   : > { %2423 = vrcp.f32 %v1092_v24 }
 0x83b   : > { %v1103_v26 = vpop.permute.xlu0 %1102 }
 0x83c   : > { %2237 = vmatprep.subr.mxu1 %v1103_v26 }
 0x83d   : > { %2238 = vmatpush3.msra.mxu1 %v1103_v26 }
 0x83e   : > { %2239 = vmatprep.subr.mxu1 %v1101_v25 }
 0x83f   : > { %2240 = vmatpush3.msra.mxu1 %v1101_v25  ;;  %v1188_v32 = vpop.permute.xlu0 %1187 }
 0x840   : > { %2244 = vmatprep.subr.msk.mxu1 %vm194_vm0, %v1194_v27 }
 0x841   : > { %v2422_v28 = vpop.eup %2421 }
 0x842   : > { %v1099_v31 = vmul.f32 %v2422_v28, %v2418_v14 }
 0x845   : > { %v2424_v29 = vpop.eup %2423 }
 0x846   : > { %v1098_v30 = vmul.f32 %v2424_v29, %v2420_v19 }
 0x848   : > { %2241 = vmatprep.mubr.msk.f32.mxu1 %vm194_vm0, %v1098_v30 }
 0x849   : > { %2242 = vmatmul.mubr.msk.f32.vlgmr.msra.gmra.mxu1 %vm194_vm0, %v1099_v31 }
 0x84a   : > { %2245 = vmatpush3.xpose.msk.msra.mxu1 %vm194_vm0, %v1194_v27  ;;  %2248 = vmatprep.mubr.msk.f32.mxu1 %vm194_vm0, %v1188_v32 }
 0x84b   : > { %2246 = vmatprep.subr.msk.mxu1 %vm194_vm0, %v1192_v33 }
 0x84e   : > { %2247 = vmatpush3.xpose.msk.msra.mxu1 %vm194_vm0, %v1192_v33 }
 0x851   : > { %2249 = vmatmul.mubr.msk.f32.vlgmr.msra.gmra.mxu1 %vm194_vm0, %v1190_v34 }
 0x909   : > { %v2725_v35 = vpop.f32.mrf.mxu1 }
 0x90b   : > { %v2727_v38 = vpop.f32.mrf.mxu1 }
 0x90c   : > { %v2365_v39 = vpack.i.bf16 %v2725_v35, %v2727_v38 }
 0x911   : > { %v2250_v40 = vpop.f32.mrf.mxu1 }
 0x912   : > { %v1281_v41 = vsel %vm194_vm0, %v2250_v40, -inf }
 0x913   : > { %1282 = vmax.xlane.f32.xlu1 %v1281_v41  ;;  %v1269_v42 = vpop.f32.mrf.mxu1 }
 0x914   : > { %v1278_v43 = vsel %vm194_vm0, %v1269_v42, -inf }
 0x915   : > { %1279 = vmax.xlane.f32.xlu0 %v1278_v43 }
 0x924   : > { %1300 = vrot.lane.b32.xlu1 %v2589_v21, %s2494_s30 }
 0x928   : > { %1393 = vrot.lane.b32.xlu1 %v2548_v0, %s2495_s4 }
 0x92c   : > { %1391 = vrot.lane.b32.xlu1 %v2551_v1, %s2495_s4 }
 0x930   : > { %1389 = vrot.lane.b32.xlu1 %v2565_v5, %s2495_s4 }
 0x99c   : > { %v1283_v44 = vpop.xlane.xlu1 %1282 }
 0x99d   : > { %v1285_v45 = vsub.f32 %v2250_v40, %v1283_v44 }
 0x99e   : > { %v1280_v46 = vpop.xlane.xlu0 %1279 }
 0x99f   : > { %v1288_v47 = vmul.f32 1.442695, %v1285_v45  ;;  %v1284_v48 = vsub.f32 %v1269_v42, %v1280_v46 }
 0x9a0   : > { %v1301_v56 = vpop.permute.xlu1 %1300 }
 0x9a1   : > { %2425 = vpow2.f32 %v1288_v47  ;;  %v1286_v49 = vmul.f32 1.442695, %v1284_v48 }
 0x9a3   : > { %2427 = vpow2.f32 %v1286_v49 }
 0x9a4   : > { %v1394_v58 = vpop.permute.xlu1 %1393 }
 0x9a8   : > { %v1392_v9 = vpop.permute.xlu1 %1391 }
 0x9ac   : > { %v1390_v10 = vpop.permute.xlu1 %1389 }
 0x9ae   : > { %v2426_v50 = vpop.eup %2425 }
 0x9af   : > { %v1293_v51 = vsel %vm194_vm0, %v2426_v50, 0.0 }
 0x9b0   : > { %v2428_v52 = vpop.eup %2427  ;;  %1294 = vadd.xlane.f32.xlu0 %v1293_v51 }
 0x9b1   : > { %v1290_v53 = vsel %vm194_vm0, %v2428_v52, 0.0 }
 0x9b4   : > { %1291 = vadd.xlane.f32.xlu0 %v1290_v53 }
 0x9ca   : > { %1302 = vrot.lane.b32.xlu0 %v2586_v20, %s2494_s30 }
 0x9ce   : > { %1387 = vrot.lane.b32.xlu0 %v2556_v3, %s2495_s4 }
 0xa39   : > { %v1295_v54 = vpop.xlane.xlu0 %1294 }
 0xa3a   : > { %2429 = vrcp.f32 %v1295_v54 }
 0xa3d   : > { %v1292_v55 = vpop.xlane.xlu0 %1291 }
 0xa3e   : > { %2431 = vrcp.f32 %v1292_v55 }
 0xa41   : > { %v1303_v57 = vpop.permute.xlu0 %1302 }
 0xa42   : > { %2251 = vmatprep.subr.mxu0 %v1303_v57 }
 0xa43   : > { %2252 = vmatpush3.msra.mxu0 %v1303_v57 }
 0xa44   : > { %2253 = vmatprep.subr.mxu0 %v1301_v56 }
 0xa45   : > { %2254 = vmatpush3.msra.mxu0 %v1301_v56  ;;  %v1388_v8 = vpop.permute.xlu0 %1387 }
 0xa46   : > { %2258 = vmatprep.subr.msk.mxu0 %vm194_vm0, %v1394_v58 }
 0xa47   : > { %v2430_v2 = vpop.eup %2429 }
 0xa48   : > { %v1299_v7 = vmul.f32 %v2430_v2, %v2426_v50 }
 0xa4b   : > { %v2432_v4 = vpop.eup %2431 }
 0xa4c   : > { %v1298_v6 = vmul.f32 %v2432_v4, %v2428_v52  ;;  %v2350_v52 = vpack.i.bf16 %v2691_v59, %v2693_v60 }
 0xa4e   : > { %2255 = vmatprep.mubr.msk.f32.mxu0 %vm194_vm0, %v1298_v6  ;;  %v1876_v6 = vld [vmem:[#allocation2 + $0x68] sm:$0xff] }
 0xa4f   : > { %2256 = vmatmul.mubr.msk.f32.vlgmr.msra.gmra.mxu0 %vm194_vm0, %v1299_v7  ;;  %v1875_v7 = vld [vmem:[#allocation2 + $0x60] sm:$0xff] }
 0xa50   : > { %2259 = vmatpush3.xpose.msk.msra.mxu0 %vm194_vm0, %v1394_v58  ;;  %2262 = vmatprep.mubr.msk.f32.mxu0 %vm194_vm0, %v1388_v8  ;;  %v1874_v8 = vld [vmem:[#allocation2 + $0x58] sm:$0xff] }
 0xa51   : > { %2260 = vmatprep.subr.msk.mxu0 %vm194_vm0, %v1392_v9 }
 0xa54   : > { %2261 = vmatpush3.xpose.msk.msra.mxu0 %vm194_vm0, %v1392_v9  ;;  %v1873_v9 = vld [vmem:[#allocation2 + $0x50] sm:$0xff] }
 0xa57   : > { %2263 = vmatmul.mubr.msk.f32.vlgmr.msra.gmra.mxu0 %vm194_vm0, %v1390_v10  ;;  %v1872_v10 = vld [vmem:[#allocation2 + $0x48] sm:$0xff] }
 0xb0f   : > { %v2755_v11 = vpop.f32.mrf.mxu0 }
 0xb11   : > { %v2757_v12 = vpop.f32.mrf.mxu0 }
 0xb12   : > { %v2370_v13 = vpack.i.bf16 %v2755_v11, %v2757_v12  ;;  %v1871_v11 = vld [vmem:[#allocation2 + $0x40] sm:$0xff]  ;;  %v1870_v12 = vld [vmem:[#allocation2 + $0x38] sm:$0xff] }
 0xb17   : > { %v2264_v14 = vpop.f32.mrf.mxu0 }
 0xb18   : > { %v1481_v15 = vsel %vm194_vm0, %v2264_v14, -inf }
 0xb19   : > { %1482 = vmax.xlane.f32.xlu1 %v1481_v15  ;;  %v1469_v19 = vpop.f32.mrf.mxu0  ;;  %v1867_v15 = vld [vmem:[#allocation2 + $0x20] sm:$0xff] }
 0xb1a   : > { %v1478_v22 = vsel %vm194_vm0, %v1469_v19, -inf }
 0xb1b   : > { %1479 = vmax.xlane.f32.xlu0 %v1478_v22  ;;  %v1865_v22 = vld [vmem:[#allocation2 + $0x10] sm:$0xff] }
 0xb2a   : > { %1500 = vrot.lane.b32.xlu1 %v2589_v21, %s2495_s4 }
 0xb2e   : > { %1593 = vrot.lane.b32.xlu1 %v2548_v0, %s2496_s5 }
 0xb32   : > { %1591 = vrot.lane.b32.xlu1 %v2551_v1, %s2496_s5 }
 0xb36   : > { %1589 = vrot.lane.b32.xlu1 %v2565_v5, %s2496_s5 }
 0xba2   : > { %v1483_v23 = vpop.xlane.xlu1 %1482 }
 0xba3   : > { %v1485_v24 = vsub.f32 %v2264_v14, %v1483_v23  ;;  %v1868_v14 = vld [vmem:[#allocation2 + $0x28] sm:$0xff] }
 0xba4   : > { %v1480_v25 = vpop.xlane.xlu0 %1479  ;;  %v1864_v23 = vld [vmem:[#allocation2 + $0x8] sm:$0xff] }
 0xba5   : > { %v1488_v26 = vmul.f32 1.442695, %v1485_v24  ;;  %v1484_v27 = vsub.f32 %v1469_v19, %v1480_v25  ;;  %v1866_v19 = vld [vmem:[#allocation2 + $0x18] sm:$0xff]  ;;  %v1863_v24 = vld [vmem:[#allocation2] sm:$0xff] }
 0xba6   : > { %v1501_v32 = vpop.permute.xlu1 %1500 }
 0xba7   : > { %2433 = vpow2.f32 %v1488_v26  ;;  %v1486_v28 = vmul.f32 1.442695, %v1484_v27 }
 0xba9   : > { %2435 = vpow2.f32 %v1486_v28 }
 0xbaa   : > { %v1594_v34 = vpop.permute.xlu1 %1593 }
 0xbb4   : > { %v2434_v29 = vpop.eup %2433 }
 0xbb5   : > { %v1493_v30 = vsel %vm194_vm0, %v2434_v29, 0.0 }
 0xbb6   : > { %v2436_v31 = vpop.eup %2435  ;;  %1494 = vadd.xlane.f32.xlu0 %v1493_v30 }
 0xbb7   : > { %v1490_v0 = vsel %vm194_vm0, %v2436_v31, 0.0 }
 0xbba   : > { %1491 = vadd.xlane.f32.xlu0 %v1490_v0 }
 0xbd0   : > { %1502 = vrot.lane.b32.xlu0 %v2586_v20, %s2495_s4 }
 0xbd4   : > { %1587 = vrot.lane.b32.xlu0 %v2556_v3, %s2496_s5  ;;  %v1592_v3 = vpop.permute.xlu1 %1591 }
 0xbd8   : > { %v1590_v45 = vpop.permute.xlu1 %1589 }
 0xc3f   : > { %v1495_v1 = vpop.xlane.xlu0 %1494 }
 0xc40   : > { %2437 = vrcp.f32 %v1495_v1 }
 0xc43   : > { %v1492_v5 = vpop.xlane.xlu0 %1491 }
 0xc44   : > { %2439 = vrcp.f32 %v1492_v5 }
 0xc47   : > { %v1503_v33 = vpop.permute.xlu0 %1502 }
 0xc48   : > { %2265 = vmatprep.subr.mxu1 %v1503_v33 }
 0xc49   : > { %2266 = vmatpush3.msra.mxu1 %v1503_v33 }
 0xc4a   : > { %2267 = vmatprep.subr.mxu1 %v1501_v32 }
 0xc4b   : > { %2268 = vmatpush3.msra.mxu1 %v1501_v32  ;;  %v1588_v44 = vpop.permute.xlu0 %1587 }
 0xc4c   : > { %2272 = vmatprep.subr.msk.mxu1 %vm194_vm0, %v1594_v34 }
 0xc4d   : > { %v2438_v40 = vpop.eup %2437 }
 0xc4e   : > { %v1499_v43 = vmul.f32 %v2438_v40, %v2434_v29 }
 0xc51   : > { %v2440_v41 = vpop.eup %2439 }
 0xc52   : > { %v1498_v42 = vmul.f32 %v2440_v41, %v2436_v31 }
 0xc54   : > { %2269 = vmatprep.mubr.msk.f32.mxu1 %vm194_vm0, %v1498_v42 }
 0xc55   : > { %2270 = vmatmul.mubr.msk.f32.vlgmr.msra.gmra.mxu1 %vm194_vm0, %v1499_v43 }
 0xc56   : > { %2273 = vmatpush3.xpose.msk.msra.mxu1 %vm194_vm0, %v1594_v34  ;;  %2276 = vmatprep.mubr.msk.f32.mxu1 %vm194_vm0, %v1588_v44 }
 0xc57   : > { %2274 = vmatprep.subr.msk.mxu1 %vm194_vm0, %v1592_v3 }
 0xc5a   : > { %2275 = vmatpush3.xpose.msk.msra.mxu1 %vm194_vm0, %v1592_v3 }
 0xc5d   : > { %2277 = vmatmul.mubr.msk.f32.vlgmr.msra.gmra.mxu1 %vm194_vm0, %v1590_v45 }
 0xd15   : > { %v2271_v46 = vpop.f32.mrf.mxu1 }
 0xd17   : > { %v1578_v47 = vpop.f32.mrf.mxu1 }
 0xd18   : > { %v2375_v53 = vpack.i.bf16 %v2271_v46, %v1578_v47 }
 0xd1d   : > { %v2278_v48 = vpop.f32.mrf.mxu1 }
 0xd1e   : > { %v1681_v49 = vsel %vm194_vm0, %v2278_v48, -inf }
 0xd1f   : > { %1682 = vmax.xlane.f32.xlu1 %v1681_v49  ;;  %v1669_v50 = vpop.f32.mrf.mxu1 }
 0xd20   : > { %v1678_v51 = vsel %vm194_vm0, %v1669_v50, -inf }
 0xd21   : > { %1679 = vmax.xlane.f32.xlu0 %v1678_v51 }
 0xd30   : > { %1700 = vrot.lane.b32.xlu1 %v2589_v21, %s2496_s5 }
 0xd34   : > { %2351 = vrot.lane.b32.xlu1 %v2350_v52, %s2496_s5 }
 0xd38   : > { %2356 = vrot.lane.b32.xlu1 %v2355_v18, %s2495_s4 }
 0xd3c   : > { %2366 = vrot.lane.b32.xlu1 %v2365_v39, %s2493_s29 }
 0xd40   : > { %2376 = vrot.lane.b32.xlu1 %v2375_v53, %s2491_s27 }
 0xda8   : > { %v1683_v54 = vpop.xlane.xlu1 %1682 }
 0xda9   : > { %v1685_v21 = vsub.f32 %v2278_v48, %v1683_v54 }
 0xdaa   : > { %v1680_v55 = vpop.xlane.xlu0 %1679 }
 0xdab   : > { %v1688_v56 = vmul.f32 1.442695, %v1685_v21  ;;  %v1684_v59 = vsub.f32 %v1669_v50, %v1680_v55 }
 0xdac   : > { %v1701_v58 = vpop.permute.xlu1 %1700 }
 0xdad   : > { %2441 = vpow2.f32 %v1688_v56  ;;  %v1686_v60 = vmul.f32 1.442695, %v1684_v59 }
 0xdaf   : > { %2443 = vpow2.f32 %v1686_v60 }
 0xdb0   : > { %v2352_v28 = vpop.permute.xlu1 %2351 }
 0xdb1   : > { %v2354_v31 = vunpack.i.h.bf16 %v2352_v28  ;;  %v2353_v0 = vunpack.i.l.bf16 %v2352_v28 }
 0xdb3   : > { %v1844_v41 = vsel %vm194_vm0, %v2615_v36, %v2354_v31  ;;  %v1843_v42 = vsel %vm194_vm0, %v2617_v37, %v2353_v0 }
 0xdb4   : > { %v2357_v29 = vpop.permute.xlu1 %2356 }
 0xdb5   : > { %v2359_v1 = vunpack.i.h.bf16 %v2357_v29  ;;  %v2358_v5 = vunpack.i.l.bf16 %v2357_v29 }
 0xdb7   : > { %v1846_v43 = vsel %vm1845_vm1, %v1843_v42, %v2358_v5  ;;  %v1847_v44 = vsel %vm1845_vm1, %v1844_v41, %v2359_v1 }
 0xdb8   : > { %v2367_v32 = vpop.permute.xlu1 %2366 }
 0xdb9   : > { %v2369_v48 = vunpack.i.h.bf16 %v2367_v32  ;;  %v2368_v49 = vunpack.i.l.bf16 %v2367_v32 }
 0xdba   : > { %v2442_v57 = vpop.eup %2441 }
 0xdbb   : > { %v1693_v16 = vsel %vm194_vm0, %v2442_v57, 0.0 }
 0xdbc   : > { %v2444_v17 = vpop.eup %2443  ;;  %1694 = vadd.xlane.f32.xlu0 %v1693_v16  ;;  %v2377_v50 = vpop.permute.xlu1 %2376 }
 0xdbd   : > { %v1690_v18 = vsel %vm194_vm0, %v2444_v17, 0.0  ;;  %v2379_v36 = vunpack.i.h.bf16 %v2377_v50  ;;  %v2378_v21 = vunpack.i.l.bf16 %v2377_v50 }
 0xdc0   : > { %1691 = vadd.xlane.f32.xlu0 %v1690_v18 }
 0xdd6   : > { %1702 = vrot.lane.b32.xlu0 %v2586_v20, %s2496_s5 }
 0xdda   : > { %2361 = vrot.lane.b32.xlu0 %v2360_v63, %s2494_s30  ;;  %v1877_v63 = vld [vmem:[#allocation2 + $0x70] sm:$0xff] }
 0xdde   : > { %2371 = vrot.lane.b32.xlu0 %v2370_v13, %s2492_s28  ;;  %v1869_v13 = vld [vmem:[#allocation2 + $0x30] sm:$0xff] }
 0xe45   : > { %v1695_v35 = vpop.xlane.xlu0 %1694 }
 0xe46   : > { %2445 = vrcp.f32 %v1695_v35 }
 0xe49   : > { %v1692_v38 = vpop.xlane.xlu0 %1691 }
 0xe4a   : > { %2447 = vrcp.f32 %v1692_v38 }
 0xe4d   : > { %v1703_v39 = vpop.permute.xlu0 %1702 }
 0xe4e   : > { %2279 = vmatprep.subr.mxu0 %v1703_v39 }
 0xe4f   : > { %2280 = vmatpush3.msra.mxu0 %v1703_v39 }
 0xe50   : > { %2281 = vmatprep.subr.mxu0 %v1701_v58 }
 0xe51   : > { %2282 = vmatpush3.msra.mxu0 %v1701_v58  ;;  %v2362_v30 = vpop.permute.xlu0 %2361 }
 0xe52   : > { %2286 = vmatprep.subr.mxu0 %v1878_v62  ;;  %v2364_v33 = vunpack.i.h.bf16 %v2362_v30  ;;  %v2363_v34 = vunpack.i.l.bf16 %v2362_v30 }
 0xe53   : > { %v2446_v20 = vpop.eup %2445 }
 0xe54   : > { %v1699_v61 = vmul.f32 %v2446_v20, %v2442_v57  ;;  %v1850_v3 = vsel %vm1848_vm2, %v1847_v44, %v2364_v33  ;;  %v1849_v45 = vsel %vm1848_vm2, %v1846_v43, %v2363_v34 }
 0xe55   : > { %v2372_v40 = vpop.permute.xlu0 %2371  ;;  %v1853_v51 = vsel %vm1851_vm3, %v1850_v3, %v2369_v48  ;;  %v1852_v52 = vsel %vm1851_vm3, %v1849_v45, %v2368_v49 }
 0xe56   : > { %v2374_v46 = vunpack.i.h.bf16 %v2372_v40  ;;  %v2373_v47 = vunpack.i.l.bf16 %v2372_v40 }
 0xe57   : > { %v2448_v2 = vpop.eup %2447 }
 0xe58   : > { %v1698_v4 = vmul.f32 %v2448_v2, %v2444_v17  ;;  %v1856_v53 = vsel %vm1854_vm4, %v1853_v51, %v2374_v46  ;;  %v1855_v54 = vsel %vm1854_vm4, %v1852_v52, %v2373_v47  ;;  %v2088_v17 = vld [vmem:[%s2832_s2] ss:$0 sm:$0xff] }
 0xe59   : > { %v1858_v59 = vsel %vm1857_vm5, %v1855_v54, %v2378_v21  ;;  %v1859_v60 = vsel %vm1857_vm5, %v1856_v53, %v2379_v36 }
 0xe5a   : > { %2283 = vmatprep.mubr.msk.f32.mxu0 %vm194_vm0, %v1698_v4 }
 0xe5b   : > { %2284 = vmatmul.mubr.msk.f32.vlgmr.msra.gmra.mxu0 %vm194_vm0, %v1699_v61 }
 0xe5c   : > { %2287 = vmatpush3.msra.mxu0 %v1878_v62 }
 0xe5d   : > { %2288 = vmatprep.subr.mxu0 %v1877_v63 }
 0xe5e   : > { %2289 = vmatpush3.msra.mxu0 %v1877_v63 }
 0xe5f   : > { %2290 = vmatprep.subr.mxu0 %v1876_v6 }
 0xe60   : > { %2291 = vmatpush3.msra.mxu0 %v1876_v6 }
 0xe61   : > { %2292 = vmatprep.subr.mxu0 %v1875_v7 }
 0xe62   : > { %2293 = vmatpush3.msra.mxu0 %v1875_v7 }
 0xe63   : > { %2294 = vmatprep.subr.mxu0 %v1874_v8 }
 0xe64   : > { %2295 = vmatpush3.msra.mxu0 %v1874_v8 }
 0xe65   : > { %2296 = vmatprep.subr.mxu0 %v1873_v9 }
 0xe66   : > { %2297 = vmatpush3.msra.mxu0 %v1873_v9 }
 0xe67   : > { %2298 = vmatprep.subr.mxu0 %v1872_v10 }
 0xe68   : > { %2299 = vmatpush3.msra.mxu0 %v1872_v10 }
 0xe69   : > { %2300 = vmatprep.subr.mxu0 %v1871_v11 }
 0xe6a   : > { %2301 = vmatpush3.msra.mxu0 %v1871_v11 }
 0xe6b   : > { %2302 = vmatprep.subr.mxu0 %v1870_v12 }
 0xe6c   : > { %2303 = vmatpush3.msra.mxu0 %v1870_v12 }
 0xe6d   : > { %2304 = vmatprep.subr.mxu0 %v1869_v13 }
 0xe6e   : > { %2305 = vmatpush3.msra.mxu0 %v1869_v13 }
 0xe6f   : > { %2306 = vmatprep.subr.mxu0 %v1868_v14 }
 0xe70   : > { %2307 = vmatpush3.msra.mxu0 %v1868_v14 }
 0xe71   : > { %2308 = vmatprep.subr.mxu0 %v1867_v15 }
 0xe72   : > { %2309 = vmatpush3.msra.mxu0 %v1867_v15 }
 0xe73   : > { %2310 = vmatprep.subr.mxu0 %v1866_v19 }
 0xe74   : > { %2311 = vmatpush3.msra.mxu0 %v1866_v19 }
 0xe75   : > { %2312 = vmatprep.subr.mxu0 %v1865_v22 }
 0xe76   : > { %2313 = vmatpush3.msra.mxu0 %v1865_v22 }
 0xe77   : > { %2314 = vmatprep.subr.mxu0 %v1864_v23 }
 0xe78   : > { %2315 = vmatpush3.msra.mxu0 %v1864_v23 }
 0xe79   : > { %2316 = vmatprep.subr.mxu0 %v1863_v24 }
 0xe7a   : > { %2317 = vmatpush3.msra.mxu0 %v1863_v24 }
 0xf1b   : > { %v2285_v25 = vpop.f32.mrf.mxu0 }
 0xf1d   : > { %v1778_v26 = vpop.f32.mrf.mxu0 }
 0xf1e   : > { %v2380_v27 = vpack.i.bf16 %v2285_v25, %v1778_v26 }
 0xf20   : > { %2381 = vrot.lane.b32.xlu0 %v2380_v27, %s2490_s26 }
 0xf92   : > { %v2382_v37 = vpop.permute.xlu0 %2381 }
 0xf93   : > { %v2384_v55 = vunpack.i.h.bf16 %v2382_v37  ;;  %v2383_v56 = vunpack.i.l.bf16 %v2382_v37 }
 0xf95   : > { %v1861_v57 = vsel %vm1860_vm6, %v1858_v59, %v2383_v56  ;;  %v1862_v16 = vsel %vm1860_vm6, %v1859_v60, %v2384_v55 }
 0xf96   : > { %2318 = vmatprep.mubr.f32.mxu0 %v1861_v57 }
 0xf97   : > { %2319 = vmatmul.mubr.f32.vlgmr.msra.gmra.mxu0 %v1862_v16 }
0x1057   : > { %v2320_v18 = vpop.f32.mrf.mxu0 }
0x1058   : > { %v1958_v35 = vadd.f32 %v2320_v18, %v2088_v17 }
0x1059   : > { %v1952_v38 = vpop.f32.mrf.mxu0 }
0x105a   : > { %1962 = vst [vmem:[%s185_s11 + $0x8] sm:$0xff] %v1958_v35  ;;  %v1953_v39 = vadd.f32 %v2088_v17, %v1952_v38 }
0x105c   : > { %1961 = vst [vmem:[%s185_s11] sm:$0xff] %v1953_v39 }
0x105d PF: > { %s14_s12 = sadd.s32 1, %s2485_s12  }
0x105e   : > { %p11_p1 = scmp.ge.s32.totalorder %s14_s12, 4  }
0x1060   :  { %13 = sbr.rel (!%p11_p1) target bundleno = 1 (0x1), region = 67 }
0x1065   :  { %1984 = vsyncpa [#allocation3], 1 }
0x1066   :  { %1986 = vsyncpa [#allocation3 + $0x1], 1 }

// kernel: _lambda_.11
= control target key start
LH: loop header
LB: loop body
LE: loop exit
PB: predicated region body
PF: predicated region fallthrough
CT: control target
= control target key end

     0   :  { %s1151_s0 = inlined_call_operand.vmem [shape: f32[32,128], index: 0, kind: input, shape index: {}]   ;;  %s1152_s1 = inlined_call_operand.vmem [shape: f32[128,512], index: 1, kind: input, shape index: {}]   ;;  %s1153_s2 = inlined_call_operand.vmem [shape: f32[1,512], index: 2, kind: input, shape index: {}]   ;;  %s1154_s3 = inlined_call_operand.vmem [shape: f32[512,128], index: 3, kind: input, shape index: {}]   ;;  %s1155_s4 = inlined_call_operand.vmem [shape: f32[1,128], index: 4, kind: input, shape index: {}]   ;;  %s1156_s5 = inlined_call_operand.hbm [shape: f32[32,128], index: 5, kind: output, shape index: {}]  }
   0x1   :  { %v94_v0 = vld [vmem:[%s1152_s1 + $0x1e8] sm:$0xff]  ;;  %v96_v1 = vld [vmem:[%s1152_s1 + $0x1f8] sm:$0xff]  ;;  %v93_v2 = vld [vmem:[%s1152_s1 + $0x1e0] sm:$0xff] }
   0x2   :  { %119 = vmatprep.subr.mxu0 %v94_v0  ;;  %208 = vmatprep.subr.mxu1 %v96_v1  ;;  %v95_v3 = vld [vmem:[%s1152_s1 + $0x1f0] sm:$0xff]  ;;  %v90_v4 = vld [vmem:[%s1152_s1 + $0x1c8] sm:$0xff]  ;;  %v92_v5 = vld [vmem:[%s1152_s1 + $0x1d8] sm:$0xff]  ;;  %v712_v1 = vmov 0.0  }
   0x3   :  { %120 = vmatpush1.msra.mxu0 %v93_v2  ;;  %209 = vmatpush1.msra.mxu1 %v95_v3  ;;  %v89_v6 = vld [vmem:[%s1152_s1 + $0x1c0] sm:$0xff]  ;;  %v91_v7 = vld [vmem:[%s1152_s1 + $0x1d0] sm:$0xff]  ;;  %v86_v8 = vld [vmem:[%s1152_s1 + $0x1a8] sm:$0xff] }
   0x4   :  { %121 = vmatprep.subr.mxu0 %v90_v4  ;;  %210 = vmatprep.subr.mxu1 %v92_v5  ;;  %v88_v9 = vld [vmem:[%s1152_s1 + $0x1b8] sm:$0xff]  ;;  %v85_v10 = vld [vmem:[%s1152_s1 + $0x1a0] sm:$0xff]  ;;  %v87_v11 = vld [vmem:[%s1152_s1 + $0x1b0] sm:$0xff] }
   0x5   :  { %122 = vmatpush1.msra.mxu0 %v89_v6  ;;  %211 = vmatpush1.msra.mxu1 %v91_v7  ;;  %v82_v12 = vld [vmem:[%s1152_s1 + $0x188] sm:$0xff]  ;;  %v84_v13 = vld [vmem:[%s1152_s1 + $0x198] sm:$0xff]  ;;  %v81_v14 = vld [vmem:[%s1152_s1 + $0x180] sm:$0xff] }
   0x6   :  { %123 = vmatprep.subr.mxu0 %v86_v8  ;;  %212 = vmatprep.subr.mxu1 %v88_v9  ;;  %v83_v15 = vld [vmem:[%s1152_s1 + $0x190] sm:$0xff]  ;;  %v78_v16 = vld [vmem:[%s1152_s1 + $0x168] sm:$0xff]  ;;  %v80_v17 = vld [vmem:[%s1152_s1 + $0x178] sm:$0xff] }
   0x7   :  { %124 = vmatpush1.msra.mxu0 %v85_v10  ;;  %213 = vmatpush1.msra.mxu1 %v87_v11  ;;  %v77_v18 = vld [vmem:[%s1152_s1 + $0x160] sm:$0xff]  ;;  %v79_v19 = vld [vmem:[%s1152_s1 + $0x170] sm:$0xff]  ;;  %v74_v20 = vld [vmem:[%s1152_s1 + $0x148] sm:$0xff] }
   0x8   :  { %125 = vmatprep.subr.mxu0 %v82_v12  ;;  %214 = vmatprep.subr.mxu1 %v84_v13  ;;  %v76_v21 = vld [vmem:[%s1152_s1 + $0x158] sm:$0xff]  ;;  %v73_v22 = vld [vmem:[%s1152_s1 + $0x140] sm:$0xff]  ;;  %v75_v23 = vld [vmem:[%s1152_s1 + $0x150] sm:$0xff] }
   0x9   :  { %126 = vmatpush1.msra.mxu0 %v81_v14  ;;  %215 = vmatpush1.msra.mxu1 %v83_v15  ;;  %v70_v24 = vld [vmem:[%s1152_s1 + $0x128] sm:$0xff]  ;;  %v72_v25 = vld [vmem:[%s1152_s1 + $0x138] sm:$0xff]  ;;  %v69_v26 = vld [vmem:[%s1152_s1 + $0x120] sm:$0xff] }
   0xa   :  { %127 = vmatprep.subr.mxu0 %v78_v16  ;;  %216 = vmatprep.subr.mxu1 %v80_v17  ;;  %v71_v27 = vld [vmem:[%s1152_s1 + $0x130] sm:$0xff]  ;;  %v66_v28 = vld [vmem:[%s1152_s1 + $0x108] sm:$0xff]  ;;  %v68_v29 = vld [vmem:[%s1152_s1 + $0x118] sm:$0xff] }
   0xb   :  { %128 = vmatpush1.msra.mxu0 %v77_v18  ;;  %217 = vmatpush1.msra.mxu1 %v79_v19  ;;  %v65_v30 = vld [vmem:[%s1152_s1 + $0x100] sm:$0xff]  ;;  %v67_v31 = vld [vmem:[%s1152_s1 + $0x110] sm:$0xff]  ;;  %v62_v32 = vld [vmem:[%s1152_s1 + $0xe8] sm:$0xff] }
   0xc   :  { %129 = vmatprep.subr.mxu0 %v74_v20  ;;  %218 = vmatprep.subr.mxu1 %v76_v21  ;;  %v64_v33 = vld [vmem:[%s1152_s1 + $0xf8] sm:$0xff]  ;;  %v61_v34 = vld [vmem:[%s1152_s1 + $0xe0] sm:$0xff]  ;;  %v63_v35 = vld [vmem:[%s1152_s1 + $0xf0] sm:$0xff] }
   0xd   :  { %130 = vmatpush1.msra.mxu0 %v73_v22  ;;  %219 = vmatpush1.msra.mxu1 %v75_v23  ;;  %v58_v36 = vld [vmem:[%s1152_s1 + $0xc8] sm:$0xff]  ;;  %v60_v37 = vld [vmem:[%s1152_s1 + $0xd8] sm:$0xff]  ;;  %v57_v38 = vld [vmem:[%s1152_s1 + $0xc0] sm:$0xff] }
   0xe   :  { %131 = vmatprep.subr.mxu0 %v70_v24  ;;  %220 = vmatprep.subr.mxu1 %v72_v25  ;;  %v59_v39 = vld [vmem:[%s1152_s1 + $0xd0] sm:$0xff]  ;;  %v54_v40 = vld [vmem:[%s1152_s1 + $0xa8] sm:$0xff]  ;;  %v56_v41 = vld [vmem:[%s1152_s1 + $0xb8] sm:$0xff] }
   0xf   :  { %132 = vmatpush1.msra.mxu0 %v69_v26  ;;  %221 = vmatpush1.msra.mxu1 %v71_v27  ;;  %v53_v42 = vld [vmem:[%s1152_s1 + $0xa0] sm:$0xff]  ;;  %v55_v43 = vld [vmem:[%s1152_s1 + $0xb0] sm:$0xff]  ;;  %v50_v44 = vld [vmem:[%s1152_s1 + $0x88] sm:$0xff] }
  0x10   :  { %133 = vmatprep.subr.mxu0 %v66_v28  ;;  %222 = vmatprep.subr.mxu1 %v68_v29  ;;  %v52_v45 = vld [vmem:[%s1152_s1 + $0x98] sm:$0xff]  ;;  %v49_v46 = vld [vmem:[%s1152_s1 + $0x80] sm:$0xff]  ;;  %v51_v47 = vld [vmem:[%s1152_s1 + $0x90] sm:$0xff] }
  0x11   :  { %134 = vmatpush1.msra.mxu0 %v65_v30  ;;  %223 = vmatpush1.msra.mxu1 %v67_v31  ;;  %v46_v48 = vld [vmem:[%s1152_s1 + $0x68] sm:$0xff]  ;;  %v48_v49 = vld [vmem:[%s1152_s1 + $0x78] sm:$0xff]  ;;  %v45_v50 = vld [vmem:[%s1152_s1 + $0x60] sm:$0xff] }
  0x12   :  { %135 = vmatprep.subr.mxu0 %v62_v32  ;;  %224 = vmatprep.subr.mxu1 %v64_v33  ;;  %v47_v51 = vld [vmem:[%s1152_s1 + $0x70] sm:$0xff]  ;;  %v42_v52 = vld [vmem:[%s1152_s1 + $0x48] sm:$0xff]  ;;  %v44_v53 = vld [vmem:[%s1152_s1 + $0x58] sm:$0xff] }
  0x13   :  { %136 = vmatpush1.msra.mxu0 %v61_v34  ;;  %225 = vmatpush1.msra.mxu1 %v63_v35  ;;  %v41_v54 = vld [vmem:[%s1152_s1 + $0x40] sm:$0xff]  ;;  %v43_v55 = vld [vmem:[%s1152_s1 + $0x50] sm:$0xff]  ;;  %v38_v56 = vld [vmem:[%s1152_s1 + $0x28] sm:$0xff] }
  0x14   :  { %137 = vmatprep.subr.mxu0 %v58_v36  ;;  %226 = vmatprep.subr.mxu1 %v60_v37  ;;  %v40_v57 = vld [vmem:[%s1152_s1 + $0x38] sm:$0xff]  ;;  %v37_v58 = vld [vmem:[%s1152_s1 + $0x20] sm:$0xff]  ;;  %v39_v59 = vld [vmem:[%s1152_s1 + $0x30] sm:$0xff] }
  0x15   :  { %138 = vmatpush1.msra.mxu0 %v57_v38  ;;  %227 = vmatpush1.msra.mxu1 %v59_v39  ;;  %v34_v60 = vld [vmem:[%s1152_s1 + $0x8] sm:$0xff]  ;;  %v36_v61 = vld [vmem:[%s1152_s1 + $0x18] sm:$0xff]  ;;  %v33_v62 = vld [vmem:[%s1152_s1] sm:$0xff] }
  0x16   :  { %139 = vmatprep.subr.mxu0 %v54_v40  ;;  %228 = vmatprep.subr.mxu1 %v56_v41  ;;  %v35_v63 = vld [vmem:[%s1152_s1 + $0x10] sm:$0xff]  ;;  %v29_v0 = vld [vmem:[%s1151_s0] sm:$0xff]  ;;  %v348_v2 = vld [vmem:[%s1154_s3 + $0xf8] sm:$0xff] }
  0x17   :  { %140 = vmatpush1.msra.mxu0 %v53_v42  ;;  %229 = vmatpush1.msra.mxu1 %v55_v43  ;;  %v380_v3 = vld [vmem:[%s1154_s3 + $0x1f8] sm:$0xff]  ;;  %v30_v6 = vld [vmem:[%s1151_s0 + $0x8] sm:$0xff]  ;;  %v347_v7 = vld [vmem:[%s1154_s3 + $0xf0] sm:$0xff] }
  0x18   :  { %141 = vmatprep.subr.mxu0 %v50_v44  ;;  %230 = vmatprep.subr.mxu1 %v52_v45  ;;  %v332_v4 = vld [vmem:[%s1154_s3 + $0x78] sm:$0xff]  ;;  %v379_v8 = vld [vmem:[%s1154_s3 + $0x1f0] sm:$0xff] }
  0x19   :  { %142 = vmatpush1.msra.mxu0 %v49_v46  ;;  %231 = vmatpush1.msra.mxu1 %v51_v47  ;;  %v364_v5 = vld [vmem:[%s1154_s3 + $0x178] sm:$0xff]  ;;  %v331_v9 = vld [vmem:[%s1154_s3 + $0x70] sm:$0xff] }
  0x1a   :  { %143 = vmatprep.subr.mxu0 %v46_v48  ;;  %232 = vmatprep.subr.mxu1 %v48_v49  ;;  %v363_v10 = vld [vmem:[%s1154_s3 + $0x170] sm:$0xff] }
  0x1b   :  { %144 = vmatpush1.msra.mxu0 %v45_v50  ;;  %233 = vmatpush1.msra.mxu1 %v47_v51  ;;  %v31_v11 = vld [vmem:[%s1151_s0 + $0x10] sm:$0xff] }
  0x1c   :  { %145 = vmatprep.subr.mxu0 %v42_v52  ;;  %234 = vmatprep.subr.mxu1 %v44_v53 }
  0x1d   :  { %146 = vmatpush1.msra.mxu0 %v41_v54  ;;  %235 = vmatpush1.msra.mxu1 %v43_v55 }
  0x1e   :  { %147 = vmatprep.subr.mxu0 %v38_v56  ;;  %236 = vmatprep.subr.mxu1 %v40_v57 }
  0x1f   :  { %148 = vmatpush1.msra.mxu0 %v37_v58  ;;  %237 = vmatpush1.msra.mxu1 %v39_v59 }
  0x20   :  { %149 = vmatprep.subr.mxu0 %v34_v60  ;;  %238 = vmatprep.subr.mxu1 %v36_v61 }
  0x21   :  { %150 = vmatpush1.msra.mxu0 %v33_v62  ;;  %183 = vmatprep.mubr.f32.mxu0 %v712_v1 }
  0x22   :  { %239 = vmatpush1.msra.mxu1 %v35_v63  ;;  %272 = vmatprep.mubr.f32.mxu1 %v712_v1 }
  0x23   :  { %184 = vmatmul.mubr.f32.vlgmr.msra.gmra.mxu0 %v29_v0  ;;  %273 = vmatmul.mubr.f32.vlgmr.msra.gmra.mxu1 %v29_v0 }
  0x24   :  { %189 = vmatprep.mubr.f32.mxu0 %v712_v1  ;;  %278 = vmatprep.mubr.f32.mxu1 %v712_v1 }
  0x25   :  { %598 = vmatprep.subr.mxu0 %v348_v2  ;;  %642 = vmatprep.subr.mxu1 %v380_v3 }
  0x26   :  { %599 = vmatpush3.msra.mxu0 %v332_v4  ;;  %643 = vmatpush3.msra.mxu1 %v364_v5 }
  0x27   :  { %190 = vmatmul.mubr.f32.gmra.mxu0 %v30_v6  ;;  %279 = vmatmul.mubr.f32.gmra.mxu1 %v30_v6 }
  0x28   :  { %195 = vmatprep.mubr.f32.mxu0 %v712_v1  ;;  %284 = vmatprep.mubr.f32.mxu1 %v712_v1 }
  0x29   :  { %10 = vsyncpa [#allocation4], 0  ;;  %600 = vmatprep.subr.mxu0 %v347_v7  ;;  %644 = vmatprep.subr.mxu1 %v379_v8  ;;  %v346_v12 = vld [vmem:[%s1154_s3 + $0xe8] sm:$0xff]  ;;  %v32_v16 = vld [vmem:[%s1151_s0 + $0x18] sm:$0xff]  ;;  %v99_v5 = vlaneseq }
  0x2a   :  { %601 = vmatpush3.msra.mxu0 %v331_v9  ;;  %645 = vmatpush3.msra.mxu1 %v363_v10  ;;  %v378_v13 = vld [vmem:[%s1154_s3 + $0x1e8] sm:$0xff]  ;;  %v345_v17 = vld [vmem:[%s1154_s3 + $0xe0] sm:$0xff]  ;;  %v344_v21 = vld [vmem:[%s1154_s3 + $0xd8] sm:$0xff] }
  0x2b   :  { %196 = vmatmul.mubr.f32.gmra.mxu0 %v31_v11  ;;  %285 = vmatmul.mubr.f32.gmra.mxu1 %v31_v11  ;;  %v330_v14 = vld [vmem:[%s1154_s3 + $0x68] sm:$0xff]  ;;  %v377_v18 = vld [vmem:[%s1154_s3 + $0x1e0] sm:$0xff]  ;;  %v376_v22 = vld [vmem:[%s1154_s3 + $0x1d8] sm:$0xff]  ;;  %v100_v6 = vshrl.u32 %v99_v5, 7 }
  0x2c   :  { %v362_v15 = vld [vmem:[%s1154_s3 + $0x168] sm:$0xff]  ;;  %201 = vmatprep.mubr.f32.mxu0 %v712_v1  ;;  %290 = vmatprep.mubr.f32.mxu1 %v712_v1  ;;  %v329_v19 = vld [vmem:[%s1154_s3 + $0x60] sm:$0xff]  ;;  %v328_v23 = vld [vmem:[%s1154_s3 + $0x58] sm:$0xff] }
  0x2d   :  { %602 = vmatprep.subr.mxu0 %v346_v12  ;;  %646 = vmatprep.subr.mxu1 %v378_v13  ;;  %v361_v20 = vld [vmem:[%s1154_s3 + $0x160] sm:$0xff]  ;;  %v360_v24 = vld [vmem:[%s1154_s3 + $0x158] sm:$0xff]  ;;  %v343_v25 = vld [vmem:[%s1154_s3 + $0xd0] sm:$0xff]  ;;  %v101_v7 = vsub.s32 0, %v100_v6  ;;  %v109_v8 = vsub.s32 2, %v100_v6  ;;  %v105_v10 = vsub.s32 1, %v100_v6 }
  0x2e   :  { %603 = vmatpush3.msra.mxu0 %v330_v14  ;;  %647 = vmatpush3.msra.mxu1 %v362_v15  ;;  %v375_v26 = vld [vmem:[%s1154_s3 + $0x1d0] sm:$0xff]  ;;  %v342_v29 = vld [vmem:[%s1154_s3 + $0xc8] sm:$0xff]  ;;  %v341_v33 = vld [vmem:[%s1154_s3 + $0xc0] sm:$0xff]  ;;  %v113_v11 = vsub.s32 3, %v100_v6 }
  0x2f   :  { %202 = vmatmul.mubr.f32.gmra.mxu0 %v32_v16  ;;  %291 = vmatmul.mubr.f32.gmra.mxu1 %v32_v16  ;;  %v327_v27 = vld [vmem:[%s1154_s3 + $0x50] sm:$0xff]  ;;  %v374_v30 = vld [vmem:[%s1154_s3 + $0x1c8] sm:$0xff]  ;;  %v373_v34 = vld [vmem:[%s1154_s3 + $0x1c0] sm:$0xff] }
  0x30   :  { %604 = vmatprep.subr.mxu0 %v345_v17  ;;  %648 = vmatprep.subr.mxu1 %v377_v18  ;;  %v359_v28 = vld [vmem:[%s1154_s3 + $0x150] sm:$0xff]  ;;  %v326_v31 = vld [vmem:[%s1154_s3 + $0x48] sm:$0xff]  ;;  %v325_v35 = vld [vmem:[%s1154_s3 + $0x40] sm:$0xff] }
  0x31   :  { %605 = vmatpush3.msra.mxu0 %v329_v19  ;;  %649 = vmatpush3.msra.mxu1 %v361_v20  ;;  %v358_v32 = vld [vmem:[%s1154_s3 + $0x148] sm:$0xff]  ;;  %v357_v36 = vld [vmem:[%s1154_s3 + $0x140] sm:$0xff]  ;;  %v340_v37 = vld [vmem:[%s1154_s3 + $0xb8] sm:$0xff] }
  0x32   :  { %606 = vmatprep.subr.mxu0 %v344_v21  ;;  %650 = vmatprep.subr.mxu1 %v376_v22  ;;  %v372_v38 = vld [vmem:[%s1154_s3 + $0x1b8] sm:$0xff]  ;;  %v339_v41 = vld [vmem:[%s1154_s3 + $0xb0] sm:$0xff]  ;;  %v338_v45 = vld [vmem:[%s1154_s3 + $0xa8] sm:$0xff] }
  0x33   :  { %607 = vmatpush3.msra.mxu0 %v328_v23  ;;  %651 = vmatpush3.msra.mxu1 %v360_v24  ;;  %v324_v39 = vld [vmem:[%s1154_s3 + $0x38] sm:$0xff]  ;;  %v371_v42 = vld [vmem:[%s1154_s3 + $0x1b0] sm:$0xff]  ;;  %v370_v46 = vld [vmem:[%s1154_s3 + $0x1a8] sm:$0xff] }
  0x34   :  { %608 = vmatprep.subr.mxu0 %v343_v25  ;;  %652 = vmatprep.subr.mxu1 %v375_v26  ;;  %v356_v40 = vld [vmem:[%s1154_s3 + $0x138] sm:$0xff]  ;;  %v323_v43 = vld [vmem:[%s1154_s3 + $0x30] sm:$0xff]  ;;  %v322_v47 = vld [vmem:[%s1154_s3 + $0x28] sm:$0xff] }
  0x35   :  { %609 = vmatpush3.msra.mxu0 %v327_v27  ;;  %653 = vmatpush3.msra.mxu1 %v359_v28  ;;  %v355_v44 = vld [vmem:[%s1154_s3 + $0x130] sm:$0xff]  ;;  %v354_v48 = vld [vmem:[%s1154_s3 + $0x128] sm:$0xff]  ;;  %v337_v49 = vld [vmem:[%s1154_s3 + $0xa0] sm:$0xff] }
  0x36   :  { %610 = vmatprep.subr.mxu0 %v342_v29  ;;  %654 = vmatprep.subr.mxu1 %v374_v30  ;;  %v369_v50 = vld [vmem:[%s1154_s3 + $0x1a0] sm:$0xff]  ;;  %v336_v53 = vld [vmem:[%s1154_s3 + $0x98] sm:$0xff]  ;;  %v335_v57 = vld [vmem:[%s1154_s3 + $0x90] sm:$0xff] }
  0x37   :  { %611 = vmatpush3.msra.mxu0 %v326_v31  ;;  %655 = vmatpush3.msra.mxu1 %v358_v32  ;;  %v321_v51 = vld [vmem:[%s1154_s3 + $0x20] sm:$0xff]  ;;  %v368_v54 = vld [vmem:[%s1154_s3 + $0x198] sm:$0xff]  ;;  %v367_v58 = vld [vmem:[%s1154_s3 + $0x190] sm:$0xff] }
  0x38   :  { %612 = vmatprep.subr.mxu0 %v341_v33  ;;  %656 = vmatprep.subr.mxu1 %v373_v34  ;;  %v353_v52 = vld [vmem:[%s1154_s3 + $0x120] sm:$0xff]  ;;  %v320_v55 = vld [vmem:[%s1154_s3 + $0x18] sm:$0xff]  ;;  %v319_v59 = vld [vmem:[%s1154_s3 + $0x10] sm:$0xff] }
  0x39   :  { %613 = vmatpush3.msra.mxu0 %v325_v35  ;;  %657 = vmatpush3.msra.mxu1 %v357_v36  ;;  %v352_v56 = vld [vmem:[%s1154_s3 + $0x118] sm:$0xff]  ;;  %v351_v60 = vld [vmem:[%s1154_s3 + $0x110] sm:$0xff]  ;;  %v334_v61 = vld [vmem:[%s1154_s3 + $0x88] sm:$0xff] }
  0x3a   :  { %614 = vmatprep.subr.mxu0 %v340_v37  ;;  %658 = vmatprep.subr.mxu1 %v372_v38  ;;  %v366_v62 = vld [vmem:[%s1154_s3 + $0x188] sm:$0xff]  ;;  %v333_v1 = vld [vmem:[%s1154_s3 + $0x80] sm:$0xff] }
  0x3b   :  { %615 = vmatpush3.msra.mxu0 %v324_v39  ;;  %659 = vmatpush3.msra.mxu1 %v356_v40  ;;  %v318_v63 = vld [vmem:[%s1154_s3 + $0x8] sm:$0xff]  ;;  %v365_v2 = vld [vmem:[%s1154_s3 + $0x180] sm:$0xff] }
  0x3c   :  { %616 = vmatprep.subr.mxu0 %v339_v41  ;;  %660 = vmatprep.subr.mxu1 %v371_v42  ;;  %v350_v0 = vld [vmem:[%s1154_s3 + $0x108] sm:$0xff]  ;;  %v317_v3 = vld [vmem:[%s1154_s3] sm:$0xff] }
  0x3d   :  { %617 = vmatpush3.msra.mxu0 %v323_v43  ;;  %661 = vmatpush3.msra.mxu1 %v355_v44  ;;  %v349_v4 = vld [vmem:[%s1154_s3 + $0x100] sm:$0xff] }
  0x3e   :  { %618 = vmatprep.subr.mxu0 %v338_v45  ;;  %662 = vmatprep.subr.mxu1 %v370_v46  ;;  %v97_v9 = vld [vmem:[%s1153_s2] sm:$0xf] }
  0x3f   :  { %619 = vmatpush3.msra.mxu0 %v322_v47  ;;  %663 = vmatpush3.msra.mxu1 %v354_v48  ;;  %v102_v12 = vrot.slane %v97_v9, %v101_v7  ;;  %v110_v13 = vrot.slane %v97_v9, %v109_v8  ;;  %v106_v14 = vrot.slane %v97_v9, %v105_v10  ;;  %v597_v6 = vld [vmem:[%s1155_s4] ss:$0 sm:$0xff]  ;;  %s713_s4 = smov [#allocation3]  }
  0x40   :  { %620 = vmatprep.subr.mxu0 %v337_v49  ;;  %664 = vmatprep.subr.mxu1 %v369_v50  ;;  %v114_v15 = vrot.slane %v97_v9, %v113_v11  ;;  %s586_s25 = sshll.u32 %s713_s4, 4  ;;  %s587_s25 = int_to_ptr.vmem [resolvable:$true] %s586_s25 }
  0x41   :  { %621 = vmatpush3.msra.mxu0 %v321_v51  ;;  %665 = vmatpush3.msra.mxu1 %v353_v52  ;;  %s690_s26 = scalar_lea.vmem %s587_s25, 512  ;;  %p695_p1 = scmp.lt.s32.totalorder %s587_s25, %s587_s25 }
  0x42   :  { %622 = vmatprep.subr.mxu0 %v336_v53  ;;  %666 = vmatprep.subr.mxu1 %v368_v54  ;;  %p691_p0 = scmp.ne.s32.totalorder %s587_s25, %s690_s26  ;;  %p696_p2 = scmp.lt.s32.totalorder %s690_s26, %s690_s26 }
  0x43   :  { %623 = vmatpush3.msra.mxu0 %v320_v55  ;;  %667 = vmatpush3.msra.mxu1 %v352_v56 }
  0x44   :  { %624 = vmatprep.subr.mxu0 %v335_v57  ;;  %668 = vmatprep.subr.mxu1 %v367_v58  ;;  %p697_p3 = por %p696_p2, %p695_p1 }
  0x45   :  { %625 = vmatpush3.msra.mxu0 %v319_v59  ;;  %669 = vmatpush3.msra.mxu1 %v351_v60 }
  0x46   :  { %626 = vmatprep.subr.mxu0 %v334_v61  ;;  %670 = vmatprep.subr.mxu1 %v366_v62  ;;  %p698_p4 = pnand %p697_p3, %p691_p0 }
  0x47   :  { %627 = vmatpush3.msra.mxu0 %v318_v63  ;;  %671 = vmatpush3.msra.mxu1 %v350_v0 }
  0x48   :  { %628 = vmatprep.subr.mxu0 %v333_v1  ;;  %672 = vmatprep.subr.mxu1 %v365_v2 }
  0x49   :  { %629 = vmatpush3.msra.mxu0 %v317_v3  ;;  %673 = vmatpush3.msra.mxu1 %v349_v4 }
  0xe3   :  { %v185_v16 = vpop.f32.mrf.mxu0  ;;  %v274_v17 = vpop.f32.mrf.mxu1 }
  0xe4   :  { %v186_v18 = vadd.f32 %v185_v16, %v102_v12  ;;  %v275_v19 = vadd.f32 %v274_v17, %v110_v13 }
  0xe5   :  { %v187_v20 = vpop.f32.mrf.mxu0  ;;  %v276_v21 = vpop.f32.mrf.mxu1 }
  0xe6   :  { %v188_v22 = vadd.f32 %v187_v20, %v106_v14  ;;  %v277_v23 = vadd.f32 %v276_v21, %v114_v15  ;;  %v297_v28 = vmax.f32 %v186_v18, 0.0  ;;  %v299_v29 = vmax.f32 %v275_v19, 0.0 }
  0xe7   :  { %v191_v24 = vpop.f32.mrf.mxu0  ;;  %v280_v25 = vpop.f32.mrf.mxu1 }
  0xe8   :  { %v298_v26 = vmax.f32 %v188_v22, 0.0  ;;  %v300_v27 = vmax.f32 %v277_v23, 0.0  ;;  %v192_v30 = vadd.f32 %v191_v24, %v102_v12  ;;  %v281_v31 = vadd.f32 %v280_v25, %v110_v13 }
  0xe9   :  { %v193_v32 = vpop.f32.mrf.mxu0  ;;  %v282_v33 = vpop.f32.mrf.mxu1 }
  0xea   :  { %v194_v34 = vadd.f32 %v193_v32, %v106_v14  ;;  %v283_v35 = vadd.f32 %v282_v33, %v114_v15  ;;  %445 = vmatprep.mubr.f32.mxu0 %v298_v26  ;;  %530 = vmatprep.mubr.f32.mxu1 %v300_v27  ;;  %v301_v40 = vmax.f32 %v192_v30, 0.0  ;;  %v303_v41 = vmax.f32 %v281_v31, 0.0 }
  0xeb   :  { %v197_v36 = vpop.f32.mrf.mxu0  ;;  %v286_v37 = vpop.f32.mrf.mxu1  ;;  %446 = vmatmul.mubr.f32.vlgmr.msra.gmra.mxu0 %v297_v28  ;;  %531 = vmatmul.mubr.f32.vlgmr.msra.gmra.mxu1 %v299_v29 }
  0xec   :  { %v302_v38 = vmax.f32 %v194_v34, 0.0  ;;  %v304_v39 = vmax.f32 %v283_v35, 0.0  ;;  %v198_v42 = vadd.f32 %v197_v36, %v102_v12  ;;  %v287_v43 = vadd.f32 %v286_v37, %v110_v13 }
  0xed   :  { %v199_v44 = vpop.f32.mrf.mxu0  ;;  %v288_v45 = vpop.f32.mrf.mxu1 }
  0xee   :  { %v200_v46 = vadd.f32 %v199_v44, %v106_v14  ;;  %v289_v47 = vadd.f32 %v288_v45, %v114_v15  ;;  %450 = vmatprep.mubr.f32.mxu0 %v302_v38  ;;  %535 = vmatprep.mubr.f32.mxu1 %v304_v39  ;;  %v305_v52 = vmax.f32 %v198_v42, 0.0  ;;  %v307_v53 = vmax.f32 %v287_v43, 0.0 }
  0xef   :  { %v203_v48 = vpop.f32.mrf.mxu0  ;;  %v292_v49 = vpop.f32.mrf.mxu1  ;;  %451 = vmatmul.mubr.f32.gmra.mxu0 %v301_v40  ;;  %536 = vmatmul.mubr.f32.gmra.mxu1 %v303_v41 }
  0xf0   :  { %v306_v50 = vmax.f32 %v200_v46, 0.0  ;;  %v308_v51 = vmax.f32 %v289_v47, 0.0  ;;  %v204_v54 = vadd.f32 %v203_v48, %v102_v12  ;;  %v293_v55 = vadd.f32 %v292_v49, %v110_v13 }
  0xf1   :  { %v205_v56 = vpop.f32.mrf.mxu0  ;;  %v294_v57 = vpop.f32.mrf.mxu1 }
  0xf2   :  { %v206_v58 = vadd.f32 %v205_v56, %v106_v14  ;;  %v295_v59 = vadd.f32 %v294_v57, %v114_v15  ;;  %455 = vmatprep.mubr.f32.mxu0 %v306_v50  ;;  %540 = vmatprep.mubr.f32.mxu1 %v308_v51  ;;  %v309_v62 = vmax.f32 %v204_v54, 0.0  ;;  %v311_v63 = vmax.f32 %v293_v55, 0.0 }
  0xf3   :  { %456 = vmatmul.mubr.f32.gmra.mxu0 %v305_v52  ;;  %541 = vmatmul.mubr.f32.gmra.mxu1 %v307_v53 }
  0xf4   :  { %v310_v60 = vmax.f32 %v206_v58, 0.0  ;;  %v312_v61 = vmax.f32 %v295_v59, 0.0 }
  0xf6   :  { %460 = vmatprep.mubr.f32.mxu0 %v310_v60  ;;  %545 = vmatprep.mubr.f32.mxu1 %v312_v61 }
  0xf7   :  { %461 = vmatmul.mubr.f32.gmra.mxu0 %v309_v62  ;;  %546 = vmatmul.mubr.f32.gmra.mxu1 %v311_v63 }
 0x1ab   :  { %v630_v0 = vpop.f32.mrf.mxu0  ;;  %v674_v1 = vpop.f32.mrf.mxu1 }
 0x1ad   :  { %v631_v2 = vpop.f32.mrf.mxu0  ;;  %v675_v3 = vpop.f32.mrf.mxu1 }
 0x1ae   :  { %v632_v4 = vadd.f32 %v631_v2, %v630_v0  ;;  %v676_v5 = vadd.f32 %v675_v3, %v674_v1 }
 0x1af   :  { %v633_v7 = vpop.f32.mrf.mxu0  ;;  %v677_v8 = vpop.f32.mrf.mxu1 }
 0x1b0   :  { %v533_v9 = vadd.f32 %v676_v5, %v632_v4 }
 0x1b1   :  { %v634_v10 = vpop.f32.mrf.mxu0  ;;  %v678_v11 = vpop.f32.mrf.mxu1 }
 0x1b2   :  { %v573_v12 = vadd.f32 %v597_v6, %v533_v9  ;;  %v635_v13 = vadd.f32 %v634_v10, %v633_v7  ;;  %v679_v14 = vadd.f32 %v678_v11, %v677_v8 }
 0x1b3   :  { %v636_v15 = vpop.f32.mrf.mxu0  ;;  %v680_v16 = vpop.f32.mrf.mxu1 }
 0x1b4   :  { %577 = vst [vmem:[#allocation3] sm:$0xff] %v573_v12  ;;  %v538_v17 = vadd.f32 %v679_v14, %v635_v13 }
 0x1b5   :  { %v637_v18 = vpop.f32.mrf.mxu0  ;;  %v681_v19 = vpop.f32.mrf.mxu1 }
 0x1b6   :  { %v574_v20 = vadd.f32 %v597_v6, %v538_v17  ;;  %v638_v21 = vadd.f32 %v637_v18, %v636_v15  ;;  %v682_v22 = vadd.f32 %v681_v19, %v680_v16 }
 0x1b7   :  { %v639_v23 = vpop.f32.mrf.mxu0  ;;  %v683_v24 = vpop.f32.mrf.mxu1 }
 0x1b8   :  { %578 = vst [vmem:[#allocation3 + $0x8] sm:$0xff] %v574_v20  ;;  %v543_v25 = vadd.f32 %v682_v22, %v638_v21 }
 0x1b9   :  { %v640_v26 = vpop.f32.mrf.mxu0  ;;  %v684_v27 = vpop.f32.mrf.mxu1 }
 0x1ba   :  { %v575_v28 = vadd.f32 %v597_v6, %v543_v25  ;;  %v641_v29 = vadd.f32 %v640_v26, %v639_v23  ;;  %v685_v30 = vadd.f32 %v684_v27, %v683_v24 }
 0x1bc   :  { %579 = vst [vmem:[#allocation3 + $0x10] sm:$0xff] %v575_v28  ;;  %v548_v31 = vadd.f32 %v685_v30, %v641_v29 }
 0x1be   :  { %v576_v32 = vadd.f32 %v597_v6, %v548_v31 }
 0x1c0   :  { %580 = vst [vmem:[#allocation3 + $0x18] sm:$0xff] %v576_v32 }
 0x1c1   :  { %701 = shalt.err (!%p698_p4)
}
 0x1c2   :  { %s714_s1 = smov 128   ;;  %s715_s27 = smov 8  }
 0x1c3   :  { %592 = dma.vmem_to_hbm [thread:$0]  %s587_s25, 512, %s1156_s5, [#allocation4], %s714_s1, %s714_s1, %s715_s27  }
 0x1c4   :  { %710 = dma.done.wait [#allocation4], 512  }
 0x1c5   :  { %711 = vsyncadd [#allocation4], 4294966784 }
 0x1c6   :  { %596 = vsyncpa [#allocation4], 1 }

// kernel: _lambda_.10
= control target key start
LH: loop header
LB: loop body
LE: loop exit
PB: predicated region body
PF: predicated region fallthrough
CT: control target
= control target key end

     0   :  { %s2442_s12 = smov 0   ;;  %s2789_s0 = inlined_call_operand.vmem [shape: f32[2,16,384], index: 0, kind: input, shape index: {}]   ;;  %s2790_s1 = inlined_call_operand.vmem [shape: f32[128,128], index: 1, kind: input, shape index: {}]   ;;  %s2791_s2 = inlined_call_operand.vmem [shape: f32[1,128], index: 2, kind: input, shape index: {}]   ;;  %s2792_s3 = inlined_call_operand.vmem [shape: f32[2,16,128], index: 3, kind: output, shape index: {}]  }
   0x1 LB: > { %s2003_s13 = sadd.s32 4294967295, %s2413_s12   ;;  %p2007_p0 = scmp.ge.s32.totalorder %s2413_s12, 1  ;;  %s2413_s12 = sphi %s2442_s12, %s13_s12  }
   0x2   : > { %p137_p1 = scmp.lt.s32.totalorder %s2413_s12, 3 }
   0x4   : > { %p138_p2 = pnand %p2007_p0, %p137_p1 }
   0x5   : > { %p161_p3 = scmp.lt.s32.totalorder (!%p138_p2), %s2003_s13, 1  ;;  %s2415_s18 = smov (!%p138_p2), 112  }
   0x6   : > { %141 = sbr.rel (%p138_p2) target bundleno = 4171 (0x104b), region = 32  ;;  %s2416_s19 = smov (!%p138_p2), 96  }
   0x7   : > { %s2417_s20 = smov (!%p138_p2), 80   ;;  %s2418_s21 = smov (!%p138_p2), 64  }
   0x8   : > { %s2419_s22 = smov (!%p138_p2), 48   ;;  %s2420_s23 = smov (!%p138_p2), 32  }
   0x9   : > { %s2421_s24 = smov (!%p138_p2), 16  }
   0xb   : > { %s2794_s13 = smov (!%p161_p3, %s2003_s13), 1  ;;  %vm179_vm0 = vcmask 130048   ;;  %vm1830_vm1 = vcmask 261120   ;;  %vm1833_vm2 = vcmask 392192   ;;  %vm1836_vm3 = vcmask 523264  }
   0xc   : > { %s2292_s14 = smul.u32 48, %s2794_s13  ;;  %vm1839_vm4 = vcmask 654336   ;;  %vm1842_vm5 = vcmask 785408   ;;  %vm1845_vm6 = vcmask 916480  }
   0xe   : > { %s2456_s17 = scalar_lea.vmem %s2789_s0, %s2292_s14 }
   0xf   : > { %v2459_v0 = vld [vmem:[%s2456_s17 + $0x20] sm:$0xff]  ;;  %v2462_v1 = vld [vmem:[%s2456_s17 + $0x8] sm:$0xff]  ;;  %v174_v4 = vld [vmem:[%s2456_s17 + $0x18] sm:$0xff] }
  0x10   : > { %v171_v2 = vld [vmem:[%s2456_s17] sm:$0xff]  ;;  %2145 = vmatprep.subr.msk.mxu1 %vm179_vm0, %v2459_v0  ;;  %v2476_v5 = vmul.f32 0.25, %v174_v4  ;;  %374 = vrot.lane.b32.xlu1 %v2462_v1, %s2415_s18  ;;  %v2497_v20 = vld [vmem:[%s2456_s17 + $0x28] sm:$0xff]  ;;  %v2500_v21 = vld [vmem:[%s2456_s17 + $0x10] sm:$0xff] }
  0x11   : > { %v2467_v3 = vmul.f32 0.25, %v171_v2  ;;  %2146 = vmatpush3.xpose.msk.msra.mxu1 %vm179_vm0, %v2459_v0 }
  0x12   : > { %2147 = vmatprep.subr.msk.mxu1 %vm179_vm0, %v2462_v1 }
  0x13   : > { %2149 = vmatprep.mubr.msk.f32.mxu1 %vm179_vm0, %v2467_v3 }
  0x14   : > { %370 = vrot.lane.b32.xlu1 %v2467_v3, %s2415_s18 }
  0x15   : > { %2148 = vmatpush3.xpose.msk.msra.mxu1 %vm179_vm0, %v2462_v1 }
  0x16   : > { %2152 = vmatprep.subr.mxu1 %v2497_v20 }
  0x18   : > { %2150 = vmatmul.mubr.msk.f32.vlgmr.msra.gmra.mxu1 %vm179_vm0, %v2476_v5 }
  0x19   : > { %2153 = vmatpush3.msra.mxu1 %v2497_v20 }
  0x1a   : > { %2154 = vmatprep.subr.mxu1 %v2500_v21 }
  0x1b   : > { %2155 = vmatpush3.msra.mxu1 %v2500_v21 }
  0x82   : > { %v375_v23 = vpop.permute.xlu1 %374 }
  0x86   : > { %v371_v24 = vpop.permute.xlu1 %370 }
  0xd8   : > { %v2151_v6 = vpop.f32.mrf.mxu1 }
  0xd9   : > { %v270_v9 = vsel %vm179_vm0, %v2151_v6, -inf }
  0xda   : > { %v258_v7 = vpop.f32.mrf.mxu1 }
  0xdb   : > { %v267_v8 = vsel %vm179_vm0, %v258_v7, -inf }
  0xdc   : > { %268 = vmax.xlane.f32.xlu0 %v267_v8 }
  0xe0   : > { %271 = vmax.xlane.f32.xlu0 %v270_v9 }
  0xf6   : > { %376 = vrot.lane.b32.xlu0 %v2459_v0, %s2415_s18 }
  0xfa   : > { %372 = vrot.lane.b32.xlu0 %v2476_v5, %s2415_s18 }
  0xfe   : > { %572 = vrot.lane.b32.xlu0 %v2467_v3, %s2416_s19 }
 0x165   : > { %v269_v10 = vpop.xlane.xlu0 %268 }
 0x166   : > { %v273_v11 = vsub.f32 %v258_v7, %v269_v10 }
 0x168   : > { %v275_v14 = vmul.f32 1.442695, %v273_v11 }
 0x169   : > { %v272_v12 = vpop.xlane.xlu0 %271 }
 0x16a   : > { %v274_v13 = vsub.f32 %v2151_v6, %v272_v12 }
 0x16c   : > { %v277_v15 = vmul.f32 1.442695, %v274_v13 }
 0x16d   : > { %v377_v22 = vpop.permute.xlu0 %376 }
 0x16e   : > { %2343 = vpow2.f32 %v277_v15  ;;  %2159 = vmatprep.subr.msk.mxu1 %vm179_vm0, %v377_v22 }
 0x16f   : > { %2345 = vpow2.f32 %v275_v14 }
 0x171   : > { %v373_v32 = vpop.permute.xlu0 %372 }
 0x175   : > { %v573_v33 = vpop.permute.xlu0 %572 }
 0x17b   : > { %v2344_v16 = vpop.eup %2343 }
 0x17c   : > { %v282_v17 = vsel %vm179_vm0, %v2344_v16, 0.0  ;;  %v2346_v18 = vpop.eup %2345 }
 0x17d   : > { %283 = vadd.xlane.f32.xlu1 %v282_v17  ;;  %v279_v19 = vsel %vm179_vm0, %v2346_v18, 0.0 }
 0x181   : > { %280 = vadd.xlane.f32.xlu1 %v279_v19 }
 0x192   : > { %578 = vrot.lane.b32.xlu1 %v2459_v0, %s2416_s19 }
 0x196   : > { %576 = vrot.lane.b32.xlu1 %v2462_v1, %s2416_s19 }
 0x19a   : > { %574 = vrot.lane.b32.xlu1 %v2476_v5, %s2416_s19 }
 0x206   : > { %v284_v25 = vpop.xlane.xlu1 %283 }
 0x207   : > { %2347 = vrcp.f32 %v284_v25 }
 0x20a   : > { %v281_v26 = vpop.xlane.xlu1 %280 }
 0x20b   : > { %2349 = vrcp.f32 %v281_v26 }
 0x20e   : > { %v579_v31 = vpop.permute.xlu1 %578 }
 0x212   : > { %v577_v34 = vpop.permute.xlu1 %576 }
 0x214   : > { %v2348_v27 = vpop.eup %2347 }
 0x215   : > { %v288_v30 = vmul.f32 %v2348_v27, %v2344_v16 }
 0x216   : > { %v575_v35 = vpop.permute.xlu1 %574 }
 0x218   : > { %v2350_v28 = vpop.eup %2349 }
 0x219   : > { %v287_v29 = vmul.f32 %v2350_v28, %v2346_v18 }
 0x21b   : > { %2156 = vmatprep.mubr.msk.f32.mxu1 %vm179_vm0, %v287_v29 }
 0x21c   : > { %2157 = vmatmul.mubr.msk.f32.vlgmr.msra.gmra.mxu1 %vm179_vm0, %v288_v30 }
 0x21d   : > { %2160 = vmatpush3.xpose.msk.msra.mxu1 %vm179_vm0, %v377_v22  ;;  %2163 = vmatprep.mubr.msk.f32.mxu1 %vm179_vm0, %v371_v24 }
 0x21e   : > { %2161 = vmatprep.subr.msk.mxu1 %vm179_vm0, %v375_v23 }
 0x221   : > { %2162 = vmatpush3.xpose.msk.msra.mxu1 %vm179_vm0, %v375_v23 }
 0x222   : > { %2173 = vmatprep.subr.msk.mxu1 %vm179_vm0, %v579_v31 }
 0x224   : > { %2164 = vmatmul.mubr.msk.f32.vlgmr.msra.gmra.mxu1 %vm179_vm0, %v373_v32 }
 0x225   : > { %2174 = vmatpush3.xpose.msk.msra.mxu1 %vm179_vm0, %v579_v31  ;;  %2177 = vmatprep.mubr.msk.f32.mxu1 %vm179_vm0, %v573_v33 }
 0x226   : > { %2175 = vmatprep.subr.msk.mxu1 %vm179_vm0, %v577_v34 }
 0x229   : > { %2176 = vmatpush3.xpose.msk.msra.mxu1 %vm179_vm0, %v577_v34 }
 0x22c   : > { %2178 = vmatmul.mubr.msk.f32.vlgmr.msra.gmra.mxu1 %vm179_vm0, %v575_v35 }
 0x2dc   : > { %v2526_v36 = vpop.f32.mrf.mxu1 }
 0x2de   : > { %v2528_v37 = vpop.f32.mrf.mxu1 }
 0x2e4   : > { %v2165_v38 = vpop.f32.mrf.mxu1 }
 0x2e5   : > { %v464_v44 = vsel %vm179_vm0, %v2165_v38, -inf }
 0x2e6   : > { %v2530_v39 = vpop.f32.mrf.mxu1 }
 0x2e7   : > { %v461_v62 = vsel %vm179_vm0, %v2530_v39, -inf }
 0x2ec   : > { %v2179_v40 = vpop.f32.mrf.mxu1 }
 0x2ed   : > { %v666_v41 = vsel %vm179_vm0, %v2179_v40, -inf }
 0x2ee   : > { %667 = vmax.xlane.f32.xlu1 %v666_v41  ;;  %v654_v42 = vpop.f32.mrf.mxu1 }
 0x2ef   : > { %v663_v43 = vsel %vm179_vm0, %v654_v42, -inf }
 0x2f0   : > { %664 = vmax.xlane.f32.xlu0 %v663_v43 }
 0x2ff   : > { %685 = vrot.lane.b32.xlu1 %v2500_v21, %s2416_s19 }
 0x303   : > { %778 = vrot.lane.b32.xlu1 %v2459_v0, %s2417_s20 }
 0x307   : > { %776 = vrot.lane.b32.xlu1 %v2462_v1, %s2417_s20 }
 0x30b   : > { %774 = vrot.lane.b32.xlu1 %v2476_v5, %s2417_s20 }
 0x32f   : > { %465 = vmax.xlane.f32.xlu1 %v464_v44 }
 0x377   : > { %v668_v45 = vpop.xlane.xlu1 %667 }
 0x378   : > { %v670_v46 = vsub.f32 %v2179_v40, %v668_v45 }
 0x379   : > { %v665_v47 = vpop.xlane.xlu0 %664 }
 0x37a   : > { %v673_v48 = vmul.f32 1.442695, %v670_v46  ;;  %v669_v49 = vsub.f32 %v654_v42, %v665_v47 }
 0x37b   : > { %v686_v55 = vpop.permute.xlu1 %685 }
 0x37c   : > { %2351 = vpow2.f32 %v673_v48  ;;  %v671_v50 = vmul.f32 1.442695, %v669_v49 }
 0x37e   : > { %2353 = vpow2.f32 %v671_v50 }
 0x37f   : > { %v779_v56 = vpop.permute.xlu1 %778 }
 0x383   : > { %v777_v57 = vpop.permute.xlu1 %776 }
 0x387   : > { %v775_v58 = vpop.permute.xlu1 %774 }
 0x389   : > { %v2352_v51 = vpop.eup %2351 }
 0x38a   : > { %v678_v52 = vsel %vm179_vm0, %v2352_v51, 0.0 }
 0x38b   : > { %v2354_v53 = vpop.eup %2353  ;;  %679 = vadd.xlane.f32.xlu0 %v678_v52 }
 0x38c   : > { %v675_v54 = vsel %vm179_vm0, %v2354_v53, 0.0 }
 0x38f   : > { %676 = vadd.xlane.f32.xlu0 %v675_v54 }
 0x3a5   : > { %687 = vrot.lane.b32.xlu0 %v2497_v20, %s2416_s19 }
 0x3a9   : > { %772 = vrot.lane.b32.xlu0 %v2467_v3, %s2417_s20 }
 0x3b8   : > { %v466_v59 = vpop.xlane.xlu1 %465 }
 0x3b9   : > { %v468_v60 = vsub.f32 %v2165_v38, %v466_v59 }
 0x3bb   : > { %v471_v61 = vmul.f32 1.442695, %v468_v60 }
 0x3bd   : > { %2355 = vpow2.f32 %v471_v61 }
 0x3c8   : > { %462 = vmax.xlane.f32.xlu0 %v461_v62 }
 0x3ca   : > { %v2551_v63 = vpop.eup %2355 }
 0x3cb   : > { %v476_v2 = vsel %vm179_vm0, %v2551_v63, 0.0 }
 0x3cc   : > { %477 = vadd.xlane.f32.xlu1 %v476_v2 }
 0x3dd   : > { %485 = vrot.lane.b32.xlu1 %v2500_v21, %s2415_s18 }
 0x3e1   : > { %887 = vrot.lane.b32.xlu1 %v2497_v20, %s2417_s20 }
 0x3e5   : > { %885 = vrot.lane.b32.xlu1 %v2500_v21, %s2417_s20 }
 0x414   : > { %v680_v4 = vpop.xlane.xlu0 %679 }
 0x415   : > { %2357 = vrcp.f32 %v680_v4 }
 0x418   : > { %v677_v6 = vpop.xlane.xlu0 %676 }
 0x419   : > { %2359 = vrcp.f32 %v677_v6 }
 0x41c   : > { %v688_v7 = vpop.permute.xlu0 %687 }
 0x41d   : > { %2180 = vmatprep.subr.mxu1 %v688_v7 }
 0x41e   : > { %2181 = vmatpush3.msra.mxu1 %v688_v7 }
 0x41f   : > { %2182 = vmatprep.subr.mxu1 %v686_v55 }
 0x420   : > { %2183 = vmatpush3.msra.mxu1 %v686_v55  ;;  %v773_v12 = vpop.permute.xlu0 %772 }
 0x421   : > { %2187 = vmatprep.subr.msk.mxu1 %vm179_vm0, %v779_v56 }
 0x422   : > { %v2358_v8 = vpop.eup %2357 }
 0x423   : > { %v684_v11 = vmul.f32 %v2358_v8, %v2352_v51 }
 0x426   : > { %v2360_v9 = vpop.eup %2359 }
 0x427   : > { %v683_v10 = vmul.f32 %v2360_v9, %v2354_v53 }
 0x429   : > { %2184 = vmatprep.mubr.msk.f32.mxu1 %vm179_vm0, %v683_v10 }
 0x42a   : > { %2185 = vmatmul.mubr.msk.f32.vlgmr.msra.gmra.mxu1 %vm179_vm0, %v684_v11 }
 0x42b   : > { %2188 = vmatpush3.xpose.msk.msra.mxu1 %vm179_vm0, %v779_v56  ;;  %2191 = vmatprep.mubr.msk.f32.mxu1 %vm179_vm0, %v773_v12 }
 0x42c   : > { %2189 = vmatprep.subr.msk.mxu1 %vm179_vm0, %v777_v57 }
 0x42f   : > { %2190 = vmatpush3.xpose.msk.msra.mxu1 %vm179_vm0, %v777_v57 }
 0x432   : > { %2192 = vmatmul.mubr.msk.f32.vlgmr.msra.gmra.mxu1 %vm179_vm0, %v775_v58 }
 0x451   : > { %v463_v13 = vpop.xlane.xlu0 %462 }
 0x452   : > { %v467_v14 = vsub.f32 %v2530_v39, %v463_v13 }
 0x454   : > { %v469_v15 = vmul.f32 1.442695, %v467_v14 }
 0x455   : > { %v478_v31 = vpop.xlane.xlu1 %477 }
 0x456   : > { %2361 = vpow2.f32 %v469_v15 }
 0x459   : > { %v486_v35 = vpop.permute.xlu1 %485 }
 0x45d   : > { %v888_v39 = vpop.permute.xlu1 %887 }
 0x461   : > { %v886_v48 = vpop.permute.xlu1 %885 }
 0x463   : > { %v2362_v25 = vpop.eup %2361 }
 0x464   : > { %v473_v26 = vsel %vm179_vm0, %v2362_v25, 0.0 }
 0x4ea   : > { %v2570_v16 = vpop.f32.mrf.mxu1 }
 0x4ec   : > { %v2572_v17 = vpop.f32.mrf.mxu1 }
 0x4ed   : > { %v2313_v18 = vpack.i.bf16 %v2570_v16, %v2572_v17 }
 0x4f2   : > { %v2193_v19 = vpop.f32.mrf.mxu1 }
 0x4f3   : > { %v866_v24 = vsel %vm179_vm0, %v2193_v19, -inf }
 0x4f4   : > { %v854_v22 = vpop.f32.mrf.mxu1 }
 0x4f5   : > { %v863_v23 = vsel %vm179_vm0, %v854_v22, -inf }
 0x4f6   : > { %864 = vmax.xlane.f32.xlu0 %v863_v23 }
 0x4fa   : > { %867 = vmax.xlane.f32.xlu0 %v866_v24 }
 0x4fe   : > { %474 = vadd.xlane.f32.xlu0 %v473_v26 }
 0x514   : > { %487 = vrot.lane.b32.xlu0 %v2497_v20, %s2415_s18 }
 0x57f   : > { %v865_v27 = vpop.xlane.xlu0 %864 }
 0x580   : > { %v869_v28 = vsub.f32 %v854_v22, %v865_v27 }
 0x582   : > { %v871_v29 = vmul.f32 1.442695, %v869_v28 }
 0x583   : > { %v868_v30 = vpop.xlane.xlu0 %867 }
 0x584   : > { %2363 = vpow2.f32 %v871_v29  ;;  %v870_v32 = vsub.f32 %v2193_v19, %v868_v30 }
 0x585   : > { %2365 = vrcp.f32 %v478_v31 }
 0x586   : > { %v873_v33 = vmul.f32 1.442695, %v870_v32 }
 0x587   : > { %v475_v34 = vpop.xlane.xlu0 %474 }
 0x588   : > { %2367 = vpow2.f32 %v873_v33 }
 0x589   : > { %2369 = vrcp.f32 %v475_v34 }
 0x58b   : > { %v488_v38 = vpop.permute.xlu0 %487 }
 0x58c   : > { %2166 = vmatprep.subr.mxu0 %v488_v38 }
 0x58d   : > { %2167 = vmatpush3.msra.mxu0 %v488_v38 }
 0x58e   : > { %2168 = vmatprep.subr.mxu0 %v486_v35 }
 0x58f   : > { %2169 = vmatpush3.msra.mxu0 %v486_v35 }
 0x590   : > { %2194 = vmatprep.subr.mxu0 %v888_v39 }
 0x591   : > { %v2364_v40 = vpop.eup %2363 }
 0x592   : > { %v875_v41 = vsel %vm179_vm0, %v2364_v40, 0.0  ;;  %v2366_v42 = vpop.eup %2365 }
 0x593   : > { %876 = vadd.xlane.f32.xlu0 %v875_v41  ;;  %v482_v47 = vmul.f32 %v2366_v42, %v2551_v63 }
 0x595   : > { %v2368_v43 = vpop.eup %2367 }
 0x596   : > { %v2370_v44 = vpop.eup %2369  ;;  %v878_v45 = vsel %vm179_vm0, %v2368_v43, 0.0 }
 0x597   : > { %879 = vadd.xlane.f32.xlu1 %v878_v45  ;;  %v481_v46 = vmul.f32 %v2370_v44, %v2362_v25 }
 0x599   : > { %2170 = vmatprep.mubr.msk.f32.mxu0 %vm179_vm0, %v481_v46 }
 0x59a   : > { %2171 = vmatmul.mubr.msk.f32.vlgmr.msra.gmra.mxu0 %vm179_vm0, %v482_v47 }
 0x59b   : > { %2195 = vmatpush3.msra.mxu0 %v888_v39 }
 0x59c   : > { %2196 = vmatprep.subr.mxu0 %v886_v48 }
 0x59d   : > { %2197 = vmatpush3.msra.mxu0 %v886_v48 }
 0x5a8   : > { %976 = vrot.lane.b32.xlu1 %v2462_v1, %s2418_s21 }
 0x5a9   : > { %978 = vrot.lane.b32.xlu0 %v2459_v0, %s2418_s21 }
 0x5ac   : > { %974 = vrot.lane.b32.xlu1 %v2476_v5, %s2418_s21 }
 0x5ad   : > { %972 = vrot.lane.b32.xlu0 %v2467_v3, %s2418_s21 }
 0x61c   : > { %v877_v49 = vpop.xlane.xlu0 %876 }
 0x61d   : > { %2371 = vrcp.f32 %v877_v49 }
 0x620   : > { %v880_v50 = vpop.xlane.xlu1 %879  ;;  %v979_v51 = vpop.permute.xlu0 %978 }
 0x621   : > { %2373 = vrcp.f32 %v880_v50  ;;  %2201 = vmatprep.subr.msk.mxu0 %vm179_vm0, %v979_v51 }
 0x624   : > { %v973_v56 = vpop.permute.xlu0 %972  ;;  %v977_v57 = vpop.permute.xlu1 %976 }
 0x628   : > { %v975_v58 = vpop.permute.xlu1 %974 }
 0x62a   : > { %v2372_v52 = vpop.eup %2371 }
 0x62b   : > { %v883_v53 = vmul.f32 %v2372_v52, %v2364_v40 }
 0x62d   : > { %2198 = vmatprep.mubr.msk.f32.mxu0 %vm179_vm0, %v883_v53 }
 0x62e   : > { %v2374_v54 = vpop.eup %2373 }
 0x62f   : > { %v884_v55 = vmul.f32 %v2374_v54, %v2368_v43 }
 0x631   : > { %2199 = vmatmul.mubr.msk.f32.vlgmr.msra.gmra.mxu0 %vm179_vm0, %v884_v55 }
 0x632   : > { %2202 = vmatpush3.xpose.msk.msra.mxu0 %vm179_vm0, %v979_v51  ;;  %2205 = vmatprep.mubr.msk.f32.mxu0 %vm179_vm0, %v973_v56 }
 0x633   : > { %2203 = vmatprep.subr.msk.mxu0 %vm179_vm0, %v977_v57 }
 0x636   : > { %2204 = vmatpush3.xpose.msk.msra.mxu0 %vm179_vm0, %v977_v57 }
 0x639   : > { %2206 = vmatmul.mubr.msk.f32.vlgmr.msra.gmra.mxu0 %vm179_vm0, %v975_v58 }
 0x65a   : > { %v2602_v59 = vpop.f32.mrf.mxu0 }
 0x65c   : > { %v2604_v60 = vpop.f32.mrf.mxu0 }
 0x6f1   : > { %v2606_v61 = vpop.f32.mrf.mxu0 }
 0x6f3   : > { %v2608_v62 = vpop.f32.mrf.mxu0 }
 0x6f4   : > { %v2318_v63 = vpack.i.bf16 %v2606_v61, %v2608_v62  ;;  %v1863_v62 = vld [vmem:[%s2790_s1 + $0x78] sm:$0xff] }
 0x6f9   : > { %v2207_v2 = vpop.f32.mrf.mxu0 }
 0x6fa   : > { %v1066_v4 = vsel %vm179_vm0, %v2207_v2, -inf }
 0x6fb   : > { %1067 = vmax.xlane.f32.xlu1 %v1066_v4  ;;  %v1054_v6 = vpop.f32.mrf.mxu0 }
 0x6fc   : > { %v1063_v7 = vsel %vm179_vm0, %v1054_v6, -inf }
 0x6fd   : > { %1064 = vmax.xlane.f32.xlu0 %v1063_v7 }
 0x70c   : > { %1085 = vrot.lane.b32.xlu1 %v2500_v21, %s2418_s21 }
 0x710   : > { %1178 = vrot.lane.b32.xlu1 %v2459_v0, %s2419_s22 }
 0x714   : > { %1176 = vrot.lane.b32.xlu1 %v2462_v1, %s2419_s22 }
 0x718   : > { %1174 = vrot.lane.b32.xlu1 %v2476_v5, %s2419_s22 }
 0x784   : > { %v1068_v8 = vpop.xlane.xlu1 %1067 }
 0x785   : > { %v1070_v9 = vsub.f32 %v2207_v2, %v1068_v8 }
 0x786   : > { %v1065_v10 = vpop.xlane.xlu0 %1064 }
 0x787   : > { %v1073_v11 = vmul.f32 1.442695, %v1070_v9  ;;  %v1069_v12 = vsub.f32 %v1054_v6, %v1065_v10 }
 0x788   : > { %v1086_v25 = vpop.permute.xlu1 %1085 }
 0x789   : > { %2375 = vpow2.f32 %v1073_v11  ;;  %v1071_v13 = vmul.f32 1.442695, %v1069_v12 }
 0x78b   : > { %2377 = vpow2.f32 %v1071_v13 }
 0x78c   : > { %v1179_v27 = vpop.permute.xlu1 %1178 }
 0x790   : > { %v1177_v33 = vpop.permute.xlu1 %1176 }
 0x794   : > { %v1175_v34 = vpop.permute.xlu1 %1174 }
 0x796   : > { %v2376_v14 = vpop.eup %2375 }
 0x797   : > { %v1078_v15 = vsel %vm179_vm0, %v2376_v14, 0.0 }
 0x798   : > { %v2378_v19 = vpop.eup %2377  ;;  %1079 = vadd.xlane.f32.xlu0 %v1078_v15 }
 0x799   : > { %v1075_v22 = vsel %vm179_vm0, %v2378_v19, 0.0 }
 0x79c   : > { %1076 = vadd.xlane.f32.xlu0 %v1075_v22 }
 0x7b2   : > { %1087 = vrot.lane.b32.xlu0 %v2497_v20, %s2418_s21 }
 0x7b6   : > { %1172 = vrot.lane.b32.xlu0 %v2467_v3, %s2419_s22 }
 0x821   : > { %v1080_v23 = vpop.xlane.xlu0 %1079 }
 0x822   : > { %2379 = vrcp.f32 %v1080_v23 }
 0x825   : > { %v1077_v24 = vpop.xlane.xlu0 %1076 }
 0x826   : > { %2381 = vrcp.f32 %v1077_v24 }
 0x829   : > { %v1088_v26 = vpop.permute.xlu0 %1087 }
 0x82a   : > { %2208 = vmatprep.subr.mxu1 %v1088_v26 }
 0x82b   : > { %2209 = vmatpush3.msra.mxu1 %v1088_v26 }
 0x82c   : > { %2210 = vmatprep.subr.mxu1 %v1086_v25 }
 0x82d   : > { %2211 = vmatpush3.msra.mxu1 %v1086_v25  ;;  %v1173_v32 = vpop.permute.xlu0 %1172 }
 0x82e   : > { %2215 = vmatprep.subr.msk.mxu1 %vm179_vm0, %v1179_v27 }
 0x82f   : > { %v2380_v28 = vpop.eup %2379 }
 0x830   : > { %v1084_v31 = vmul.f32 %v2380_v28, %v2376_v14 }
 0x833   : > { %v2382_v29 = vpop.eup %2381 }
 0x834   : > { %v1083_v30 = vmul.f32 %v2382_v29, %v2378_v19 }
 0x836   : > { %2212 = vmatprep.mubr.msk.f32.mxu1 %vm179_vm0, %v1083_v30 }
 0x837   : > { %2213 = vmatmul.mubr.msk.f32.vlgmr.msra.gmra.mxu1 %vm179_vm0, %v1084_v31 }
 0x838   : > { %2216 = vmatpush3.xpose.msk.msra.mxu1 %vm179_vm0, %v1179_v27  ;;  %2219 = vmatprep.mubr.msk.f32.mxu1 %vm179_vm0, %v1173_v32 }
 0x839   : > { %2217 = vmatprep.subr.msk.mxu1 %vm179_vm0, %v1177_v33 }
 0x83c   : > { %2218 = vmatpush3.xpose.msk.msra.mxu1 %vm179_vm0, %v1177_v33 }
 0x83f   : > { %2220 = vmatmul.mubr.msk.f32.vlgmr.msra.gmra.mxu1 %vm179_vm0, %v1175_v34 }
 0x8f7   : > { %v2636_v35 = vpop.f32.mrf.mxu1 }
 0x8f9   : > { %v2638_v38 = vpop.f32.mrf.mxu1 }
 0x8fa   : > { %v2323_v39 = vpack.i.bf16 %v2636_v35, %v2638_v38 }
 0x8ff   : > { %v2221_v40 = vpop.f32.mrf.mxu1 }
 0x900   : > { %v1266_v41 = vsel %vm179_vm0, %v2221_v40, -inf }
 0x901   : > { %1267 = vmax.xlane.f32.xlu1 %v1266_v41  ;;  %v1254_v42 = vpop.f32.mrf.mxu1 }
 0x902   : > { %v1263_v43 = vsel %vm179_vm0, %v1254_v42, -inf }
 0x903   : > { %1264 = vmax.xlane.f32.xlu0 %v1263_v43 }
 0x912   : > { %1285 = vrot.lane.b32.xlu1 %v2500_v21, %s2419_s22 }
 0x916   : > { %1378 = vrot.lane.b32.xlu1 %v2459_v0, %s2420_s23 }
 0x91a   : > { %1376 = vrot.lane.b32.xlu1 %v2462_v1, %s2420_s23 }
 0x91e   : > { %1374 = vrot.lane.b32.xlu1 %v2476_v5, %s2420_s23 }
 0x98a   : > { %v1268_v44 = vpop.xlane.xlu1 %1267 }
 0x98b   : > { %v1270_v45 = vsub.f32 %v2221_v40, %v1268_v44 }
 0x98c   : > { %v1265_v46 = vpop.xlane.xlu0 %1264 }
 0x98d   : > { %v1273_v47 = vmul.f32 1.442695, %v1270_v45  ;;  %v1269_v48 = vsub.f32 %v1254_v42, %v1265_v46 }
 0x98e   : > { %v1286_v56 = vpop.permute.xlu1 %1285 }
 0x98f   : > { %2383 = vpow2.f32 %v1273_v47  ;;  %v1271_v49 = vmul.f32 1.442695, %v1269_v48 }
 0x991   : > { %2385 = vpow2.f32 %v1271_v49 }
 0x992   : > { %v1379_v58 = vpop.permute.xlu1 %1378 }
 0x996   : > { %v1377_v9 = vpop.permute.xlu1 %1376 }
 0x99a   : > { %v1375_v10 = vpop.permute.xlu1 %1374 }
 0x99c   : > { %v2384_v50 = vpop.eup %2383 }
 0x99d   : > { %v1278_v51 = vsel %vm179_vm0, %v2384_v50, 0.0 }
 0x99e   : > { %v2386_v52 = vpop.eup %2385  ;;  %1279 = vadd.xlane.f32.xlu0 %v1278_v51 }
 0x99f   : > { %v1275_v53 = vsel %vm179_vm0, %v2386_v52, 0.0 }
 0x9a2   : > { %1276 = vadd.xlane.f32.xlu0 %v1275_v53 }
 0x9b8   : > { %1287 = vrot.lane.b32.xlu0 %v2497_v20, %s2419_s22 }
 0x9bc   : > { %1372 = vrot.lane.b32.xlu0 %v2467_v3, %s2420_s23 }
 0xa27   : > { %v1280_v54 = vpop.xlane.xlu0 %1279 }
 0xa28   : > { %2387 = vrcp.f32 %v1280_v54 }
 0xa2b   : > { %v1277_v55 = vpop.xlane.xlu0 %1276 }
 0xa2c   : > { %2389 = vrcp.f32 %v1277_v55 }
 0xa2f   : > { %v1288_v57 = vpop.permute.xlu0 %1287 }
 0xa30   : > { %2222 = vmatprep.subr.mxu0 %v1288_v57 }
 0xa31   : > { %2223 = vmatpush3.msra.mxu0 %v1288_v57 }
 0xa32   : > { %2224 = vmatprep.subr.mxu0 %v1286_v56 }
 0xa33   : > { %2225 = vmatpush3.msra.mxu0 %v1286_v56  ;;  %v1373_v8 = vpop.permute.xlu0 %1372 }
 0xa34   : > { %2229 = vmatprep.subr.msk.mxu0 %vm179_vm0, %v1379_v58 }
 0xa35   : > { %v2388_v2 = vpop.eup %2387 }
 0xa36   : > { %v1284_v7 = vmul.f32 %v2388_v2, %v2384_v50 }
 0xa39   : > { %v2390_v4 = vpop.eup %2389 }
 0xa3a   : > { %v1283_v6 = vmul.f32 %v2390_v4, %v2386_v52  ;;  %v2308_v52 = vpack.i.bf16 %v2602_v59, %v2604_v60 }
 0xa3c   : > { %2226 = vmatprep.mubr.msk.f32.mxu0 %vm179_vm0, %v1283_v6  ;;  %v1861_v6 = vld [vmem:[%s2790_s1 + $0x68] sm:$0xff] }
 0xa3d   : > { %2227 = vmatmul.mubr.msk.f32.vlgmr.msra.gmra.mxu0 %vm179_vm0, %v1284_v7  ;;  %v1860_v7 = vld [vmem:[%s2790_s1 + $0x60] sm:$0xff] }
 0xa3e   : > { %2230 = vmatpush3.xpose.msk.msra.mxu0 %vm179_vm0, %v1379_v58  ;;  %2233 = vmatprep.mubr.msk.f32.mxu0 %vm179_vm0, %v1373_v8  ;;  %v1859_v8 = vld [vmem:[%s2790_s1 + $0x58] sm:$0xff] }
 0xa3f   : > { %2231 = vmatprep.subr.msk.mxu0 %vm179_vm0, %v1377_v9 }
 0xa42   : > { %2232 = vmatpush3.xpose.msk.msra.mxu0 %vm179_vm0, %v1377_v9  ;;  %v1858_v9 = vld [vmem:[%s2790_s1 + $0x50] sm:$0xff] }
 0xa45   : > { %2234 = vmatmul.mubr.msk.f32.vlgmr.msra.gmra.mxu0 %vm179_vm0, %v1375_v10  ;;  %v1857_v10 = vld [vmem:[%s2790_s1 + $0x48] sm:$0xff] }
 0xafd   : > { %v2666_v11 = vpop.f32.mrf.mxu0 }
 0xaff   : > { %v2668_v12 = vpop.f32.mrf.mxu0 }
 0xb00   : > { %v2328_v13 = vpack.i.bf16 %v2666_v11, %v2668_v12  ;;  %v1856_v11 = vld [vmem:[%s2790_s1 + $0x40] sm:$0xff]  ;;  %v1855_v12 = vld [vmem:[%s2790_s1 + $0x38] sm:$0xff] }
 0xb05   : > { %v2235_v14 = vpop.f32.mrf.mxu0 }
 0xb06   : > { %v1466_v15 = vsel %vm179_vm0, %v2235_v14, -inf }
 0xb07   : > { %1467 = vmax.xlane.f32.xlu1 %v1466_v15  ;;  %v1454_v19 = vpop.f32.mrf.mxu0  ;;  %v1852_v15 = vld [vmem:[%s2790_s1 + $0x20] sm:$0xff] }
 0xb08   : > { %v1463_v22 = vsel %vm179_vm0, %v1454_v19, -inf }
 0xb09   : > { %1464 = vmax.xlane.f32.xlu0 %v1463_v22  ;;  %v1850_v22 = vld [vmem:[%s2790_s1 + $0x10] sm:$0xff] }
 0xb18   : > { %1485 = vrot.lane.b32.xlu1 %v2500_v21, %s2420_s23 }
 0xb1c   : > { %1578 = vrot.lane.b32.xlu1 %v2459_v0, %s2421_s24 }
 0xb20   : > { %1576 = vrot.lane.b32.xlu1 %v2462_v1, %s2421_s24 }
 0xb24   : > { %1574 = vrot.lane.b32.xlu1 %v2476_v5, %s2421_s24 }
 0xb90   : > { %v1468_v23 = vpop.xlane.xlu1 %1467 }
 0xb91   : > { %v1470_v24 = vsub.f32 %v2235_v14, %v1468_v23  ;;  %v1853_v14 = vld [vmem:[%s2790_s1 + $0x28] sm:$0xff] }
 0xb92   : > { %v1465_v25 = vpop.xlane.xlu0 %1464  ;;  %v1849_v23 = vld [vmem:[%s2790_s1 + $0x8] sm:$0xff] }
 0xb93   : > { %v1473_v26 = vmul.f32 1.442695, %v1470_v24  ;;  %v1469_v27 = vsub.f32 %v1454_v19, %v1465_v25  ;;  %v1851_v19 = vld [vmem:[%s2790_s1 + $0x18] sm:$0xff]  ;;  %v1848_v24 = vld [vmem:[%s2790_s1] sm:$0xff] }
 0xb94   : > { %v1486_v32 = vpop.permute.xlu1 %1485 }
 0xb95   : > { %2391 = vpow2.f32 %v1473_v26  ;;  %v1471_v28 = vmul.f32 1.442695, %v1469_v27 }
 0xb97   : > { %2393 = vpow2.f32 %v1471_v28 }
 0xb98   : > { %v1579_v34 = vpop.permute.xlu1 %1578 }
 0xba2   : > { %v2392_v29 = vpop.eup %2391 }
 0xba3   : > { %v1478_v30 = vsel %vm179_vm0, %v2392_v29, 0.0 }
 0xba4   : > { %v2394_v31 = vpop.eup %2393  ;;  %1479 = vadd.xlane.f32.xlu0 %v1478_v30 }
 0xba5   : > { %v1475_v0 = vsel %vm179_vm0, %v2394_v31, 0.0 }
 0xba8   : > { %1476 = vadd.xlane.f32.xlu0 %v1475_v0 }
 0xbbe   : > { %1487 = vrot.lane.b32.xlu0 %v2497_v20, %s2420_s23 }
 0xbc2   : > { %1572 = vrot.lane.b32.xlu0 %v2467_v3, %s2421_s24  ;;  %v1577_v3 = vpop.permute.xlu1 %1576 }
 0xbc6   : > { %v1575_v45 = vpop.permute.xlu1 %1574 }
 0xc2d   : > { %v1480_v1 = vpop.xlane.xlu0 %1479 }
 0xc2e   : > { %2395 = vrcp.f32 %v1480_v1 }
 0xc31   : > { %v1477_v5 = vpop.xlane.xlu0 %1476 }
 0xc32   : > { %2397 = vrcp.f32 %v1477_v5 }
 0xc35   : > { %v1488_v33 = vpop.permute.xlu0 %1487 }
 0xc36   : > { %2236 = vmatprep.subr.mxu1 %v1488_v33 }
 0xc37   : > { %2237 = vmatpush3.msra.mxu1 %v1488_v33 }
 0xc38   : > { %2238 = vmatprep.subr.mxu1 %v1486_v32 }
 0xc39   : > { %2239 = vmatpush3.msra.mxu1 %v1486_v32  ;;  %v1573_v44 = vpop.permute.xlu0 %1572 }
 0xc3a   : > { %2243 = vmatprep.subr.msk.mxu1 %vm179_vm0, %v1579_v34 }
 0xc3b   : > { %v2396_v40 = vpop.eup %2395 }
 0xc3c   : > { %v1484_v43 = vmul.f32 %v2396_v40, %v2392_v29 }
 0xc3f   : > { %v2398_v41 = vpop.eup %2397 }
 0xc40   : > { %v1483_v42 = vmul.f32 %v2398_v41, %v2394_v31 }
 0xc42   : > { %2240 = vmatprep.mubr.msk.f32.mxu1 %vm179_vm0, %v1483_v42 }
 0xc43   : > { %2241 = vmatmul.mubr.msk.f32.vlgmr.msra.gmra.mxu1 %vm179_vm0, %v1484_v43 }
 0xc44   : > { %2244 = vmatpush3.xpose.msk.msra.mxu1 %vm179_vm0, %v1579_v34  ;;  %2247 = vmatprep.mubr.msk.f32.mxu1 %vm179_vm0, %v1573_v44 }
 0xc45   : > { %2245 = vmatprep.subr.msk.mxu1 %vm179_vm0, %v1577_v3 }
 0xc48   : > { %2246 = vmatpush3.xpose.msk.msra.mxu1 %vm179_vm0, %v1577_v3 }
 0xc4b   : > { %2248 = vmatmul.mubr.msk.f32.vlgmr.msra.gmra.mxu1 %vm179_vm0, %v1575_v45 }
 0xd03   : > { %v2242_v46 = vpop.f32.mrf.mxu1 }
 0xd05   : > { %v1563_v47 = vpop.f32.mrf.mxu1 }
 0xd06   : > { %v2333_v53 = vpack.i.bf16 %v2242_v46, %v1563_v47 }
 0xd0b   : > { %v2249_v48 = vpop.f32.mrf.mxu1 }
 0xd0c   : > { %v1666_v49 = vsel %vm179_vm0, %v2249_v48, -inf }
 0xd0d   : > { %1667 = vmax.xlane.f32.xlu1 %v1666_v49  ;;  %v1654_v50 = vpop.f32.mrf.mxu1 }
 0xd0e   : > { %v1663_v51 = vsel %vm179_vm0, %v1654_v50, -inf }
 0xd0f   : > { %1664 = vmax.xlane.f32.xlu0 %v1663_v51 }
 0xd1e   : > { %1685 = vrot.lane.b32.xlu1 %v2500_v21, %s2421_s24 }
 0xd22   : > { %2309 = vrot.lane.b32.xlu1 %v2308_v52, %s2421_s24 }
 0xd26   : > { %2314 = vrot.lane.b32.xlu1 %v2313_v18, %s2420_s23 }
 0xd2a   : > { %2324 = vrot.lane.b32.xlu1 %v2323_v39, %s2418_s21 }
 0xd2e   : > { %2334 = vrot.lane.b32.xlu1 %v2333_v53, %s2416_s19 }
 0xd96   : > { %v1668_v54 = vpop.xlane.xlu1 %1667 }
 0xd97   : > { %v1670_v21 = vsub.f32 %v2249_v48, %v1668_v54 }
 0xd98   : > { %v1665_v55 = vpop.xlane.xlu0 %1664 }
 0xd99   : > { %v1673_v56 = vmul.f32 1.442695, %v1670_v21  ;;  %v1669_v59 = vsub.f32 %v1654_v50, %v1665_v55 }
 0xd9a   : > { %v1686_v58 = vpop.permute.xlu1 %1685 }
 0xd9b   : > { %2399 = vpow2.f32 %v1673_v56  ;;  %v1671_v60 = vmul.f32 1.442695, %v1669_v59 }
 0xd9d   : > { %2401 = vpow2.f32 %v1671_v60 }
 0xd9e   : > { %v2310_v28 = vpop.permute.xlu1 %2309 }
 0xd9f   : > { %v2312_v31 = vunpack.i.h.bf16 %v2310_v28  ;;  %v2311_v0 = vunpack.i.l.bf16 %v2310_v28 }
 0xda1   : > { %v1829_v41 = vsel %vm179_vm0, %v2526_v36, %v2312_v31  ;;  %v1828_v42 = vsel %vm179_vm0, %v2528_v37, %v2311_v0 }
 0xda2   : > { %v2315_v29 = vpop.permute.xlu1 %2314 }
 0xda3   : > { %v2317_v1 = vunpack.i.h.bf16 %v2315_v29  ;;  %v2316_v5 = vunpack.i.l.bf16 %v2315_v29 }
 0xda5   : > { %v1831_v43 = vsel %vm1830_vm1, %v1828_v42, %v2316_v5  ;;  %v1832_v44 = vsel %vm1830_vm1, %v1829_v41, %v2317_v1 }
 0xda6   : > { %v2325_v32 = vpop.permute.xlu1 %2324 }
 0xda7   : > { %v2327_v48 = vunpack.i.h.bf16 %v2325_v32  ;;  %v2326_v49 = vunpack.i.l.bf16 %v2325_v32 }
 0xda8   : > { %v2400_v57 = vpop.eup %2399 }
 0xda9   : > { %v1678_v16 = vsel %vm179_vm0, %v2400_v57, 0.0 }
 0xdaa   : > { %v2402_v17 = vpop.eup %2401  ;;  %1679 = vadd.xlane.f32.xlu0 %v1678_v16  ;;  %v2335_v50 = vpop.permute.xlu1 %2334 }
 0xdab   : > { %v1675_v18 = vsel %vm179_vm0, %v2402_v17, 0.0  ;;  %v2337_v36 = vunpack.i.h.bf16 %v2335_v50  ;;  %v2336_v21 = vunpack.i.l.bf16 %v2335_v50 }
 0xdae   : > { %1676 = vadd.xlane.f32.xlu0 %v1675_v18 }
 0xdc4   : > { %1687 = vrot.lane.b32.xlu0 %v2497_v20, %s2421_s24 }
 0xdc8   : > { %2319 = vrot.lane.b32.xlu0 %v2318_v63, %s2419_s22  ;;  %v1862_v63 = vld [vmem:[%s2790_s1 + $0x70] sm:$0xff] }
 0xdcc   : > { %2329 = vrot.lane.b32.xlu0 %v2328_v13, %s2417_s20  ;;  %v1854_v13 = vld [vmem:[%s2790_s1 + $0x30] sm:$0xff] }
 0xe33   : > { %v1680_v35 = vpop.xlane.xlu0 %1679 }
 0xe34   : > { %2403 = vrcp.f32 %v1680_v35 }
 0xe37   : > { %v1677_v38 = vpop.xlane.xlu0 %1676 }
 0xe38   : > { %2405 = vrcp.f32 %v1677_v38 }
 0xe3b   : > { %v1688_v39 = vpop.permute.xlu0 %1687 }
 0xe3c   : > { %2250 = vmatprep.subr.mxu0 %v1688_v39 }
 0xe3d   : > { %2251 = vmatpush3.msra.mxu0 %v1688_v39 }
 0xe3e   : > { %2252 = vmatprep.subr.mxu0 %v1686_v58 }
 0xe3f   : > { %2253 = vmatpush3.msra.mxu0 %v1686_v58  ;;  %v2320_v30 = vpop.permute.xlu0 %2319 }
 0xe40   : > { %2257 = vmatprep.subr.mxu0 %v1863_v62  ;;  %v2322_v33 = vunpack.i.h.bf16 %v2320_v30  ;;  %v2321_v34 = vunpack.i.l.bf16 %v2320_v30 }
 0xe41   : > { %v2404_v20 = vpop.eup %2403 }
 0xe42   : > { %v1684_v61 = vmul.f32 %v2404_v20, %v2400_v57  ;;  %v1835_v3 = vsel %vm1833_vm2, %v1832_v44, %v2322_v33  ;;  %v1834_v45 = vsel %vm1833_vm2, %v1831_v43, %v2321_v34 }
 0xe43   : > { %v2330_v40 = vpop.permute.xlu0 %2329  ;;  %v1838_v51 = vsel %vm1836_vm3, %v1835_v3, %v2327_v48  ;;  %v1837_v52 = vsel %vm1836_vm3, %v1834_v45, %v2326_v49 }
 0xe44   : > { %v2332_v46 = vunpack.i.h.bf16 %v2330_v40  ;;  %v2331_v47 = vunpack.i.l.bf16 %v2330_v40 }
 0xe45   : > { %v2406_v2 = vpop.eup %2405 }
 0xe46   : > { %v1683_v4 = vmul.f32 %v2406_v2, %v2402_v17  ;;  %v1841_v53 = vsel %vm1839_vm4, %v1838_v51, %v2332_v46  ;;  %v1840_v54 = vsel %vm1839_vm4, %v1837_v52, %v2331_v47  ;;  %v2059_v17 = vld [vmem:[%s2791_s2] ss:$0 sm:$0xff] }
 0xe47   : > { %v1843_v59 = vsel %vm1842_vm5, %v1840_v54, %v2336_v21  ;;  %v1844_v60 = vsel %vm1842_vm5, %v1841_v53, %v2337_v36 }
 0xe48   : > { %2254 = vmatprep.mubr.msk.f32.mxu0 %vm179_vm0, %v1683_v4 }
 0xe49   : > { %2255 = vmatmul.mubr.msk.f32.vlgmr.msra.gmra.mxu0 %vm179_vm0, %v1684_v61 }
 0xe4a   : > { %2258 = vmatpush3.msra.mxu0 %v1863_v62 }
 0xe4b   : > { %2259 = vmatprep.subr.mxu0 %v1862_v63 }
 0xe4c   : > { %2260 = vmatpush3.msra.mxu0 %v1862_v63 }
 0xe4d   : > { %2261 = vmatprep.subr.mxu0 %v1861_v6 }
 0xe4e   : > { %2262 = vmatpush3.msra.mxu0 %v1861_v6 }
 0xe4f   : > { %2263 = vmatprep.subr.mxu0 %v1860_v7 }
 0xe50   : > { %2264 = vmatpush3.msra.mxu0 %v1860_v7 }
 0xe51   : > { %2265 = vmatprep.subr.mxu0 %v1859_v8 }
 0xe52   : > { %2266 = vmatpush3.msra.mxu0 %v1859_v8 }
 0xe53   : > { %2267 = vmatprep.subr.mxu0 %v1858_v9 }
 0xe54   : > { %2268 = vmatpush3.msra.mxu0 %v1858_v9 }
 0xe55   : > { %2269 = vmatprep.subr.mxu0 %v1857_v10 }
 0xe56   : > { %2270 = vmatpush3.msra.mxu0 %v1857_v10 }
 0xe57   : > { %2271 = vmatprep.subr.mxu0 %v1856_v11 }
 0xe58   : > { %2272 = vmatpush3.msra.mxu0 %v1856_v11 }
 0xe59   : > { %2273 = vmatprep.subr.mxu0 %v1855_v12 }
 0xe5a   : > { %2274 = vmatpush3.msra.mxu0 %v1855_v12 }
 0xe5b   : > { %2275 = vmatprep.subr.mxu0 %v1854_v13 }
 0xe5c   : > { %2276 = vmatpush3.msra.mxu0 %v1854_v13 }
 0xe5d   : > { %2277 = vmatprep.subr.mxu0 %v1853_v14 }
 0xe5e   : > { %2278 = vmatpush3.msra.mxu0 %v1853_v14 }
 0xe5f   : > { %2279 = vmatprep.subr.mxu0 %v1852_v15 }
 0xe60   : > { %2280 = vmatpush3.msra.mxu0 %v1852_v15 }
 0xe61   : > { %2281 = vmatprep.subr.mxu0 %v1851_v19 }
 0xe62   : > { %2282 = vmatpush3.msra.mxu0 %v1851_v19 }
 0xe63   : > { %2283 = vmatprep.subr.mxu0 %v1850_v22 }
 0xe64   : > { %2284 = vmatpush3.msra.mxu0 %v1850_v22 }
 0xe65   : > { %2285 = vmatprep.subr.mxu0 %v1849_v23 }
 0xe66   : > { %2286 = vmatpush3.msra.mxu0 %v1849_v23 }
 0xe67   : > { %2287 = vmatprep.subr.mxu0 %v1848_v24 }
 0xe68   : > { %2288 = vmatpush3.msra.mxu0 %v1848_v24 }
 0xf09   : > { %v2256_v25 = vpop.f32.mrf.mxu0 }
 0xf0b   : > { %v1763_v26 = vpop.f32.mrf.mxu0 }
 0xf0c   : > { %v2338_v27 = vpack.i.bf16 %v2256_v25, %v1763_v26 }
 0xf0e   : > { %2339 = vrot.lane.b32.xlu0 %v2338_v27, %s2415_s18  ;;  %s2062_s18 = sshll.u32 %s2794_s13, 4 }
 0xf0f   : > { %s170_s10 = scalar_lea.vmem %s2792_s3, %s2062_s18 }
 0xf80   : > { %v2340_v37 = vpop.permute.xlu0 %2339 }
 0xf81   : > { %v2342_v55 = vunpack.i.h.bf16 %v2340_v37  ;;  %v2341_v56 = vunpack.i.l.bf16 %v2340_v37 }
 0xf83   : > { %v1846_v57 = vsel %vm1845_vm6, %v1843_v59, %v2341_v56  ;;  %v1847_v16 = vsel %vm1845_vm6, %v1844_v60, %v2342_v55 }
 0xf84   : > { %2289 = vmatprep.mubr.f32.mxu0 %v1846_v57 }
 0xf85   : > { %2290 = vmatmul.mubr.f32.vlgmr.msra.gmra.mxu0 %v1847_v16 }
0x1045   : > { %v2291_v18 = vpop.f32.mrf.mxu0 }
0x1046   : > { %v1943_v35 = vadd.f32 %v2291_v18, %v2059_v17 }
0x1047   : > { %v1937_v38 = vpop.f32.mrf.mxu0 }
0x1048   : > { %1947 = vst [vmem:[%s170_s10 + $0x8] sm:$0xff] %v1943_v35  ;;  %v1938_v39 = vadd.f32 %v2059_v17, %v1937_v38 }
0x104a   : > { %1946 = vst [vmem:[%s170_s10] sm:$0xff] %v1938_v39 }
0x104b PF: > { %s13_s12 = sadd.s32 1, %s2413_s12  }
0x104c   : > { %p10_p4 = scmp.ge.s32.totalorder %s13_s12, 4  }
0x104e   :  { %12 = sbr.rel (!%p10_p4) target bundleno = 1 (0x1), region = 62 }

</bundles_post_ra>
